<compile_context>
chip_gen: v7x
topology: tpu7x:2x2x1
jax: 0.10.0
libtpu: 0.0.40
codegen_flags: <defaults>
</compile_context>

<pallas_src>
import math

import jax
import jax.numpy as jnp
from jax.experimental import pallas as pl
from jax.experimental.pallas import tpu as pltpu  # noqa: F401  (kept for TPU-specific tuning hooks)

# ---------------- configuration (small, consistent with the module) ----------
B = 2            # batch
H = W = 8        # spatial feature size
L = H * W        # tokens per batch element
C = 32           # embed dim
NUM_HEADS = 4
HEAD_DIM = C // NUM_HEADS
WIN = 4          # window_size M
N = WIN * WIN    # tokens per window
MLP_RATIO = 4
HIDDEN = C * MLP_RATIO
EPS = 1e-5
SCALE = HEAD_DIM ** (-0.5)
SQRT2 = math.sqrt(2.0)
NEG_INF = -1e9
VEC_W = 128      # lane width of the packed small-vector slab
assert HIDDEN <= VEC_W and 3 * C <= VEC_W

# static lane offsets inside the packed weight slab  [Wqkv | Wproj | W1]
_OFF_QKV = 0
_OFF_PROJ = 3 * C
_OFF_W1 = 4 * C
_WMAT_W = 4 * C + HIDDEN          # 256


# ---------------- fused Pallas kernel -----------------------------------------
def _swin_block_kernel(x_ref, vec_ref, wmat_ref, w2_ref, abias_ref, o_ref):
    # x_ref: (B*L, C) — all 128 token rows, natural (row-major) token order.
    # Window structure is handled purely by the additive bias matrix
    # abias_ref (rel-pos bias inside a window, -1e9 outside), so no
    # window_partition / window_reverse exists anywhere.
    x = x_ref[...]                                           # (128, C) f32

    # ---- unpack the consolidated parameter slabs (static slices) ----
    vecs = vec_ref[...]                                      # (8, 128)
    g1 = vecs[0:1, :C]
    b1 = vecs[1:2, :C]
    bqkv = vecs[2:3, :3 * C]                                 # scale already folded in
    bproj = vecs[3:4, :C]
    g2 = vecs[4:5, :C]
    b2 = vecs[5:6, :C]
    bf1 = vecs[6:7, :HIDDEN]
    bf2 = vecs[7:8, :C]

    wmat = wmat_ref[...]                                     # (C, 256)
    wqkv = wmat[:, _OFF_QKV:_OFF_QKV + 3 * C]                # (C, 3C), scale folded into Wq cols
    wproj = wmat[:, _OFF_PROJ:_OFF_PROJ + C]                 # (C, C)
    w1 = wmat[:, _OFF_W1:_OFF_W1 + HIDDEN]                   # (C, HIDDEN)

    # ---- norm1 (LayerNorm over C; per-token, order independent) ----
    mu = jnp.mean(x, axis=-1, keepdims=True)
    var = jnp.mean((x - mu) * (x - mu), axis=-1, keepdims=True)
    xn = (x - mu) * jax.lax.rsqrt(var + EPS) * g1 + b1

    # ---- fused QKV projection: one (128, C) @ (C, 3C) MXU push ----
    qkv = jnp.dot(xn, wqkv, preferred_element_type=jnp.float32) + bqkv   # (128, 3C)

    # ---- W-MSA as dense masked attention; short unrolled loop over batch ----
    outs = []
    for bi in range(B):                                      # B = 2, unrolled
        r0 = bi * L
        # First residual + proj bias folded into the accumulator init.
        acc = x[r0:r0 + L, :] + bproj                        # (L, C)
        for h in range(NUM_HEADS):                           # 4 heads, unrolled
            c0 = h * HEAD_DIM
            q = qkv[r0:r0 + L, c0:c0 + HEAD_DIM]                         # (L, D), pre-scaled
            k = qkv[r0:r0 + L, C + c0:C + c0 + HEAD_DIM]                 # (L, D)
            v = qkv[r0:r0 + L, 2 * C + c0:2 * C + c0 + HEAD_DIM]         # (L, D)

            # scores: (L, L); bias carries rel-pos bias / -1e9 same-window mask
            s = jax.lax.dot_general(q, k, (((1,), (1,)), ((), ())),
                                    preferred_element_type=jnp.float32)
            s = s + abias_ref[h]

            # softmax (masked entries underflow to exactly 0 after exp)
            m = jnp.max(s, axis=-1, keepdims=True)
            p = jnp.exp(s - m)
            denom = jnp.sum(p, axis=-1, keepdims=True)
            p = p * pl.reciprocal(denom, approx=True)

            # fold head output straight into the proj matmul:
            # (P @ V) @ Wproj_h == P @ (V @ Wproj_h); no concat of head outputs.
            vproj = jnp.dot(v, wproj[c0:c0 + HEAD_DIM, :],
                            preferred_element_type=jnp.float32)          # (L, C)
            acc = acc + jnp.dot(p, vproj, preferred_element_type=jnp.float32)
        outs.append(acc)
    y = jnp.concatenate(outs, axis=0)                        # (128, C) = x + attn + bproj

    # ---- norm2 + MLP (fc1 -> exact GELU -> fc2) + second residual ----
    mu2 = jnp.mean(y, axis=-1, keepdims=True)
    var2 = jnp.mean((y - mu2) * (y - mu2), axis=-1, keepdims=True)
    yn = (y - mu2) * jax.lax.rsqrt(var2 + EPS) * g2 + b2

    hid = jnp.dot(yn, w1, preferred_element_type=jnp.float32) + bf1      # (128, HIDDEN)
    hid = 0.5 * hid * (1.0 + jax.lax.erf(hid * (1.0 / SQRT2)))           # exact GELU (matches nn.GELU)
    out = jnp.dot(hid, w2_ref[...], preferred_element_type=jnp.float32) + bf2

    o_ref[...] = y + out                                     # one lane-dense slab store


# Rough advisory cost for XLA's scheduler.
_FLOPS = 2 * (B * L * C * 3 * C
              + B * NUM_HEADS * (L * HEAD_DIM * L + L * HEAD_DIM * C + L * L * C)
              + B * L * C * HIDDEN + B * L * HIDDEN * C)
_TRANS = B * NUM_HEADS * L * L + B * NUM_HEADS * L + B * L * HIDDEN + 2 * B * L
_BYTES = 4 * (2 * B * L * C + 8 * VEC_W + C * _WMAT_W + HIDDEN * C + NUM_HEADS * L * L)


@jax.jit
def swin_block_forward(x, kp):
    # x: (B, L, C)
    b, l, c = x.shape
    out = pl.pallas_call(
        _swin_block_kernel,
        out_shape=jax.ShapeDtypeStruct((b * l, c), jnp.float32),
        cost_estimate=pl.CostEstimate(flops=_FLOPS, transcendentals=_TRANS,
                                      bytes_accessed=_BYTES),
    )(x.reshape(b * l, c), kp["vecs"], kp["wmat"], kp["w2"], kp["attn_bias"])
    return out.reshape(b, l, c)


# ---------------- window partition / reverse (only used by the reference) -----
def window_partition(x):
    # x: (B, H, W, C) -> (nWB, N, C)
    bb = x.shape[0]
    x = x.reshape(bb, H // WIN, WIN, W // WIN, WIN, C)
    x = x.transpose(0, 1, 3, 2, 4, 5)
    return x.reshape(-1, N, C)


def window_reverse(wins):
    # wins: (nWB, N, C) -> (B, H, W, C)
    bb = wins.shape[0] // ((H // WIN) * (W // WIN))
    x = wins.reshape(bb, H // WIN, W // WIN, WIN, WIN, C)
    x = x.transpose(0, 1, 3, 2, 4, 5)
    return x.reshape(bb, H, W, C)


# ---------------- deterministic parameter init (raw, PyTorch-faithful) --------
def make_params(key):
    ks = jax.random.split(key, 8)
    p = {}
    p["g1"] = jnp.ones((C,), jnp.float32)
    p["b1"] = jnp.zeros((C,), jnp.float32)
    p["g2"] = jnp.ones((C,), jnp.float32)
    p["b2"] = jnp.zeros((C,), jnp.float32)
    p["wqkv"] = (0.02 * jax.random.normal(ks[0], (C, 3 * C))).astype(jnp.float32)
    p["bqkv"] = (0.02 * jax.random.normal(ks[1], (3 * C,))).astype(jnp.float32)
    p["wproj"] = (0.02 * jax.random.normal(ks[2], (C, C))).astype(jnp.float32)
    p["bproj"] = jnp.zeros((C,), jnp.float32)
    p["w1"] = (0.02 * jax.random.normal(ks[3], (C, HIDDEN))).astype(jnp.float32)
    p["bf1"] = jnp.zeros((HIDDEN,), jnp.float32)
    p["w2"] = (0.02 * jax.random.normal(ks[4], (HIDDEN, C))).astype(jnp.float32)
    p["bf2"] = jnp.zeros((C,), jnp.float32)

    # relative position bias table -> gathered (num_heads, N, N) bias (as PyTorch)
    table = (0.02 * jax.random.truncated_normal(
        ks[5], -2.0, 2.0,
        ((2 * WIN - 1) * (2 * WIN - 1), NUM_HEADS))).astype(jnp.float32)
    coords = jnp.stack(jnp.meshgrid(jnp.arange(WIN), jnp.arange(WIN), indexing="ij"))
    flat = coords.reshape(2, -1)                             # (2, N)
    rel = flat[:, :, None] - flat[:, None, :]                # (2, N, N)
    rel = rel.transpose(1, 2, 0)
    rel = rel.at[:, :, 0].add(WIN - 1)
    rel = rel.at[:, :, 1].add(WIN - 1)
    rel = rel.at[:, :, 0].multiply(2 * WIN - 1)
    rel_index = rel.sum(-1)                                  # (N, N)
    relbias = table[rel_index.reshape(-1)].reshape(N, N, NUM_HEADS).transpose(2, 0, 1)
    p["relbias"] = relbias.astype(jnp.float32)               # (NH, N, N) for reference
    return p


# ---------------- kernel-side parameter packing (done once, at prep time) ------
def pack_params(p):
    kp = {}

    # Fold the attention scale into Wq / bq (constant fold, not a runtime op).
    wqkv_s = p["wqkv"].at[:, :C].multiply(SCALE)
    bqkv_s = p["bqkv"].at[:C].multiply(SCALE)

    # One (C, 256) weight slab: [Wqkv | Wproj | W1]; W2 stays separate.
    kp["wmat"] = jnp.concatenate([wqkv_s, p["wproj"], p["w1"]], axis=1).astype(jnp.float32)
    kp["w2"] = p["w2"].astype(jnp.float32)

    # One (8, 128) slab for the eight small vectors (each row zero-padded).
    def pad_row(v):
        return jnp.pad(v, (0, VEC_W - v.shape[0])).reshape(1, VEC_W)
    kp["vecs"] = jnp.concatenate(
        [pad_row(p["g1"]), pad_row(p["b1"]), pad_row(bqkv_s), pad_row(p["bproj"]),
         pad_row(p["g2"]), pad_row(p["b2"]), pad_row(p["bf1"]), pad_row(p["bf2"])],
        axis=0).astype(jnp.float32)

    # Dense (NH, L, L) additive bias in NATURAL token order:
    #   rel-pos bias where tokens i, j share a window; -1e9 elsewhere.
    # Identical for every batch element, so the kernel needs no window permute.
    hh, ww = jnp.meshgrid(jnp.arange(H), jnp.arange(W), indexing="ij")
    hh = hh.reshape(-1)
    ww = ww.reshape(-1)                                      # (L,)
    win_id = (hh // WIN) * (W // WIN) + (ww // WIN)          # (L,)
    local = (hh % WIN) * WIN + (ww % WIN)                    # (L,)
    same = win_id[:, None] == win_id[None, :]                # (L, L)
    bias_full = p["relbias"][:, local[:, None], local[None, :]]   # (NH, L, L)
    kp["attn_bias"] = jnp.where(same[None, :, :], bias_full, NEG_INF).astype(jnp.float32)
    return kp


# ---------------- pure-JAX reference (faithful port, W-MSA path) ----------------
def reference_forward(x, p):
    def ln(v, g, b):
        mu = v.mean(-1, keepdims=True)
        var = ((v - mu) ** 2).mean(-1, keepdims=True)
        return (v - mu) / jnp.sqrt(var + EPS) * g + b

    b, l, c = x.shape
    xn = ln(x, p["g1"], p["b1"])
    xw = window_partition(xn.reshape(b, H, W, c))            # (nWB, N, C)
    qkv = xw @ p["wqkv"] + p["bqkv"]
    qkv = qkv.reshape(-1, N, 3, NUM_HEADS, HEAD_DIM).transpose(2, 0, 3, 1, 4)
    q, k, v = qkv[0] * SCALE, qkv[1], qkv[2]
    attn = jnp.einsum("bhnd,bhmd->bhnm", q, k) + p["relbias"][None]
    attn = jax.nn.softmax(attn, -1)
    out = jnp.einsum("bhnm,bhmd->bhnd", attn, v).transpose(0, 2, 1, 3).reshape(-1, N, c)
    out = out @ p["wproj"] + p["bproj"]
    y = x + window_reverse(out).reshape(b, l, c)
    yn = ln(y, p["g2"], p["b2"])
    hmid = yn @ p["w1"] + p["bf1"]
    hmid = 0.5 * hmid * (1.0 + jax.lax.erf(hmid / SQRT2))
    return y + (hmid @ p["w2"] + p["bf2"])


if __name__ == "__main__":
    key = jax.random.PRNGKey(0)
    kx, kparam = jax.random.split(key)
    x = jax.random.normal(kx, (B, L, C), dtype=jnp.float32)
    params = make_params(kparam)
    kernel_params = pack_params(params)

    out = swin_block_forward(x, kernel_params)
    out = jax.block_until_ready(out)

    ref = reference_forward(x, params)
    assert out.shape == (B, L, C)
    # tolerance loosened slightly for pl.reciprocal(approx=True) in the softmax
    assert jnp.allclose(out, ref, atol=1e-3, rtol=1e-3), "mismatch vs reference"
    print("KERNEL_OK")
</pallas_src>

<mosaic_0001>
module attributes {stable_mosaic.version = 11 : i64} {
  func.func @_swin_block_kernel(%arg0: memref<128x32xf32, #tpu.memory_space<vmem>>, %arg1: memref<8x128xf32, #tpu.memory_space<vmem>>, %arg2: memref<32x256xf32, #tpu.memory_space<vmem>>, %arg3: memref<128x32xf32, #tpu.memory_space<vmem>>, %arg4: memref<4x64x64xf32, #tpu.memory_space<vmem>>, %arg5: memref<128x32xf32, #tpu.memory_space<vmem>>) attributes {dimension_semantics = [], scalar_prefetch = 0 : i64, scratch_operands = 0 : i64, tpu.core_type = #tpu.core_type<tc>} {
    %c0 = arith.constant 0 : index
    %c0_0 = arith.constant 0 : index
    %0 = vector.load %arg0[%c0, %c0_0] : memref<128x32xf32, #tpu.memory_space<vmem>>, vector<128x32xf32>
    %c0_1 = arith.constant 0 : index
    %c0_2 = arith.constant 0 : index
    %1 = vector.load %arg1[%c0_1, %c0_2] : memref<8x128xf32, #tpu.memory_space<vmem>>, vector<8x128xf32>
    %2 = vector.extract_strided_slice %1 {offsets = [0, 0], sizes = [1, 32], strides = [1, 1]} : vector<8x128xf32> to vector<1x32xf32>
    %3 = vector.extract_strided_slice %1 {offsets = [1, 0], sizes = [1, 32], strides = [1, 1]} : vector<8x128xf32> to vector<1x32xf32>
    %4 = vector.extract_strided_slice %1 {offsets = [2, 0], sizes = [1, 96], strides = [1, 1]} : vector<8x128xf32> to vector<1x96xf32>
    %5 = vector.extract_strided_slice %1 {offsets = [3, 0], sizes = [1, 32], strides = [1, 1]} : vector<8x128xf32> to vector<1x32xf32>
    %6 = vector.extract_strided_slice %1 {offsets = [4, 0], sizes = [1, 32], strides = [1, 1]} : vector<8x128xf32> to vector<1x32xf32>
    %7 = vector.extract_strided_slice %1 {offsets = [5, 0], sizes = [1, 32], strides = [1, 1]} : vector<8x128xf32> to vector<1x32xf32>
    %8 = vector.extract_strided_slice %1 {offsets = [6, 0], sizes = [1, 128], strides = [1, 1]} : vector<8x128xf32> to vector<1x128xf32>
    %9 = vector.extract_strided_slice %1 {offsets = [7, 0], sizes = [1, 32], strides = [1, 1]} : vector<8x128xf32> to vector<1x32xf32>
    %c0_3 = arith.constant 0 : index
    %c0_4 = arith.constant 0 : index
    %10 = vector.load %arg2[%c0_3, %c0_4] : memref<32x256xf32, #tpu.memory_space<vmem>>, vector<32x256xf32>
    %11 = vector.extract_strided_slice %10 {offsets = [0, 0], sizes = [32, 96], strides = [1, 1]} : vector<32x256xf32> to vector<32x96xf32>
    %12 = vector.extract_strided_slice %10 {offsets = [0, 96], sizes = [32, 32], strides = [1, 1]} : vector<32x256xf32> to vector<32x32xf32>
    %13 = vector.extract_strided_slice %10 {offsets = [0, 128], sizes = [32, 128], strides = [1, 1]} : vector<32x256xf32> to vector<32x128xf32>
    %cst = arith.constant dense<0.000000e+00> : vector<128xf32>
    %14 = vector.multi_reduction <add>, %0, %cst [1] : vector<128x32xf32> to vector<128xf32>
    %15 = vector.shape_cast %14 : vector<128xf32> to vector<128x1xf32>
    %cst_5 = arith.constant 3.200000e+01 : f32
    %16 = vector.broadcast %cst_5 : f32 to vector<128x1xf32>
    %17 = arith.divf %15, %16 : vector<128x1xf32>
    %18 = vector.broadcast %17 : vector<128x1xf32> to vector<128x32xf32>
    %19 = arith.subf %0, %18 : vector<128x32xf32>
    %20 = vector.broadcast %17 : vector<128x1xf32> to vector<128x32xf32>
    %21 = arith.subf %0, %20 : vector<128x32xf32>
    %22 = arith.mulf %19, %21 : vector<128x32xf32>
    %cst_6 = arith.constant dense<0.000000e+00> : vector<128xf32>
    %23 = vector.multi_reduction <add>, %22, %cst_6 [1] : vector<128x32xf32> to vector<128xf32>
    %24 = vector.shape_cast %23 : vector<128xf32> to vector<128x1xf32>
    %cst_7 = arith.constant 3.200000e+01 : f32
    %25 = vector.broadcast %cst_7 : f32 to vector<128x1xf32>
    %26 = arith.divf %24, %25 : vector<128x1xf32>
    %27 = vector.broadcast %17 : vector<128x1xf32> to vector<128x32xf32>
    %28 = arith.subf %0, %27 : vector<128x32xf32>
    %cst_8 = arith.constant 9.99999974E-6 : f32
    %29 = vector.broadcast %cst_8 : f32 to vector<128x1xf32>
    %30 = arith.addf %26, %29 : vector<128x1xf32>
    %31 = math.rsqrt %30 : vector<128x1xf32>
    %32 = vector.broadcast %31 : vector<128x1xf32> to vector<128x32xf32>
    %33 = arith.mulf %28, %32 : vector<128x32xf32>
    %34 = vector.broadcast %2 : vector<1x32xf32> to vector<128x32xf32>
    %35 = arith.mulf %33, %34 : vector<128x32xf32>
    %36 = vector.broadcast %3 : vector<1x32xf32> to vector<128x32xf32>
    %37 = arith.addf %35, %36 : vector<128x32xf32>
    %cst_9 = arith.constant dense<0.000000e+00> : vector<128x96xf32>
    %38 = tpu.matmul %37, %11, %cst_9 {dimension_numbers = #tpu.dot_dimension_numbers<[1], [0], [0], [1], [0, 0, 1, 1], [], []>} : vector<128x32xf32>, vector<32x96xf32>, vector<128x96xf32> -> vector<128x96xf32>
    %39 = vector.broadcast %4 : vector<1x96xf32> to vector<128x96xf32>
    %40 = arith.addf %38, %39 : vector<128x96xf32>
    %41 = vector.extract_strided_slice %0 {offsets = [0, 0], sizes = [64, 32], strides = [1, 1]} : vector<128x32xf32> to vector<64x32xf32>
    %42 = vector.broadcast %5 : vector<1x32xf32> to vector<64x32xf32>
    %43 = arith.addf %41, %42 : vector<64x32xf32>
    %44 = vector.extract_strided_slice %40 {offsets = [0, 0], sizes = [64, 8], strides = [1, 1]} : vector<128x96xf32> to vector<64x8xf32>
    %45 = vector.extract_strided_slice %40 {offsets = [0, 32], sizes = [64, 8], strides = [1, 1]} : vector<128x96xf32> to vector<64x8xf32>
    %46 = vector.extract_strided_slice %40 {offsets = [0, 64], sizes = [64, 8], strides = [1, 1]} : vector<128x96xf32> to vector<64x8xf32>
    %cst_10 = arith.constant dense<0.000000e+00> : vector<64x64xf32>
    %47 = tpu.matmul %44, %45, %cst_10 {dimension_numbers = #tpu.dot_dimension_numbers<[1], [1], [0], [0], [0, 0, 1, 0], [], []>} : vector<64x8xf32>, vector<64x8xf32>, vector<64x64xf32> -> vector<64x64xf32>
    %c0_11 = arith.constant 0 : index
    %c0_12 = arith.constant 0 : index
    %c0_13 = arith.constant 0 : index
    %48 = vector.load %arg4[%c0_11, %c0_12, %c0_13] : memref<4x64x64xf32, #tpu.memory_space<vmem>>, vector<1x64x64xf32>
    %49 = vector.shape_cast %48 : vector<1x64x64xf32> to vector<64x64xf32>
    %50 = arith.addf %47, %49 : vector<64x64xf32>
    %cst_14 = arith.constant dense<0xFF800000> : vector<64xf32>
    %51 = vector.multi_reduction <maximumf>, %50, %cst_14 [1] : vector<64x64xf32> to vector<64xf32>
    %52 = vector.shape_cast %51 : vector<64xf32> to vector<64x1xf32>
    %53 = vector.broadcast %52 : vector<64x1xf32> to vector<64x64xf32>
    %54 = arith.subf %50, %53 : vector<64x64xf32>
    %55 = math.exp %54 : vector<64x64xf32>
    %cst_15 = arith.constant dense<0.000000e+00> : vector<64xf32>
    %56 = vector.multi_reduction <add>, %55, %cst_15 [1] : vector<64x64xf32> to vector<64xf32>
    %57 = vector.shape_cast %56 : vector<64xf32> to vector<64x1xf32>
    %58 = tpu.reciprocal %57 {approx = true} : vector<64x1xf32> -> vector<64x1xf32>
    %59 = vector.broadcast %58 : vector<64x1xf32> to vector<64x64xf32>
    %60 = arith.mulf %55, %59 : vector<64x64xf32>
    %61 = vector.extract_strided_slice %12 {offsets = [0, 0], sizes = [8, 32], strides = [1, 1]} : vector<32x32xf32> to vector<8x32xf32>
    %cst_16 = arith.constant dense<0.000000e+00> : vector<64x32xf32>
    %62 = tpu.matmul %46, %61, %cst_16 {dimension_numbers = #tpu.dot_dimension_numbers<[1], [0], [0], [1], [0, 0, 1, 1], [], []>} : vector<64x8xf32>, vector<8x32xf32>, vector<64x32xf32> -> vector<64x32xf32>
    %cst_17 = arith.constant dense<0.000000e+00> : vector<64x32xf32>
    %63 = tpu.matmul %60, %62, %cst_17 {dimension_numbers = #tpu.dot_dimension_numbers<[1], [0], [0], [1], [0, 0, 1, 1], [], []>} : vector<64x64xf32>, vector<64x32xf32>, vector<64x32xf32> -> vector<64x32xf32>
    %64 = arith.addf %43, %63 : vector<64x32xf32>
    %65 = vector.extract_strided_slice %40 {offsets = [0, 8], sizes = [64, 8], strides = [1, 1]} : vector<128x96xf32> to vector<64x8xf32>
    %66 = vector.extract_strided_slice %40 {offsets = [0, 40], sizes = [64, 8], strides = [1, 1]} : vector<128x96xf32> to vector<64x8xf32>
    %67 = vector.extract_strided_slice %40 {offsets = [0, 72], sizes = [64, 8], strides = [1, 1]} : vector<128x96xf32> to vector<64x8xf32>
    %cst_18 = arith.constant dense<0.000000e+00> : vector<64x64xf32>
    %68 = tpu.matmul %65, %66, %cst_18 {dimension_numbers = #tpu.dot_dimension_numbers<[1], [1], [0], [0], [0, 0, 1, 0], [], []>} : vector<64x8xf32>, vector<64x8xf32>, vector<64x64xf32> -> vector<64x64xf32>
    %c1 = arith.constant 1 : index
    %c0_19 = arith.constant 0 : index
    %c0_20 = arith.constant 0 : index
    %69 = vector.load %arg4[%c1, %c0_19, %c0_20] : memref<4x64x64xf32, #tpu.memory_space<vmem>>, vector<1x64x64xf32>
    %70 = vector.shape_cast %69 : vector<1x64x64xf32> to vector<64x64xf32>
    %71 = arith.addf %68, %70 : vector<64x64xf32>
    %cst_21 = arith.constant dense<0xFF800000> : vector<64xf32>
    %72 = vector.multi_reduction <maximumf>, %71, %cst_21 [1] : vector<64x64xf32> to vector<64xf32>
    %73 = vector.shape_cast %72 : vector<64xf32> to vector<64x1xf32>
    %74 = vector.broadcast %73 : vector<64x1xf32> to vector<64x64xf32>
    %75 = arith.subf %71, %74 : vector<64x64xf32>
    %76 = math.exp %75 : vector<64x64xf32>
    %cst_22 = arith.constant dense<0.000000e+00> : vector<64xf32>
    %77 = vector.multi_reduction <add>, %76, %cst_22 [1] : vector<64x64xf32> to vector<64xf32>
    %78 = vector.shape_cast %77 : vector<64xf32> to vector<64x1xf32>
    %79 = tpu.reciprocal %78 {approx = true} : vector<64x1xf32> -> vector<64x1xf32>
    %80 = vector.broadcast %79 : vector<64x1xf32> to vector<64x64xf32>
    %81 = arith.mulf %76, %80 : vector<64x64xf32>
    %82 = vector.extract_strided_slice %12 {offsets = [8, 0], sizes = [8, 32], strides = [1, 1]} : vector<32x32xf32> to vector<8x32xf32>
    %cst_23 = arith.constant dense<0.000000e+00> : vector<64x32xf32>
    %83 = tpu.matmul %67, %82, %cst_23 {dimension_numbers = #tpu.dot_dimension_numbers<[1], [0], [0], [1], [0, 0, 1, 1], [], []>} : vector<64x8xf32>, vector<8x32xf32>, vector<64x32xf32> -> vector<64x32xf32>
    %cst_24 = arith.constant dense<0.000000e+00> : vector<64x32xf32>
    %84 = tpu.matmul %81, %83, %cst_24 {dimension_numbers = #tpu.dot_dimension_numbers<[1], [0], [0], [1], [0, 0, 1, 1], [], []>} : vector<64x64xf32>, vector<64x32xf32>, vector<64x32xf32> -> vector<64x32xf32>
    %85 = arith.addf %64, %84 : vector<64x32xf32>
    %86 = vector.extract_strided_slice %40 {offsets = [0, 16], sizes = [64, 8], strides = [1, 1]} : vector<128x96xf32> to vector<64x8xf32>
    %87 = vector.extract_strided_slice %40 {offsets = [0, 48], sizes = [64, 8], strides = [1, 1]} : vector<128x96xf32> to vector<64x8xf32>
    %88 = vector.extract_strided_slice %40 {offsets = [0, 80], sizes = [64, 8], strides = [1, 1]} : vector<128x96xf32> to vector<64x8xf32>
    %cst_25 = arith.constant dense<0.000000e+00> : vector<64x64xf32>
    %89 = tpu.matmul %86, %87, %cst_25 {dimension_numbers = #tpu.dot_dimension_numbers<[1], [1], [0], [0], [0, 0, 1, 0], [], []>} : vector<64x8xf32>, vector<64x8xf32>, vector<64x64xf32> -> vector<64x64xf32>
    %c2 = arith.constant 2 : index
    %c0_26 = arith.constant 0 : index
    %c0_27 = arith.constant 0 : index
    %90 = vector.load %arg4[%c2, %c0_26, %c0_27] : memref<4x64x64xf32, #tpu.memory_space<vmem>>, vector<1x64x64xf32>
    %91 = vector.shape_cast %90 : vector<1x64x64xf32> to vector<64x64xf32>
    %92 = arith.addf %89, %91 : vector<64x64xf32>
    %cst_28 = arith.constant dense<0xFF800000> : vector<64xf32>
    %93 = vector.multi_reduction <maximumf>, %92, %cst_28 [1] : vector<64x64xf32> to vector<64xf32>
    %94 = vector.shape_cast %93 : vector<64xf32> to vector<64x1xf32>
    %95 = vector.broadcast %94 : vector<64x1xf32> to vector<64x64xf32>
    %96 = arith.subf %92, %95 : vector<64x64xf32>
    %97 = math.exp %96 : vector<64x64xf32>
    %cst_29 = arith.constant dense<0.000000e+00> : vector<64xf32>
    %98 = vector.multi_reduction <add>, %97, %cst_29 [1] : vector<64x64xf32> to vector<64xf32>
    %99 = vector.shape_cast %98 : vector<64xf32> to vector<64x1xf32>
    %100 = tpu.reciprocal %99 {approx = true} : vector<64x1xf32> -> vector<64x1xf32>
    %101 = vector.broadcast %100 : vector<64x1xf32> to vector<64x64xf32>
    %102 = arith.mulf %97, %101 : vector<64x64xf32>
    %103 = vector.extract_strided_slice %12 {offsets = [16, 0], sizes = [8, 32], strides = [1, 1]} : vector<32x32xf32> to vector<8x32xf32>
    %cst_30 = arith.constant dense<0.000000e+00> : vector<64x32xf32>
    %104 = tpu.matmul %88, %103, %cst_30 {dimension_numbers = #tpu.dot_dimension_numbers<[1], [0], [0], [1], [0, 0, 1, 1], [], []>} : vector<64x8xf32>, vector<8x32xf32>, vector<64x32xf32> -> vector<64x32xf32>
    %cst_31 = arith.constant dense<0.000000e+00> : vector<64x32xf32>
    %105 = tpu.matmul %102, %104, %cst_31 {dimension_numbers = #tpu.dot_dimension_numbers<[1], [0], [0], [1], [0, 0, 1, 1], [], []>} : vector<64x64xf32>, vector<64x32xf32>, vector<64x32xf32> -> vector<64x32xf32>
    %106 = arith.addf %85, %105 : vector<64x32xf32>
    %107 = vector.extract_strided_slice %40 {offsets = [0, 24], sizes = [64, 8], strides = [1, 1]} : vector<128x96xf32> to vector<64x8xf32>
    %108 = vector.extract_strided_slice %40 {offsets = [0, 56], sizes = [64, 8], strides = [1, 1]} : vector<128x96xf32> to vector<64x8xf32>
    %109 = vector.extract_strided_slice %40 {offsets = [0, 88], sizes = [64, 8], strides = [1, 1]} : vector<128x96xf32> to vector<64x8xf32>
    %cst_32 = arith.constant dense<0.000000e+00> : vector<64x64xf32>
    %110 = tpu.matmul %107, %108, %cst_32 {dimension_numbers = #tpu.dot_dimension_numbers<[1], [1], [0], [0], [0, 0, 1, 0], [], []>} : vector<64x8xf32>, vector<64x8xf32>, vector<64x64xf32> -> vector<64x64xf32>
    %c3 = arith.constant 3 : index
    %c0_33 = arith.constant 0 : index
    %c0_34 = arith.constant 0 : index
    %111 = vector.load %arg4[%c3, %c0_33, %c0_34] : memref<4x64x64xf32, #tpu.memory_space<vmem>>, vector<1x64x64xf32>
    %112 = vector.shape_cast %111 : vector<1x64x64xf32> to vector<64x64xf32>
    %113 = arith.addf %110, %112 : vector<64x64xf32>
    %cst_35 = arith.constant dense<0xFF800000> : vector<64xf32>
    %114 = vector.multi_reduction <maximumf>, %113, %cst_35 [1] : vector<64x64xf32> to vector<64xf32>
    %115 = vector.shape_cast %114 : vector<64xf32> to vector<64x1xf32>
    %116 = vector.broadcast %115 : vector<64x1xf32> to vector<64x64xf32>
    %117 = arith.subf %113, %116 : vector<64x64xf32>
    %118 = math.exp %117 : vector<64x64xf32>
    %cst_36 = arith.constant dense<0.000000e+00> : vector<64xf32>
    %119 = vector.multi_reduction <add>, %118, %cst_36 [1] : vector<64x64xf32> to vector<64xf32>
    %120 = vector.shape_cast %119 : vector<64xf32> to vector<64x1xf32>
    %121 = tpu.reciprocal %120 {approx = true} : vector<64x1xf32> -> vector<64x1xf32>
    %122 = vector.broadcast %121 : vector<64x1xf32> to vector<64x64xf32>
    %123 = arith.mulf %118, %122 : vector<64x64xf32>
    %124 = vector.extract_strided_slice %12 {offsets = [24, 0], sizes = [8, 32], strides = [1, 1]} : vector<32x32xf32> to vector<8x32xf32>
    %cst_37 = arith.constant dense<0.000000e+00> : vector<64x32xf32>
    %125 = tpu.matmul %109, %124, %cst_37 {dimension_numbers = #tpu.dot_dimension_numbers<[1], [0], [0], [1], [0, 0, 1, 1], [], []>} : vector<64x8xf32>, vector<8x32xf32>, vector<64x32xf32> -> vector<64x32xf32>
    %cst_38 = arith.constant dense<0.000000e+00> : vector<64x32xf32>
    %126 = tpu.matmul %123, %125, %cst_38 {dimension_numbers = #tpu.dot_dimension_numbers<[1], [0], [0], [1], [0, 0, 1, 1], [], []>} : vector<64x64xf32>, vector<64x32xf32>, vector<64x32xf32> -> vector<64x32xf32>
    %127 = arith.addf %106, %126 : vector<64x32xf32>
    %128 = vector.extract_strided_slice %0 {offsets = [64, 0], sizes = [64, 32], strides = [1, 1]} : vector<128x32xf32> to vector<64x32xf32>
    %129 = vector.broadcast %5 : vector<1x32xf32> to vector<64x32xf32>
    %130 = arith.addf %128, %129 : vector<64x32xf32>
    %131 = vector.extract_strided_slice %40 {offsets = [64, 0], sizes = [64, 8], strides = [1, 1]} : vector<128x96xf32> to vector<64x8xf32>
    %132 = vector.extract_strided_slice %40 {offsets = [64, 32], sizes = [64, 8], strides = [1, 1]} : vector<128x96xf32> to vector<64x8xf32>
    %133 = vector.extract_strided_slice %40 {offsets = [64, 64], sizes = [64, 8], strides = [1, 1]} : vector<128x96xf32> to vector<64x8xf32>
    %cst_39 = arith.constant dense<0.000000e+00> : vector<64x64xf32>
    %134 = tpu.matmul %131, %132, %cst_39 {dimension_numbers = #tpu.dot_dimension_numbers<[1], [1], [0], [0], [0, 0, 1, 0], [], []>} : vector<64x8xf32>, vector<64x8xf32>, vector<64x64xf32> -> vector<64x64xf32>
    %c0_40 = arith.constant 0 : index
    %c0_41 = arith.constant 0 : index
    %c0_42 = arith.constant 0 : index
    %135 = vector.load %arg4[%c0_40, %c0_41, %c0_42] : memref<4x64x64xf32, #tpu.memory_space<vmem>>, vector<1x64x64xf32>
    %136 = vector.shape_cast %135 : vector<1x64x64xf32> to vector<64x64xf32>
    %137 = arith.addf %134, %136 : vector<64x64xf32>
    %cst_43 = arith.constant dense<0xFF800000> : vector<64xf32>
    %138 = vector.multi_reduction <maximumf>, %137, %cst_43 [1] : vector<64x64xf32> to vector<64xf32>
    %139 = vector.shape_cast %138 : vector<64xf32> to vector<64x1xf32>
    %140 = vector.broadcast %139 : vector<64x1xf32> to vector<64x64xf32>
    %141 = arith.subf %137, %140 : vector<64x64xf32>
    %142 = math.exp %141 : vector<64x64xf32>
    %cst_44 = arith.constant dense<0.000000e+00> : vector<64xf32>
    %143 = vector.multi_reduction <add>, %142, %cst_44 [1] : vector<64x64xf32> to vector<64xf32>
    %144 = vector.shape_cast %143 : vector<64xf32> to vector<64x1xf32>
    %145 = tpu.reciprocal %144 {approx = true} : vector<64x1xf32> -> vector<64x1xf32>
    %146 = vector.broadcast %145 : vector<64x1xf32> to vector<64x64xf32>
    %147 = arith.mulf %142, %146 : vector<64x64xf32>
    %148 = vector.extract_strided_slice %12 {offsets = [0, 0], sizes = [8, 32], strides = [1, 1]} : vector<32x32xf32> to vector<8x32xf32>
    %cst_45 = arith.constant dense<0.000000e+00> : vector<64x32xf32>
    %149 = tpu.matmul %133, %148, %cst_45 {dimension_numbers = #tpu.dot_dimension_numbers<[1], [0], [0], [1], [0, 0, 1, 1], [], []>} : vector<64x8xf32>, vector<8x32xf32>, vector<64x32xf32> -> vector<64x32xf32>
    %cst_46 = arith.constant dense<0.000000e+00> : vector<64x32xf32>
    %150 = tpu.matmul %147, %149, %cst_46 {dimension_numbers = #tpu.dot_dimension_numbers<[1], [0], [0], [1], [0, 0, 1, 1], [], []>} : vector<64x64xf32>, vector<64x32xf32>, vector<64x32xf32> -> vector<64x32xf32>
    %151 = arith.addf %130, %150 : vector<64x32xf32>
    %152 = vector.extract_strided_slice %40 {offsets = [64, 8], sizes = [64, 8], strides = [1, 1]} : vector<128x96xf32> to vector<64x8xf32>
    %153 = vector.extract_strided_slice %40 {offsets = [64, 40], sizes = [64, 8], strides = [1, 1]} : vector<128x96xf32> to vector<64x8xf32>
    %154 = vector.extract_strided_slice %40 {offsets = [64, 72], sizes = [64, 8], strides = [1, 1]} : vector<128x96xf32> to vector<64x8xf32>
    %cst_47 = arith.constant dense<0.000000e+00> : vector<64x64xf32>
    %155 = tpu.matmul %152, %153, %cst_47 {dimension_numbers = #tpu.dot_dimension_numbers<[1], [1], [0], [0], [0, 0, 1, 0], [], []>} : vector<64x8xf32>, vector<64x8xf32>, vector<64x64xf32> -> vector<64x64xf32>
    %c1_48 = arith.constant 1 : index
    %c0_49 = arith.constant 0 : index
    %c0_50 = arith.constant 0 : index
    %156 = vector.load %arg4[%c1_48, %c0_49, %c0_50] : memref<4x64x64xf32, #tpu.memory_space<vmem>>, vector<1x64x64xf32>
    %157 = vector.shape_cast %156 : vector<1x64x64xf32> to vector<64x64xf32>
    %158 = arith.addf %155, %157 : vector<64x64xf32>
    %cst_51 = arith.constant dense<0xFF800000> : vector<64xf32>
    %159 = vector.multi_reduction <maximumf>, %158, %cst_51 [1] : vector<64x64xf32> to vector<64xf32>
    %160 = vector.shape_cast %159 : vector<64xf32> to vector<64x1xf32>
    %161 = vector.broadcast %160 : vector<64x1xf32> to vector<64x64xf32>
    %162 = arith.subf %158, %161 : vector<64x64xf32>
    %163 = math.exp %162 : vector<64x64xf32>
    %cst_52 = arith.constant dense<0.000000e+00> : vector<64xf32>
    %164 = vector.multi_reduction <add>, %163, %cst_52 [1] : vector<64x64xf32> to vector<64xf32>
    %165 = vector.shape_cast %164 : vector<64xf32> to vector<64x1xf32>
    %166 = tpu.reciprocal %165 {approx = true} : vector<64x1xf32> -> vector<64x1xf32>
    %167 = vector.broadcast %166 : vector<64x1xf32> to vector<64x64xf32>
    %168 = arith.mulf %163, %167 : vector<64x64xf32>
    %169 = vector.extract_strided_slice %12 {offsets = [8, 0], sizes = [8, 32], strides = [1, 1]} : vector<32x32xf32> to vector<8x32xf32>
    %cst_53 = arith.constant dense<0.000000e+00> : vector<64x32xf32>
    %170 = tpu.matmul %154, %169, %cst_53 {dimension_numbers = #tpu.dot_dimension_numbers<[1], [0], [0], [1], [0, 0, 1, 1], [], []>} : vector<64x8xf32>, vector<8x32xf32>, vector<64x32xf32> -> vector<64x32xf32>
    %cst_54 = arith.constant dense<0.000000e+00> : vector<64x32xf32>
    %171 = tpu.matmul %168, %170, %cst_54 {dimension_numbers = #tpu.dot_dimension_numbers<[1], [0], [0], [1], [0, 0, 1, 1], [], []>} : vector<64x64xf32>, vector<64x32xf32>, vector<64x32xf32> -> vector<64x32xf32>
    %172 = arith.addf %151, %171 : vector<64x32xf32>
    %173 = vector.extract_strided_slice %40 {offsets = [64, 16], sizes = [64, 8], strides = [1, 1]} : vector<128x96xf32> to vector<64x8xf32>
    %174 = vector.extract_strided_slice %40 {offsets = [64, 48], sizes = [64, 8], strides = [1, 1]} : vector<128x96xf32> to vector<64x8xf32>
    %175 = vector.extract_strided_slice %40 {offsets = [64, 80], sizes = [64, 8], strides = [1, 1]} : vector<128x96xf32> to vector<64x8xf32>
    %cst_55 = arith.constant dense<0.000000e+00> : vector<64x64xf32>
    %176 = tpu.matmul %173, %174, %cst_55 {dimension_numbers = #tpu.dot_dimension_numbers<[1], [1], [0], [0], [0, 0, 1, 0], [], []>} : vector<64x8xf32>, vector<64x8xf32>, vector<64x64xf32> -> vector<64x64xf32>
    %c2_56 = arith.constant 2 : index
    %c0_57 = arith.constant 0 : index
    %c0_58 = arith.constant 0 : index
    %177 = vector.load %arg4[%c2_56, %c0_57, %c0_58] : memref<4x64x64xf32, #tpu.memory_space<vmem>>, vector<1x64x64xf32>
    %178 = vector.shape_cast %177 : vector<1x64x64xf32> to vector<64x64xf32>
    %179 = arith.addf %176, %178 : vector<64x64xf32>
    %cst_59 = arith.constant dense<0xFF800000> : vector<64xf32>
    %180 = vector.multi_reduction <maximumf>, %179, %cst_59 [1] : vector<64x64xf32> to vector<64xf32>
    %181 = vector.shape_cast %180 : vector<64xf32> to vector<64x1xf32>
    %182 = vector.broadcast %181 : vector<64x1xf32> to vector<64x64xf32>
    %183 = arith.subf %179, %182 : vector<64x64xf32>
    %184 = math.exp %183 : vector<64x64xf32>
    %cst_60 = arith.constant dense<0.000000e+00> : vector<64xf32>
    %185 = vector.multi_reduction <add>, %184, %cst_60 [1] : vector<64x64xf32> to vector<64xf32>
    %186 = vector.shape_cast %185 : vector<64xf32> to vector<64x1xf32>
    %187 = tpu.reciprocal %186 {approx = true} : vector<64x1xf32> -> vector<64x1xf32>
    %188 = vector.broadcast %187 : vector<64x1xf32> to vector<64x64xf32>
    %189 = arith.mulf %184, %188 : vector<64x64xf32>
    %190 = vector.extract_strided_slice %12 {offsets = [16, 0], sizes = [8, 32], strides = [1, 1]} : vector<32x32xf32> to vector<8x32xf32>
    %cst_61 = arith.constant dense<0.000000e+00> : vector<64x32xf32>
    %191 = tpu.matmul %175, %190, %cst_61 {dimension_numbers = #tpu.dot_dimension_numbers<[1], [0], [0], [1], [0, 0, 1, 1], [], []>} : vector<64x8xf32>, vector<8x32xf32>, vector<64x32xf32> -> vector<64x32xf32>
    %cst_62 = arith.constant dense<0.000000e+00> : vector<64x32xf32>
    %192 = tpu.matmul %189, %191, %cst_62 {dimension_numbers = #tpu.dot_dimension_numbers<[1], [0], [0], [1], [0, 0, 1, 1], [], []>} : vector<64x64xf32>, vector<64x32xf32>, vector<64x32xf32> -> vector<64x32xf32>
    %193 = arith.addf %172, %192 : vector<64x32xf32>
    %194 = vector.extract_strided_slice %40 {offsets = [64, 24], sizes = [64, 8], strides = [1, 1]} : vector<128x96xf32> to vector<64x8xf32>
    %195 = vector.extract_strided_slice %40 {offsets = [64, 56], sizes = [64, 8], strides = [1, 1]} : vector<128x96xf32> to vector<64x8xf32>
    %196 = vector.extract_strided_slice %40 {offsets = [64, 88], sizes = [64, 8], strides = [1, 1]} : vector<128x96xf32> to vector<64x8xf32>
    %cst_63 = arith.constant dense<0.000000e+00> : vector<64x64xf32>
    %197 = tpu.matmul %194, %195, %cst_63 {dimension_numbers = #tpu.dot_dimension_numbers<[1], [1], [0], [0], [0, 0, 1, 0], [], []>} : vector<64x8xf32>, vector<64x8xf32>, vector<64x64xf32> -> vector<64x64xf32>
    %c3_64 = arith.constant 3 : index
    %c0_65 = arith.constant 0 : index
    %c0_66 = arith.constant 0 : index
    %198 = vector.load %arg4[%c3_64, %c0_65, %c0_66] : memref<4x64x64xf32, #tpu.memory_space<vmem>>, vector<1x64x64xf32>
    %199 = vector.shape_cast %198 : vector<1x64x64xf32> to vector<64x64xf32>
    %200 = arith.addf %197, %199 : vector<64x64xf32>
    %cst_67 = arith.constant dense<0xFF800000> : vector<64xf32>
    %201 = vector.multi_reduction <maximumf>, %200, %cst_67 [1] : vector<64x64xf32> to vector<64xf32>
    %202 = vector.shape_cast %201 : vector<64xf32> to vector<64x1xf32>
    %203 = vector.broadcast %202 : vector<64x1xf32> to vector<64x64xf32>
    %204 = arith.subf %200, %203 : vector<64x64xf32>
    %205 = math.exp %204 : vector<64x64xf32>
    %cst_68 = arith.constant dense<0.000000e+00> : vector<64xf32>
    %206 = vector.multi_reduction <add>, %205, %cst_68 [1] : vector<64x64xf32> to vector<64xf32>
    %207 = vector.shape_cast %206 : vector<64xf32> to vector<64x1xf32>
    %208 = tpu.reciprocal %207 {approx = true} : vector<64x1xf32> -> vector<64x1xf32>
    %209 = vector.broadcast %208 : vector<64x1xf32> to vector<64x64xf32>
    %210 = arith.mulf %205, %209 : vector<64x64xf32>
    %211 = vector.extract_strided_slice %12 {offsets = [24, 0], sizes = [8, 32], strides = [1, 1]} : vector<32x32xf32> to vector<8x32xf32>
    %cst_69 = arith.constant dense<0.000000e+00> : vector<64x32xf32>
    %212 = tpu.matmul %196, %211, %cst_69 {dimension_numbers = #tpu.dot_dimension_numbers<[1], [0], [0], [1], [0, 0, 1, 1], [], []>} : vector<64x8xf32>, vector<8x32xf32>, vector<64x32xf32> -> vector<64x32xf32>
    %cst_70 = arith.constant dense<0.000000e+00> : vector<64x32xf32>
    %213 = tpu.matmul %210, %212, %cst_70 {dimension_numbers = #tpu.dot_dimension_numbers<[1], [0], [0], [1], [0, 0, 1, 1], [], []>} : vector<64x64xf32>, vector<64x32xf32>, vector<64x32xf32> -> vector<64x32xf32>
    %214 = arith.addf %193, %213 : vector<64x32xf32>
    %215 = tpu.concatenate %127, %214 in 0 : vector<64x32xf32>, vector<64x32xf32> -> vector<128x32xf32>
    %cst_71 = arith.constant dense<0.000000e+00> : vector<128xf32>
    %216 = vector.multi_reduction <add>, %215, %cst_71 [1] : vector<128x32xf32> to vector<128xf32>
    %217 = vector.shape_cast %216 : vector<128xf32> to vector<128x1xf32>
    %cst_72 = arith.constant 3.200000e+01 : f32
    %218 = vector.broadcast %cst_72 : f32 to vector<128x1xf32>
    %219 = arith.divf %217, %218 : vector<128x1xf32>
    %220 = vector.broadcast %219 : vector<128x1xf32> to vector<128x32xf32>
    %221 = arith.subf %215, %220 : vector<128x32xf32>
    %222 = vector.broadcast %219 : vector<128x1xf32> to vector<128x32xf32>
    %223 = arith.subf %215, %222 : vector<128x32xf32>
    %224 = arith.mulf %221, %223 : vector<128x32xf32>
    %cst_73 = arith.constant dense<0.000000e+00> : vector<128xf32>
    %225 = vector.multi_reduction <add>, %224, %cst_73 [1] : vector<128x32xf32> to vector<128xf32>
    %226 = vector.shape_cast %225 : vector<128xf32> to vector<128x1xf32>
    %cst_74 = arith.constant 3.200000e+01 : f32
    %227 = vector.broadcast %cst_74 : f32 to vector<128x1xf32>
    %228 = arith.divf %226, %227 : vector<128x1xf32>
    %229 = vector.broadcast %219 : vector<128x1xf32> to vector<128x32xf32>
    %230 = arith.subf %215, %229 : vector<128x32xf32>
    %cst_75 = arith.constant 9.99999974E-6 : f32
    %231 = vector.broadcast %cst_75 : f32 to vector<128x1xf32>
    %232 = arith.addf %228, %231 : vector<128x1xf32>
    %233 = math.rsqrt %232 : vector<128x1xf32>
    %234 = vector.broadcast %233 : vector<128x1xf32> to vector<128x32xf32>
    %235 = arith.mulf %230, %234 : vector<128x32xf32>
    %236 = vector.broadcast %6 : vector<1x32xf32> to vector<128x32xf32>
    %237 = arith.mulf %235, %236 : vector<128x32xf32>
    %238 = vector.broadcast %7 : vector<1x32xf32> to vector<128x32xf32>
    %239 = arith.addf %237, %238 : vector<128x32xf32>
    %cst_76 = arith.constant dense<0.000000e+00> : vector<128x128xf32>
    %240 = tpu.matmul %239, %13, %cst_76 {dimension_numbers = #tpu.dot_dimension_numbers<[1], [0], [0], [1], [0, 0, 1, 1], [], []>} : vector<128x32xf32>, vector<32x128xf32>, vector<128x128xf32> -> vector<128x128xf32>
    %241 = vector.broadcast %8 : vector<1x128xf32> to vector<128x128xf32>
    %242 = arith.addf %240, %241 : vector<128x128xf32>
    %cst_77 = arith.constant 5.000000e-01 : f32
    %243 = vector.broadcast %cst_77 : f32 to vector<128x128xf32>
    %244 = arith.mulf %243, %242 : vector<128x128xf32>
    %cst_78 = arith.constant 0.707106769 : f32
    %245 = vector.broadcast %cst_78 : f32 to vector<128x128xf32>
    %246 = arith.mulf %242, %245 : vector<128x128xf32>
    %247 = math.erf %246 : vector<128x128xf32>
    %cst_79 = arith.constant 1.000000e+00 : f32
    %248 = vector.broadcast %cst_79 : f32 to vector<128x128xf32>
    %249 = arith.addf %248, %247 : vector<128x128xf32>
    %250 = arith.mulf %244, %249 : vector<128x128xf32>
    %c0_80 = arith.constant 0 : index
    %c0_81 = arith.constant 0 : index
    %251 = vector.load %arg3[%c0_80, %c0_81] : memref<128x32xf32, #tpu.memory_space<vmem>>, vector<128x32xf32>
    %cst_82 = arith.constant dense<0.000000e+00> : vector<128x32xf32>
    %252 = tpu.matmul %250, %251, %cst_82 {dimension_numbers = #tpu.dot_dimension_numbers<[1], [0], [0], [1], [0, 0, 1, 1], [], []>} : vector<128x128xf32>, vector<128x32xf32>, vector<128x32xf32> -> vector<128x32xf32>
    %253 = vector.broadcast %9 : vector<1x32xf32> to vector<128x32xf32>
    %254 = arith.addf %252, %253 : vector<128x32xf32>
    %255 = arith.addf %215, %254 : vector<128x32xf32>
    %c0_83 = arith.constant 0 : index
    %c0_84 = arith.constant 0 : index
    %256 = vector.load %arg5[%c0_83, %c0_84] : memref<128x32xf32, #tpu.memory_space<vmem>>, vector<128x32xf32>
    tpu.vector_store %arg5[%c0_83, %c0_84], %255 {strides = array<i32>} : memref<128x32xf32, #tpu.memory_space<vmem>>, vector<128x32xf32>,
    return
  }
}

</mosaic_0001>

<bundles_post_ra>
// kernel: swin_block_forward.1
= control target key start
LH: loop header
LB: loop body
LE: loop exit
PB: predicated region body
PF: predicated region fallthrough
CT: control target
= control target key end

     0   :  { %vm45_vm0 = vcmask 261120   ;;  %vm536_vm1 = vcmask 64512   ;;  %s7939_s19 = smov 96   ;;  %s7940_s11 = smov 32   ;;  %vm674_vm3 = vcmask 523264   ;;  %s10377_s0 = inlined_call_operand.vmem [shape: f32[128,32], index: 0, kind: input, shape index: {}]   ;;  %s10378_s2 = inlined_call_operand.vmem [shape: f32[32,256], index: 2, kind: input, shape index: {}]   ;;  %s10379_s1 = inlined_call_operand.vmem [shape: f32[8,128], index: 1, kind: input, shape index: {}]   ;;  %s10380_s4 = inlined_call_operand.vmem [shape: f32[4,64,64], index: 4, kind: input, shape index: {}]   ;;  %s10381_s3 = inlined_call_operand.vmem [shape: f32[128,32], index: 3, kind: input, shape index: {}]   ;;  %s10382_s5 = inlined_call_operand.vmem [shape: f32[128,32], index: 5, kind: output, shape index: {}]  }
   0x1   :  { %v20_v0 = vld [vmem:[%s10377_s0] sm:$0xff]  ;;  %v22_v1 = vld [vmem:[%s10377_s0 + $0x10] sm:$0xff]  ;;  %v21_v2 = vld [vmem:[%s10377_s0 + $0x8] sm:$0xff]  ;;  %s7941_s12 = smov 64   ;;  %s7942_s13 = smov 88  }
   0x2   :  { %v46_v3 = vsel %vm45_vm0, %v20_v0, 0.0  ;;  %v52_v4 = vsel %vm45_vm0, %v22_v1, 0.0  ;;  %v23_v5 = vld [vmem:[%s10377_s0 + $0x18] sm:$0xff]  ;;  %v49_v6 = vsel %vm45_vm0, %v21_v2, 0.0  ;;  %v24_v8 = vld [vmem:[%s10377_s0 + $0x20] sm:$0xff]  ;;  %v25_v9 = vld [vmem:[%s10377_s0 + $0x28] sm:$0xff] }
   0x3   :  { %47 = vadd.xlane.f32.xlu0 %v46_v3  ;;  %53 = vadd.xlane.f32.xlu1 %v52_v4  ;;  %v55_v7 = vsel %vm45_vm0, %v23_v5, 0.0  ;;  %v58_v10 = vsel %vm45_vm0, %v24_v8, 0.0  ;;  %v61_v11 = vsel %vm45_vm0, %v25_v9, 0.0  ;;  %v26_v12 = vld [vmem:[%s10377_s0 + $0x30] sm:$0xff]  ;;  %v27_v13 = vld [vmem:[%s10377_s0 + $0x38] sm:$0xff]  ;;  %v8056_v56 = vld [vmem:[%s10378_s2] sm:$0xff] }
   0x4   :  { %v64_v14 = vsel %vm45_vm0, %v26_v12, 0.0  ;;  %v67_v15 = vsel %vm45_vm0, %v27_v13, 0.0  ;;  %v8061_v57 = vld [vmem:[%s10378_s2 + $0x10] sm:$0xff]  ;;  %v41_v59 = vld [vmem:[%s10378_s2 + $0x20] sm:$0xff]  ;;  %vm8219_vm2 = vmpackc.low %vm536_vm1, %vm536_vm1  ;;  %s7943_s14 = smov 120   ;;  %s7944_s7 = smov 56  }
   0x5   :  { %v6915_v58 = vpack.c.bf16 %v8061_v57, %v8056_v56  ;;  %v43_v60 = vld [vmem:[%s10378_s2 + $0x30] sm:$0xff]  ;;  %s7945_s8 = smov 80   ;;  %s7946_s9 = smov 112  }
   0x6   :  { %v6919_v61 = vpack.c.bf16 %v43_v60, %v41_v59  ;;  %s7947_s15 = smov 48   ;;  %s7948_s16 = smov 72  }
   0x7   :  { %50 = vadd.xlane.f32.xlu0 %v49_v6  ;;  %56 = vadd.xlane.f32.xlu1 %v55_v7  ;;  %s7949_s17 = smov 104  }
   0x8   :  { %6916 = vmatprep.subr.bf16.mxu0 %v6915_v58 }
   0x9   :  { %6918 = vmatpush3.bf16.msra.mxu0 %v6915_v58 }
   0xa   :  { %6920 = vmatprep.subr.bf16.mxu0 %v6919_v61 }
   0xb   :  { %59 = vadd.xlane.f32.xlu0 %v58_v10  ;;  %62 = vadd.xlane.f32.xlu1 %v61_v11 }
   0xd   :  { %6922 = vmatpush3.bf16.msra.mxu0 %v6919_v61 }
   0xf   :  { %65 = vadd.xlane.f32.xlu0 %v64_v14  ;;  %68 = vadd.xlane.f32.xlu1 %v67_v15 }
  0x90   :  { %v48_v16 = vpop.xlane.xlu0 %47  ;;  %v54_v17 = vpop.xlane.xlu1 %53 }
  0x91   :  { %v95_v18 = vmul.f32 0.03125, %v48_v16  ;;  %v97_v19 = vmul.f32 0.03125, %v54_v17  ;;  %v36_v16 = vld [vmem:[%s10379_s1] sm:$0xff] }
  0x93   :  { %v8013_v20 = vsub.f32 %v20_v0, %v95_v18  ;;  %v8015_v21 = vsub.f32 %v22_v1, %v97_v19  ;;  %v255_v0 = vlaneseq }
  0x94   :  { %v51_v22 = vpop.xlane.xlu0 %50  ;;  %v57_v23 = vpop.xlane.xlu1 %56 }
  0x95   :  { %v96_v24 = vmul.f32 0.03125, %v51_v22  ;;  %v98_v25 = vmul.f32 0.03125, %v57_v23  ;;  %v127_v26 = vmul.f32 %v8013_v20, %v8013_v20  ;;  %v129_v27 = vmul.f32 %v8015_v21, %v8015_v21 }
  0x96   :  { %v8071_v6 = vshrl.u32 %v255_v0, 7 }
  0x97   :  { %v8021_v28 = vsub.f32 %v21_v2, %v96_v24  ;;  %v8023_v29 = vsub.f32 %v23_v5, %v98_v25  ;;  %v143_v30 = vsel %vm45_vm0, %v127_v26, 0.0  ;;  %v149_v33 = vsel %vm45_vm0, %v129_v27, 0.0 }
  0x98   :  { %144 = vadd.xlane.f32.xlu0 %v143_v30  ;;  %v60_v31 = vpop.xlane.xlu0 %59  ;;  %v63_v32 = vpop.xlane.xlu1 %62  ;;  %v277_v19 = vsub.s32 1, %v8071_v6  ;;  %v297_v0 = vsub.s32 2, %v8071_v6 }
  0x99   :  { %v99_v34 = vmul.f32 0.03125, %v60_v31  ;;  %v100_v35 = vmul.f32 0.03125, %v63_v32  ;;  %v128_v36 = vmul.f32 %v8021_v28, %v8021_v28  ;;  %v130_v37 = vmul.f32 %v8023_v29, %v8023_v29 }
  0x9a   :  { %v8081_v32 = vrot.slane %v36_v16, %v277_v19 }
  0x9b   :  { %v8031_v38 = vsub.f32 %v24_v8, %v99_v34  ;;  %v8033_v39 = vsub.f32 %v25_v9, %v100_v35  ;;  %v146_v40 = vsel %vm45_vm0, %v128_v36, 0.0  ;;  %v152_v43 = vsel %vm45_vm0, %v130_v37, 0.0 }
  0x9c   :  { %150 = vadd.xlane.f32.xlu0 %v149_v33  ;;  %147 = vadd.xlane.f32.xlu1 %v146_v40  ;;  %v66_v41 = vpop.xlane.xlu0 %65  ;;  %v69_v42 = vpop.xlane.xlu1 %68 }
  0x9d   :  { %v101_v44 = vmul.f32 0.03125, %v66_v41  ;;  %v102_v45 = vmul.f32 0.03125, %v69_v42  ;;  %v131_v46 = vmul.f32 %v8031_v38, %v8031_v38  ;;  %v132_v47 = vmul.f32 %v8033_v39, %v8033_v39 }
  0x9f   :  { %v8041_v48 = vsub.f32 %v26_v12, %v101_v44  ;;  %v8043_v49 = vsub.f32 %v27_v13, %v102_v45  ;;  %v155_v50 = vsel %vm45_vm0, %v131_v46, 0.0  ;;  %v158_v51 = vsel %vm45_vm0, %v132_v47, 0.0 }
  0xa0   :  { %153 = vadd.xlane.f32.xlu1 %v152_v43  ;;  %156 = vadd.xlane.f32.xlu0 %v155_v50  ;;  %v257_v13 = vsub.s32 0, %v8071_v6 }
  0xa1   :  { %v133_v52 = vmul.f32 %v8041_v48, %v8041_v48  ;;  %v134_v53 = vmul.f32 %v8043_v49, %v8043_v49 }
  0xa2   :  { %v8078_v24 = vrot.slane %v36_v16, %v257_v13 }
  0xa3   :  { %v161_v54 = vsel %vm45_vm0, %v133_v52, 0.0  ;;  %v164_v55 = vsel %vm45_vm0, %v134_v53, 0.0 }
  0xa4   :  { %159 = vadd.xlane.f32.xlu1 %v158_v51  ;;  %162 = vadd.xlane.f32.xlu0 %v161_v54 }
  0xa8   :  { %165 = vadd.xlane.f32.xlu1 %v164_v55 }
 0x125   :  { %v145_v62 = vpop.xlane.xlu0 %144 }
 0x126   :  { %v191_v63 = vmul.f32 0.03125, %v145_v62 }
 0x128   :  { %v207_v1 = vadd.f32 1e-05, %v191_v63 }
 0x129   :  { %v148_v2 = vpop.xlane.xlu1 %147  ;;  %v151_v3 = vpop.xlane.xlu0 %150 }
 0x12a   :  { %7535 = vrsqrt.f32 %v207_v1  ;;  %v192_v4 = vmul.f32 0.03125, %v148_v2  ;;  %v193_v5 = vmul.f32 0.03125, %v151_v3  ;;  %v8115_v1 = vrot.slane %v36_v16, %v297_v0 }
 0x12c   :  { %v208_v7 = vadd.f32 1e-05, %v192_v4  ;;  %v209_v8 = vadd.f32 1e-05, %v193_v5 }
 0x12d   :  { %v154_v9 = vpop.xlane.xlu1 %153  ;;  %v157_v10 = vpop.xlane.xlu0 %156 }
 0x12e   :  { %7537 = vrsqrt.f32 %v208_v7  ;;  %v194_v11 = vmul.f32 0.03125, %v154_v9  ;;  %v195_v12 = vmul.f32 0.03125, %v157_v10 }
 0x12f   :  { %7539 = vrsqrt.f32 %v209_v8 }
 0x130   :  { %v210_v14 = vadd.f32 1e-05, %v194_v11  ;;  %v211_v15 = vadd.f32 1e-05, %v195_v12 }
 0x131   :  { %v160_v17 = vpop.xlane.xlu1 %159  ;;  %v163_v18 = vpop.xlane.xlu0 %162 }
 0x132   :  { %7541 = vrsqrt.f32 %v210_v14  ;;  %v196_v22 = vmul.f32 0.03125, %v160_v17  ;;  %v197_v23 = vmul.f32 0.03125, %v163_v18 }
 0x133   :  { %7543 = vrsqrt.f32 %v211_v15 }
 0x134   :  { %v7536_v25 = vpop.eup %7535  ;;  %v212_v26 = vadd.f32 1e-05, %v196_v22  ;;  %v213_v27 = vadd.f32 1e-05, %v197_v23 }
 0x135   :  { %v166_v30 = vpop.xlane.xlu1 %165  ;;  %v239_v31 = vmul.f32 %v7536_v25, %v8013_v20  ;;  %v28_v25 = vld [vmem:[%s10377_s0 + $0x40] sm:$0xff] }
 0x136   :  { %7545 = vrsqrt.f32 %v212_v26  ;;  %v198_v33 = vmul.f32 0.03125, %v166_v30  ;;  %v70_v26 = vsel %vm45_vm0, %v28_v25, 0.0 }
 0x137   :  { %7547 = vrsqrt.f32 %v213_v27  ;;  %v259_v34 = vmul.f32 %v8078_v24, %v239_v31  ;;  %v30_v27 = vld [vmem:[%s10377_s0 + $0x50] sm:$0xff]  ;;  %v8178_v31 = vld [vmem:[%s10377_s0 + $0x58] sm:$0xff] }
 0x138   :  { %v7538_v35 = vpop.eup %7537  ;;  %v214_v36 = vadd.f32 1e-05, %v198_v33  ;;  %v76_v30 = vsel %vm45_vm0, %v30_v27, 0.0  ;;  %v79_v33 = vsel %vm45_vm0, %v8178_v31, 0.0 }
 0x139   :  { %v7540_v37 = vpop.eup %7539  ;;  %v279_v40 = vadd.f32 %v8081_v32, %v259_v34  ;;  %v240_v41 = vmul.f32 %v7538_v35, %v8021_v28  ;;  %v8185_v34 = vld [vmem:[%s10377_s0 + $0x60] sm:$0xff] }
 0x13a   :  { %7549 = vrsqrt.f32 %v214_v36  ;;  %v241_v42 = vmul.f32 %v7540_v37, %v8015_v21  ;;  %v82_v35 = vsel %vm45_vm0, %v8185_v34, 0.0  ;;  %v8192_v36 = vld [vmem:[%s10377_s0 + $0x70] sm:$0xff]  ;;  %v8197_v37 = vld [vmem:[%s10377_s0 + $0x48] sm:$0xff] }
 0x13b   :  { %6243 = vmatprep.mubr.msk.f32.mxu0 %vm45_vm0, %v279_v40  ;;  %v260_v20 = vmul.f32 %v8078_v24, %v240_v41  ;;  %v88_v40 = vsel %vm45_vm0, %v8192_v36, 0.0  ;;  %v73_v41 = vsel %vm45_vm0, %v8197_v37, 0.0 }
 0x13c   :  { %v7542_v43 = vpop.eup %7541  ;;  %v261_v44 = vmul.f32 %v8078_v24, %v241_v42  ;;  %v8206_v42 = vld [vmem:[%s10377_s0 + $0x68] sm:$0xff] }
 0x13d   :  { %v7544_v45 = vpop.eup %7543  ;;  %v280_v46 = vadd.f32 %v8081_v32, %v260_v20  ;;  %v242_v47 = vmul.f32 %v7542_v43, %v8023_v29  ;;  %v85_v20 = vsel %vm45_vm0, %v8206_v42, 0.0  ;;  %v8213_v43 = vld [vmem:[%s10377_s0 + $0x78] sm:$0xff] }
 0x13e   :  { %v281_v50 = vadd.f32 %v8081_v32, %v261_v44  ;;  %v243_v51 = vmul.f32 %v7544_v45, %v8031_v38  ;;  %v91_v44 = vsel %vm45_vm0, %v8213_v43, 0.0 }
 0x13f   :  { %6244 = vmatmul.mubr.msk.f32.vlgmr.msra.gmra.mrb[0].mxu0 %vm45_vm0, %v280_v46  ;;  %v262_v21 = vmul.f32 %v8078_v24, %v242_v47 }
 0x140   :  { %v7546_v28 = vpop.eup %7545  ;;  %6246 = vmatprep.mubr.msk.f32.mxu0 %vm45_vm0, %v281_v50  ;;  %v263_v52 = vmul.f32 %v8078_v24, %v243_v51 }
 0x141   :  { %v7548_v53 = vpop.eup %7547  ;;  %v282_v54 = vadd.f32 %v8081_v32, %v262_v21  ;;  %v244_v55 = vmul.f32 %v7546_v28, %v8033_v39 }
 0x142   :  { %v283_v29 = vadd.f32 %v8081_v32, %v263_v52  ;;  %v245_v58 = vmul.f32 %v7548_v53, %v8041_v48 }
 0x143   :  { %6247 = vmatmul.mubr.msk.f32.gmra.mrb[2].mxu0 %vm45_vm0, %v282_v54  ;;  %v264_v38 = vmul.f32 %v8078_v24, %v244_v55 }
 0x144   :  { %v7550_v59 = vpop.eup %7549  ;;  %6249 = vmatprep.mubr.msk.f32.mxu0 %vm45_vm0, %v283_v29  ;;  %v265_v60 = vmul.f32 %v8078_v24, %v245_v58 }
 0x145   :  { %v284_v61 = vadd.f32 %v8081_v32, %v264_v38  ;;  %v246_v62 = vmul.f32 %v7550_v59, %v8043_v49 }
 0x146   :  { %v285_v63 = vadd.f32 %v8081_v32, %v265_v60 }
 0x147   :  { %6250 = vmatmul.mubr.msk.f32.gmra.mrb[4].mxu0 %vm45_vm0, %v284_v61  ;;  %v266_v39 = vmul.f32 %v8078_v24, %v246_v62 }
 0x148   :  { %6252 = vmatprep.mubr.msk.f32.mxu0 %vm45_vm0, %v285_v63 }
 0x149   :  { %v286_v48 = vadd.f32 %v8081_v32, %v266_v39 }
 0x14b   :  { %6253 = vmatmul.mubr.msk.f32.gmra.mrb[6].mxu0 %vm45_vm0, %v286_v48 }
 0x212   :  { %v6245_v2 = vpop.f32.mrb[0].mxu0 }
 0x213   :  { %v8118_v3 = vadd.f32 %v6245_v2, %v8115_v1  ;;  %v413_v49 = vpop.f32.mrb[1].mxu0 }
 0x214   :  { %v8121_v4 = vadd.f32 %v413_v49, %v8115_v1 }
 0x216   :  { %v6248_v5 = vpop.f32.mrb[2].mxu0  ;;  %6283 = vmatprep.mubr.msk.f32.mxu1 %vm536_vm1, %v8121_v4  ;;  %v8127_v7 = vpack.i.bf16 %v8118_v3, %v8121_v4 }
 0x217   :  { %v8130_v8 = vadd.f32 %v6248_v5, %v8115_v1  ;;  %v423_v9 = vpop.f32.mrb[3].mxu0 }
 0x218   :  { %v8133_v10 = vadd.f32 %v423_v9, %v8115_v1  ;;  %7376 = vrot.lane.b32.xlu0 %v8127_v7, %s7939_s19 }
 0x21a   :  { %v6251_v11 = vpop.f32.mrb[4].mxu0  ;;  %v8139_v12 = vpack.i.bf16 %v8130_v8, %v8133_v10 }
 0x21b   :  { %v8142_v13 = vadd.f32 %v6251_v11, %v8115_v1  ;;  %v433_v14 = vpop.f32.mrb[5].mxu0 }
 0x21c   :  { %v8145_v15 = vadd.f32 %v433_v14, %v8115_v1  ;;  %7381 = vrot.lane.b32.xlu1 %v8139_v12, %s7939_s19 }
 0x21e   :  { %v6254_v16 = vpop.f32.mrb[6].mxu0  ;;  %v8151_v17 = vpack.i.bf16 %v8142_v13, %v8145_v15 }
 0x21f   :  { %v8154_v18 = vadd.f32 %v6254_v16, %v8115_v1  ;;  %v443_v19 = vpop.f32.mrb[7].mxu0 }
 0x220   :  { %v8157_v22 = vadd.f32 %v443_v19, %v8115_v1  ;;  %7386 = vrot.lane.b32.xlu1 %v8151_v17, %s7939_s19 }
 0x222   :  { %v8163_v23 = vpack.i.bf16 %v8154_v18, %v8157_v22 }
 0x224   :  { %7391 = vrot.lane.b32.xlu1 %v8163_v23, %s7939_s19 }
 0x237   :  { %71 = vadd.xlane.f32.xlu0 %v70_v26 }
 0x23b   :  { %77 = vadd.xlane.f32.xlu0 %v76_v30 }
 0x23f   :  { %80 = vadd.xlane.f32.xlu0 %v79_v33 }
 0x243   :  { %83 = vadd.xlane.f32.xlu0 %v82_v35 }
 0x247   :  { %89 = vadd.xlane.f32.xlu0 %v88_v40 }
 0x248   :  { %74 = vadd.xlane.f32.xlu1 %v73_v41 }
 0x24c   :  { %86 = vadd.xlane.f32.xlu1 %v85_v20 }
 0x250   :  { %92 = vadd.xlane.f32.xlu1 %v91_v44 }
 0x28a   :  { %v7377_v45 = vpop.permute.xlu0 %7376 }
 0x28b   :  { %v7379_v46 = vunpack.i.h.bf16 %v7377_v45  ;;  %v7378_v47 = vunpack.i.l.bf16 %v7377_v45 }
 0x28d   :  { %v6923_v51 = vpack.c.bf16 %v7379_v46, %v7378_v47 }
 0x28e   :  { %v7382_v21 = vpop.permute.xlu1 %7381 }
 0x28f   :  { %v7384_v28 = vunpack.i.h.bf16 %v7382_v21  ;;  %v7383_v52 = vunpack.i.l.bf16 %v7382_v21  ;;  %6925 = vmatprep.subr.msk.bf16.mxu1 %vm8219_vm2, %v6923_v51 }
 0x290   :  { %6928 = vmatpush3.bf16.xpose.msk.msra.mxu1 %vm8219_vm2, %v6923_v51 }
 0x291   :  { %v6929_v53 = vpack.c.bf16 %v7384_v28, %v7383_v52 }
 0x292   :  { %v7387_v54 = vpop.permute.xlu1 %7386 }
 0x293   :  { %v7389_v55 = vunpack.i.h.bf16 %v7387_v54  ;;  %v7388_v29 = vunpack.i.l.bf16 %v7387_v54  ;;  %6931 = vmatprep.subr.msk.bf16.mxu1 %vm8219_vm2, %v6929_v53 }
 0x295   :  { %v6935_v58 = vpack.c.bf16 %v7389_v55, %v7388_v29 }
 0x296   :  { %v7392_v38 = vpop.permute.xlu1 %7391 }
 0x297   :  { %v7394_v59 = vunpack.i.h.bf16 %v7392_v38  ;;  %v7393_v60 = vunpack.i.l.bf16 %v7392_v38 }
 0x298   :  { %6934 = vmatpush3.bf16.xpose.msk.msra.mxu1 %vm8219_vm2, %v6929_v53 }
 0x299   :  { %6937 = vmatprep.subr.msk.bf16.mxu1 %vm8219_vm2, %v6935_v58  ;;  %v6941_v61 = vpack.c.bf16 %v7394_v59, %v7393_v60 }
 0x2a0   :  { %6940 = vmatpush3.bf16.xpose.msk.msra.mxu1 %vm8219_vm2, %v6935_v58 }
 0x2a1   :  { %6943 = vmatprep.subr.msk.bf16.mxu1 %vm8219_vm2, %v6941_v61 }
 0x2a8   :  { %6946 = vmatpush3.bf16.xpose.msk.msra.mxu1 %vm8219_vm2, %v6941_v61 }
 0x2af   :  { %6284 = vmatmul.mubr.msk.f32.vlgmr.msra.gmra.mrb[0].mxu1 %vm536_vm1, %v8118_v3 }
 0x2b0   :  { %6286 = vmatprep.mubr.msk.f32.mxu1 %vm536_vm1, %v8133_v10 }
 0x2b3   :  { %6287 = vmatmul.mubr.msk.f32.gmra.mrb[2].mxu1 %vm536_vm1, %v8130_v8 }
 0x2b4   :  { %6289 = vmatprep.mubr.msk.f32.mxu1 %vm536_vm1, %v8145_v15 }
 0x2b7   :  { %6290 = vmatmul.mubr.msk.f32.gmra.mrb[4].mxu1 %vm536_vm1, %v8142_v13 }
 0x2b8   :  { %6292 = vmatprep.mubr.msk.f32.mxu1 %vm536_vm1, %v8157_v22 }
 0x2bb   :  { %6293 = vmatmul.mubr.msk.f32.gmra.mrb[6].mxu1 %vm536_vm1, %v8154_v18 }
 0x2c4   :  { %v72_v62 = vpop.xlane.xlu0 %71 }
 0x2c5   :  { %v103_v63 = vmul.f32 0.03125, %v72_v62 }
 0x2c7   :  { %v8253_v39 = vsub.f32 %v28_v25, %v103_v63 }
 0x2c8   :  { %v78_v48 = vpop.xlane.xlu0 %77 }
 0x2c9   :  { %v105_v0 = vmul.f32 0.03125, %v78_v48  ;;  %v135_v2 = vmul.f32 %v8253_v39, %v8253_v39 }
 0x2cb   :  { %v8257_v49 = vsub.f32 %v30_v27, %v105_v0  ;;  %v167_v5 = vsel %vm45_vm0, %v135_v2, 0.0 }
 0x2cc   :  { %168 = vadd.xlane.f32.xlu0 %v167_v5  ;;  %v81_v9 = vpop.xlane.xlu0 %80 }
 0x2cd   :  { %v137_v11 = vmul.f32 %v8257_v49, %v8257_v49  ;;  %v106_v25 = vmul.f32 0.03125, %v81_v9 }
 0x2cf   :  { %v173_v14 = vsel %vm45_vm0, %v137_v11, 0.0  ;;  %v8269_v40 = vsub.f32 %v8178_v31, %v106_v25 }
 0x2d0   :  { %174 = vadd.xlane.f32.xlu0 %v173_v14  ;;  %v84_v16 = vpop.xlane.xlu0 %83 }
 0x2d1   :  { %v107_v19 = vmul.f32 0.03125, %v84_v16  ;;  %v138_v31 = vmul.f32 %v8269_v40, %v8269_v40 }
 0x2d3   :  { %v8264_v26 = vsub.f32 %v8185_v34, %v107_v19  ;;  %v176_v53 = vsel %vm45_vm0, %v138_v31, 0.0 }
 0x2d4   :  { %v90_v30 = vpop.xlane.xlu0 %89 }
 0x2d5   :  { %v109_v33 = vmul.f32 0.03125, %v90_v30  ;;  %v75_v27 = vpop.xlane.xlu1 %74  ;;  %v139_v35 = vmul.f32 %v8264_v26, %v8264_v26 }
 0x2d6   :  { %v104_v41 = vmul.f32 0.03125, %v75_v27 }
 0x2d7   :  { %v8272_v20 = vsub.f32 %v8192_v36, %v109_v33  ;;  %v179_v44 = vsel %vm45_vm0, %v139_v35, 0.0 }
 0x2d8   :  { %v8276_v45 = vsub.f32 %v8197_v37, %v104_v41  ;;  %180 = vadd.xlane.f32.xlu0 %v179_v44 }
 0x2d9   :  { %v141_v34 = vmul.f32 %v8272_v20, %v8272_v20  ;;  %v87_v46 = vpop.xlane.xlu1 %86 }
 0x2da   :  { %v136_v47 = vmul.f32 %v8276_v45, %v8276_v45  ;;  %v108_v51 = vmul.f32 0.03125, %v87_v46 }
 0x2db   :  { %v185_v36 = vsel %vm45_vm0, %v141_v34, 0.0 }
 0x2dc   :  { %186 = vadd.xlane.f32.xlu0 %v185_v36  ;;  %v170_v21 = vsel %vm45_vm0, %v136_v47, 0.0  ;;  %v8287_v37 = vsub.f32 %v8206_v42, %v108_v51 }
 0x2dd   :  { %171 = vadd.xlane.f32.xlu1 %v170_v21  ;;  %v93_v28 = vpop.xlane.xlu1 %92 }
 0x2de   :  { %v110_v52 = vmul.f32 0.03125, %v93_v28  ;;  %v140_v54 = vmul.f32 %v8287_v37, %v8287_v37 }
 0x2e0   :  { %v8293_v55 = vsub.f32 %v8213_v43, %v110_v52  ;;  %v182_v29 = vsel %vm45_vm0, %v140_v54, 0.0 }
 0x2e1   :  { %177 = vadd.xlane.f32.xlu1 %v176_v53 }
 0x2e2   :  { %v142_v58 = vmul.f32 %v8293_v55, %v8293_v55 }
 0x2e4   :  { %v188_v42 = vsel %vm45_vm0, %v142_v58, 0.0 }
 0x2e5   :  { %183 = vadd.xlane.f32.xlu1 %v182_v29 }
 0x2e9   :  { %189 = vadd.xlane.f32.xlu1 %v188_v42 }
 0x2f2   :  { %780 = vrot.lane.b32.xlu0 %v8056_v56, %s7940_s11 }
 0x2f6   :  { %769 = vrot.lane.b32.xlu0 %v8130_v8, %s7941_s12 }
 0x2fa   :  { %763 = vrot.lane.b32.xlu1 %v8121_v4, %s7941_s12  ;;  %773 = vrot.lane.b32.xlu0 %v8142_v13, %s7941_s12 }
 0x2fe   :  { %765 = vrot.lane.b32.xlu1 %v8118_v3, %s7941_s12  ;;  %777 = vrot.lane.b32.xlu0 %v8154_v18, %s7941_s12 }
 0x302   :  { %767 = vrot.lane.b32.xlu1 %v8133_v10, %s7941_s12  ;;  %7401 = vrot.lane.b32.xlu0 %v8139_v12, %s7942_s13 }
 0x306   :  { %771 = vrot.lane.b32.xlu1 %v8145_v15, %s7941_s12  ;;  %1052 = vrot.lane.b32.xlu0 %v8118_v3, %s7943_s14 }
 0x30a   :  { %775 = vrot.lane.b32.xlu1 %v8157_v22, %s7941_s12  ;;  %7411 = vrot.lane.b32.xlu0 %v8163_v23, %s7942_s13 }
 0x30e   :  { %7396 = vrot.lane.b32.xlu1 %v8127_v7, %s7942_s13  ;;  %1056 = vrot.lane.b32.xlu0 %v8130_v8, %s7943_s14 }
 0x312   :  { %7406 = vrot.lane.b32.xlu1 %v8151_v17, %s7942_s13  ;;  %1060 = vrot.lane.b32.xlu0 %v8142_v13, %s7943_s14 }
 0x316   :  { %1050 = vrot.lane.b32.xlu1 %v8121_v4, %s7943_s14  ;;  %1064 = vrot.lane.b32.xlu0 %v8154_v18, %s7943_s14 }
 0x31a   :  { %1054 = vrot.lane.b32.xlu1 %v8133_v10, %s7943_s14 }
 0x31e   :  { %1058 = vrot.lane.b32.xlu1 %v8145_v15, %s7943_s14 }
 0x322   :  { %1062 = vrot.lane.b32.xlu1 %v8157_v22, %s7943_s14 }
 0x359   :  { %v169_v56 = vpop.xlane.xlu0 %168 }
 0x35a   :  { %v199_v43 = vmul.f32 0.03125, %v169_v56 }
 0x35c   :  { %v215_v38 = vadd.f32 1e-05, %v199_v43 }
 0x35d   :  { %v175_v59 = vpop.xlane.xlu0 %174 }
 0x35e   :  { %7551 = vrsqrt.f32 %v215_v38  ;;  %v201_v60 = vmul.f32 0.03125, %v175_v59 }
 0x360   :  { %v217_v62 = vadd.f32 1e-05, %v201_v60 }
 0x362   :  { %7553 = vrsqrt.f32 %v217_v62 }
 0x365   :  { %v181_v61 = vpop.xlane.xlu0 %180 }
 0x366   :  { %v203_v63 = vmul.f32 0.03125, %v181_v61 }
 0x368   :  { %v7552_v48 = vpop.eup %7551  ;;  %v219_v5 = vadd.f32 1e-05, %v203_v63 }
 0x369   :  { %v187_v0 = vpop.xlane.xlu0 %186  ;;  %v247_v2 = vmul.f32 %v7552_v48, %v8253_v39 }
 0x36a   :  { %v205_v9 = vmul.f32 0.03125, %v187_v0  ;;  %v172_v11 = vpop.xlane.xlu1 %171  ;;  %7555 = vrsqrt.f32 %v219_v5 }
 0x36b   :  { %v200_v14 = vmul.f32 0.03125, %v172_v11  ;;  %v267_v16 = vmul.f32 %v8078_v24, %v247_v2 }
 0x36c   :  { %v221_v33 = vadd.f32 1e-05, %v205_v9  ;;  %v7554_v34 = vpop.eup %7553 }
 0x36d   :  { %v216_v19 = vadd.f32 1e-05, %v200_v14  ;;  %v8343_v25 = vpop.permute.xlu0 %780  ;;  %v287_v30 = vadd.f32 %v8081_v32, %v267_v16  ;;  %v249_v31 = vmul.f32 %v7554_v34, %v8257_v49 }
 0x36e   :  { %v178_v27 = vpop.xlane.xlu1 %177  ;;  %6295 = vmatprep.subr.mxu0 %v8343_v25 }
 0x36f   :  { %7557 = vrsqrt.f32 %v216_v19  ;;  %v202_v35 = vmul.f32 0.03125, %v178_v27  ;;  %6255 = vmatprep.mubr.msk.f32.mxu0 %vm45_vm0, %v287_v30  ;;  %6296 = vmatpush3.msra.mxu0 %v8343_v25  ;;  %v269_v29 = vmul.f32 %v8078_v24, %v249_v31 }
 0x370   :  { %7559 = vrsqrt.f32 %v221_v33 }
 0x371   :  { %v218_v39 = vadd.f32 1e-05, %v202_v35  ;;  %v8350_v28 = vpop.permute.xlu0 %769  ;;  %v289_v61 = vadd.f32 %v8081_v32, %v269_v29  ;;  %v506_v35 = vld [vmem:[%s10380_s4 + $0x10] sm:$0xff] }
 0x372   :  { %v184_v41 = vpop.xlane.xlu1 %183 }
 0x373   :  { %7561 = vrsqrt.f32 %v218_v39  ;;  %v204_v44 = vmul.f32 0.03125, %v184_v41 }
 0x374   :  { %v7556_v36 = vpop.eup %7555 }
 0x375   :  { %v220_v46 = vadd.f32 1e-05, %v204_v44  ;;  %v251_v58 = vmul.f32 %v7556_v36, %v8264_v26  ;;  %v8362_v60 = vpop.permute.xlu0 %773  ;;  %v505_v26 = vld [vmem:[%s10380_s4 + $0x8] sm:$0xff] }
 0x376   :  { %v190_v47 = vpop.xlane.xlu1 %189 }
 0x377   :  { %7563 = vrsqrt.f32 %v220_v46  ;;  %v206_v51 = vmul.f32 0.03125, %v190_v47  ;;  %v507_v46 = vld [vmem:[%s10380_s4 + $0x18] sm:$0xff] }
 0x379   :  { %v7558_v21 = vpop.eup %7557  ;;  %v222_v52 = vadd.f32 1e-05, %v206_v51  ;;  %v8386_v27 = vpop.permute.xlu0 %777 }
 0x37a   :  { %v8352_v53 = vpop.permute.xlu1 %763  ;;  %v248_v54 = vmul.f32 %v7558_v21, %v8276_v45  ;;  %v7560_v42 = vpop.eup %7559  ;;  %v271_v45 = vmul.f32 %v8078_v24, %v251_v58  ;;  %v508_v21 = vld [vmem:[%s10380_s4 + $0x20] sm:$0xff] }
 0x37b   :  { %7565 = vrsqrt.f32 %v222_v52  ;;  %v253_v62 = vmul.f32 %v7560_v42, %v8272_v20 }
 0x37c   :  { %v268_v56 = vmul.f32 %v8078_v24, %v248_v54  ;;  %v291_v14 = vadd.f32 %v8081_v32, %v271_v45 }
 0x37d   :  { %v7562_v43 = vpop.eup %7561  ;;  %v273_v16 = vmul.f32 %v8078_v24, %v253_v62 }
 0x37e   :  { %v8358_v38 = vpop.permute.xlu1 %765  ;;  %v288_v49 = vadd.f32 %v8081_v32, %v268_v56  ;;  %v250_v59 = vmul.f32 %v7562_v43, %v8269_v40  ;;  %v504_v40 = vld [vmem:[%s10380_s4] sm:$0xff] }
 0x37f   :  { %v293_v51 = vadd.f32 %v8081_v32, %v273_v16 }
 0x380   :  { %6256 = vmatmul.mubr.msk.f32.gmra.mrb[8].mxu0 %vm45_vm0, %v288_v49  ;;  %v270_v63 = vmul.f32 %v8078_v24, %v250_v59  ;;  %v7402_v49 = vpop.permute.xlu0 %7401 }
 0x381   :  { %v7564_v48 = vpop.eup %7563  ;;  %6258 = vmatprep.mubr.msk.f32.mxu0 %vm45_vm0, %v289_v61 }
 0x382   :  { %v768_v0 = vpop.permute.xlu1 %767  ;;  %v6285_v2 = vpop.f32.mrb[0].mxu1  ;;  %v290_v5 = vadd.f32 %v8081_v32, %v270_v63  ;;  %v252_v20 = vmul.f32 %v7564_v48, %v8287_v37  ;;  %v7404_v63 = vunpack.i.h.bf16 %v7402_v49  ;;  %v7403_v48 = vunpack.i.l.bf16 %v7402_v49 }
 0x383   :  { %v8378_v9 = vadd.f32 %v6285_v2, %v505_v26  ;;  %v635_v11 = vpop.f32.mrb[1].mxu1 }
 0x384   :  { %v8382_v19 = vadd.f32 %v635_v11, %v504_v40  ;;  %6259 = vmatmul.mubr.msk.f32.gmra.mrb[10].mxu0 %vm45_vm0, %v290_v5  ;;  %v272_v30 = vmul.f32 %v8078_v24, %v252_v20  ;;  %v511_v5 = vld [vmem:[%s10380_s4 + $0x38] sm:$0xff] }
 0x385   :  { %v7566_v33 = vpop.eup %7565  ;;  %6261 = vmatprep.mubr.msk.f32.mxu0 %vm45_vm0, %v291_v14  ;;  %v678_v37 = vsel %vm674_vm3, %v8378_v9, -inf }
 0x386   :  { %v772_v39 = vpop.permute.xlu1 %771  ;;  %679 = vmax.xlane.f32.xlu0 %v678_v37  ;;  %v6288_v41 = vpop.f32.mrb[2].mxu1  ;;  %v675_v44 = vsel %vm674_vm3, %v8382_v19, -inf  ;;  %v292_v34 = vadd.f32 %v8081_v32, %v272_v30  ;;  %v254_v31 = vmul.f32 %v7566_v33, %v8293_v55  ;;  %v509_v55 = vld [vmem:[%s10380_s4 + $0x28] sm:$0xff]  ;;  %v6969_v33 = vpack.c.bf16 %v7404_v63, %v7403_v48 }
 0x387   :  { %v645_v47 = vpop.f32.mrb[3].mxu1  ;;  %676 = vmax.xlane.f32.xlu1 %v675_v44  ;;  %v8410_v54 = vadd.f32 %v6288_v41, %v507_v46 }
 0x388   :  { %v8402_v36 = vadd.f32 %v645_v47, %v506_v35  ;;  %6262 = vmatmul.mubr.msk.f32.gmra.mrb[12].mxu0 %vm45_vm0, %v292_v34  ;;  %v274_v52 = vmul.f32 %v8078_v24, %v254_v31  ;;  %v510_v24 = vld [vmem:[%s10380_s4 + $0x30] sm:$0xff] }
 0x389   :  { %6264 = vmatprep.mubr.msk.f32.mxu0 %vm45_vm0, %v293_v51  ;;  %v684_v26 = vsel %vm674_vm3, %v8410_v54, -inf }
 0x38a   :  { %v776_v29 = vpop.permute.xlu1 %775  ;;  %v6291_v58 = vpop.f32.mrb[4].mxu1  ;;  %v681_v42 = vsel %vm674_vm3, %v8402_v36, -inf  ;;  %v294_v43 = vadd.f32 %v8081_v32, %v274_v52 }
 0x38b   :  { %v655_v56 = vpop.f32.mrb[5].mxu1  ;;  %682 = vmax.xlane.f32.xlu0 %v681_v42  ;;  %v8424_v61 = vadd.f32 %v6291_v58, %v509_v55 }
 0x38c   :  { %v8418_v59 = vadd.f32 %v655_v56, %v508_v21  ;;  %6265 = vmatmul.mubr.msk.f32.gmra.mrb[14].mxu0 %vm45_vm0, %v294_v43 }
 0x38d   :  { %6297 = vmatprep.mubr.msk.f32.mxu0 %vm536_vm1, %v8352_v53  ;;  %v690_v16 = vsel %vm674_vm3, %v8424_v61, -inf }
 0x38e   :  { %v7397_v45 = vpop.permute.xlu1 %7396  ;;  %v6294_v62 = vpop.f32.mrb[6].mxu1  ;;  %v687_v32 = vsel %vm674_vm3, %v8418_v59, -inf }
 0x38f   :  { %v7399_v40 = vunpack.i.h.bf16 %v7397_v45  ;;  %v7398_v2 = vunpack.i.l.bf16 %v7397_v45  ;;  %v665_v20 = vpop.f32.mrb[7].mxu1  ;;  %685 = vmax.xlane.f32.xlu0 %v684_v26  ;;  %688 = vmax.xlane.f32.xlu1 %v687_v32  ;;  %v8439_v14 = vadd.f32 %v6294_v62, %v511_v5 }
 0x390   :  { %v8435_v53 = vadd.f32 %v665_v20, %v510_v24  ;;  %6298 = vmatmul.mubr.msk.f32.vlgmr.msra.gmra.mrb[16].mxu0 %vm536_vm1, %v8358_v38  ;;  %v1053_v38 = vpop.permute.xlu0 %1052 }
 0x391   :  { %v6963_v11 = vpack.c.bf16 %v7399_v40, %v7398_v2  ;;  %6300 = vmatprep.mubr.msk.f32.mxu0 %vm536_vm1, %v768_v0  ;;  %v696_v0 = vsel %vm674_vm3, %v8439_v14, -inf }
 0x392   :  { %v693_v30 = vsel %vm674_vm3, %v8435_v53, -inf  ;;  %v7407_v37 = vpop.permute.xlu1 %7406 }
 0x393   :  { %6965 = vmatprep.subr.msk.bf16.mxu0 %vm8219_vm2, %v6963_v11  ;;  %691 = vmax.xlane.f32.xlu0 %v690_v16  ;;  %v7409_v35 = vunpack.i.h.bf16 %v7407_v37  ;;  %v7408_v41 = vunpack.i.l.bf16 %v7407_v37 }
 0x394   :  { %694 = vmax.xlane.f32.xlu1 %v693_v30  ;;  %6968 = vmatpush3.bf16.xpose.msk.msra.mxu0 %vm8219_vm2, %v6963_v11  ;;  %v7412_v34 = vpop.permute.xlu0 %7411 }
 0x395   :  { %6301 = vmatmul.mubr.msk.f32.gmra.mrb[18].mxu0 %vm536_vm1, %v8350_v28  ;;  %6971 = vmatprep.subr.msk.bf16.mxu0 %vm8219_vm2, %v6969_v33  ;;  %v6975_v44 = vpack.c.bf16 %v7409_v35, %v7408_v41  ;;  %v7413_v46 = vunpack.i.l.bf16 %v7412_v34 }
 0x396   :  { %6303 = vmatprep.mubr.msk.f32.mxu0 %vm536_vm1, %v772_v39  ;;  %v1051_v28 = vpop.permute.xlu1 %1050  ;;  %v7414_v39 = vunpack.i.h.bf16 %v7412_v34 }
 0x397   :  { %697 = vmax.xlane.f32.xlu0 %v696_v0 }
 0x398   :  { %v6981_v47 = vpack.c.bf16 %v7414_v39, %v7413_v46 }
 0x399   :  { %6304 = vmatmul.mubr.msk.f32.gmra.mrb[20].mxu0 %vm536_vm1, %v8362_v60 }
 0x39a   :  { %6306 = vmatprep.mubr.msk.f32.mxu0 %vm536_vm1, %v776_v29  ;;  %v1055_v60 = vpop.permute.xlu1 %1054 }
 0x39c   :  { %6974 = vmatpush3.bf16.xpose.msk.msra.mxu0 %vm8219_vm2, %v6969_v33 }
 0x39d   :  { %6307 = vmatmul.mubr.msk.f32.gmra.mrb[22].mxu0 %vm536_vm1, %v8386_v27  ;;  %6977 = vmatprep.subr.msk.bf16.mxu0 %vm8219_vm2, %v6975_v44  ;;  %v1057_v27 = vpop.permute.xlu0 %1056 }
 0x39e   :  { %6353 = vmatprep.mubr.msk.f32.mxu0 %vm536_vm1, %v1051_v28  ;;  %v1059_v51 = vpop.permute.xlu1 %1058 }
 0x3a1   :  { %v1061_v31 = vpop.permute.xlu0 %1060 }
 0x3a2   :  { %v1063_v21 = vpop.permute.xlu1 %1062 }
 0x3a4   :  { %6980 = vmatpush3.bf16.xpose.msk.msra.mxu0 %vm8219_vm2, %v6975_v44 }
 0x3a5   :  { %6983 = vmatprep.subr.msk.bf16.mxu0 %vm8219_vm2, %v6981_v47  ;;  %1324 = vrot.lane.b32.xlu1 %v8061_v57, %s7940_s11  ;;  %v1065_v57 = vpop.permute.xlu0 %1064 }
 0x3ac   :  { %6986 = vmatpush3.bf16.xpose.msk.msra.mxu0 %vm8219_vm2, %v6981_v47 }
 0x3b3   :  { %6354 = vmatmul.mubr.msk.f32.vlgmr.msra.gmra.mrb[24].mxu0 %vm536_vm1, %v1053_v38 }
 0x3b4   :  { %6356 = vmatprep.mubr.msk.f32.mxu0 %vm536_vm1, %v1055_v60 }
 0x3b7   :  { %6357 = vmatmul.mubr.msk.f32.gmra.mrb[26].mxu0 %vm536_vm1, %v1057_v27 }
 0x3b8   :  { %6359 = vmatprep.mubr.msk.f32.mxu0 %vm536_vm1, %v1059_v51 }
 0x3bb   :  { %6360 = vmatmul.mubr.msk.f32.gmra.mrb[28].mxu0 %vm536_vm1, %v1061_v31 }
 0x3bc   :  { %6362 = vmatprep.mubr.msk.f32.mxu0 %vm536_vm1, %v1063_v21 }
 0x3bf   :  { %6363 = vmatmul.mubr.msk.f32.gmra.mrb[30].mxu0 %vm536_vm1, %v1065_v57 }
 0x413   :  { %v680_v52 = vpop.xlane.xlu0 %679 }
 0x414   :  { %v700_v29 = vsub.f32 %v8378_v9, %v680_v52  ;;  %v677_v58 = vpop.xlane.xlu1 %676 }
 0x415   :  { %v699_v42 = vsub.f32 %v8382_v19, %v677_v58 }
 0x416   :  { %v709_v55 = vmul.f32 1.442695, %v700_v29 }
 0x417   :  { %v707_v56 = vmul.f32 1.442695, %v699_v42 }
 0x418   :  { %7567 = vpow2.f32 %v709_v55  ;;  %v683_v43 = vpop.xlane.xlu0 %682 }
 0x419   :  { %7569 = vpow2.f32 %v707_v56  ;;  %v701_v49 = vsub.f32 %v8402_v36, %v683_v43 }
 0x41b   :  { %v711_v24 = vmul.f32 1.442695, %v701_v49 }
 0x41c   :  { %v686_v45 = vpop.xlane.xlu0 %685  ;;  %v689_v62 = vpop.xlane.xlu1 %688 }
 0x41d   :  { %7571 = vpow2.f32 %v711_v24  ;;  %v702_v26 = vsub.f32 %v8410_v54, %v686_v45  ;;  %v703_v32 = vsub.f32 %v8418_v59, %v689_v62 }
 0x41f   :  { %v713_v63 = vmul.f32 1.442695, %v702_v26  ;;  %v715_v9 = vmul.f32 1.442695, %v703_v32 }
 0x420   :  { %v692_v48 = vpop.xlane.xlu0 %691 }
 0x421   :  { %7573 = vpow2.f32 %v713_v63  ;;  %v704_v19 = vsub.f32 %v8424_v61, %v692_v48  ;;  %v695_v44 = vpop.xlane.xlu1 %694  ;;  %v5571_v63 = vld [vmem:[%s10380_s4 + $0x40] sm:$0xff] }
 0x422   :  { %v8488_v40 = vpop.eup %7567  ;;  %7575 = vpow2.f32 %v715_v9  ;;  %v705_v34 = vsub.f32 %v8435_v53, %v695_v44 }
 0x423   :  { %v8490_v2 = vpop.eup %7569  ;;  %v717_v36 = vmul.f32 1.442695, %v704_v19  ;;  %v726_v5 = vsel %vm674_vm3, %v8488_v40, 0.0 }
 0x424   :  { %727 = vadd.xlane.f32.xlu0 %v726_v5  ;;  %v698_v20 = vpop.xlane.xlu0 %697  ;;  %v723_v54 = vsel %vm674_vm3, %v8490_v2, 0.0  ;;  %v719_v46 = vmul.f32 1.442695, %v705_v34 }
 0x425   :  { %7577 = vpow2.f32 %v717_v36  ;;  %v706_v59 = vsub.f32 %v8439_v14, %v698_v20  ;;  %724 = vadd.xlane.f32.xlu1 %v723_v54  ;;  %v8560_v32 = vpop.permute.xlu1 %1324  ;;  %v5573_v36 = vld [vmem:[%s10380_s4 + $0x50] sm:$0xff]  ;;  %v5574_v54 = vld [vmem:[%s10380_s4 + $0x58] sm:$0xff] }
 0x427   :  { %v8497_v11 = vpop.eup %7571  ;;  %v721_v61 = vmul.f32 1.442695, %v706_v59 }
 0x428   :  { %v729_v16 = vsel %vm674_vm3, %v8497_v11, 0.0 }
 0x429   :  { %7579 = vpow2.f32 %v721_v61  ;;  %730 = vadd.xlane.f32.xlu1 %v729_v16 }
 0x42a   :  { %7581 = vpow2.f32 %v719_v46 }
 0x42b   :  { %v8501_v30 = vpop.eup %7573 }
 0x42c   :  { %v8503_v33 = vpop.eup %7575  ;;  %v732_v37 = vsel %vm674_vm3, %v8501_v30, 0.0 }
 0x42d   :  { %733 = vadd.xlane.f32.xlu0 %v732_v37  ;;  %v735_v14 = vsel %vm674_vm3, %v8503_v33, 0.0 }
 0x42e   :  { %736 = vadd.xlane.f32.xlu1 %v735_v14 }
 0x42f   :  { %v8509_v38 = vpop.eup %7577 }
 0x430   :  { %v738_v0 = vsel %vm674_vm3, %v8509_v38, 0.0 }
 0x431   :  { %739 = vadd.xlane.f32.xlu0 %v738_v0 }
 0x433   :  { %v8513_v35 = vpop.eup %7579 }
 0x434   :  { %v744_v41 = vsel %vm674_vm3, %v8513_v35, 0.0  ;;  %v8550_v21 = vpop.eup %7581 }
 0x435   :  { %745 = vadd.xlane.f32.xlu0 %v744_v41  ;;  %v741_v58 = vsel %vm674_vm3, %v8550_v21, 0.0  ;;  %v5575_v41 = vld [vmem:[%s10380_s4 + $0x60] sm:$0xff] }
 0x43f   :  { %1309 = vrot.lane.b32.xlu1 %v8118_v3, %s7944_s7 }
 0x443   :  { %1311 = vrot.lane.b32.xlu1 %v8133_v10, %s7944_s7 }
 0x44b   :  { %1307 = vrot.lane.b32.xlu0 %v8121_v4, %s7944_s7 }
 0x44f   :  { %1315 = vrot.lane.b32.xlu0 %v8145_v15, %s7944_s7 }
 0x453   :  { %v8526_v28 = vpop.f32.mrb[8].mxu0  ;;  %1319 = vrot.lane.b32.xlu0 %v8157_v22, %s7944_s7 }
 0x454   :  { %v8530_v39 = vpop.f32.mrb[9].mxu0 }
 0x457   :  { %v8532_v47 = vpop.f32.mrb[10].mxu0  ;;  %7416 = vrot.lane.b32.xlu0 %v8127_v7, %s7945_s8 }
 0x458   :  { %v8536_v60 = vpop.f32.mrb[11].mxu0 }
 0x45b   :  { %v8538_v27 = vpop.f32.mrb[12].mxu0  ;;  %7426 = vrot.lane.b32.xlu0 %v8151_v17, %s7945_s8 }
 0x45c   :  { %v8542_v53 = vpop.f32.mrb[13].mxu0 }
 0x45f   :  { %1594 = vrot.lane.b32.xlu0 %v8121_v4, %s7946_s9  ;;  %v8546_v51 = vpop.f32.mrb[14].mxu0 }
 0x460   :  { %v8548_v31 = vpop.f32.mrb[15].mxu0 }
 0x463   :  { %1598 = vrot.lane.b32.xlu0 %v8133_v10, %s7946_s9  ;;  %v6299_v57 = vpop.f32.mrb[16].mxu0 }
 0x464   :  { %v865_v52 = vpop.f32.mrb[17].mxu0 }
 0x465   :  { %v6947_v29 = vpack.c.bf16 %v6299_v57, %v865_v52  ;;  %v5577_v52 = vld [vmem:[%s10380_s4 + $0x70] sm:$0xff] }
 0x467   :  { %742 = vadd.xlane.f32.xlu1 %v741_v58  ;;  %1602 = vrot.lane.b32.xlu0 %v8145_v15, %s7946_s9 }
 0x468   :  { %v6302_v42 = vpop.f32.mrb[18].mxu0  ;;  %6948 = vmatprep.subr.bf16.mxu1 %v6947_v29 }
 0x469   :  { %v875_v55 = vpop.f32.mrb[19].mxu0  ;;  %6950 = vmatpush3.bf16.msra.mxu1 %v6947_v29 }
 0x46a   :  { %v6951_v56 = vpack.c.bf16 %v6302_v42, %v875_v55 }
 0x46b   :  { %1606 = vrot.lane.b32.xlu0 %v8157_v22, %s7946_s9 }
 0x46c   :  { %v6305_v43 = vpop.f32.mrb[20].mxu0  ;;  %6952 = vmatprep.subr.bf16.mxu1 %v6951_v56 }
 0x46d   :  { %v885_v49 = vpop.f32.mrb[21].mxu0  ;;  %6954 = vmatpush3.bf16.msra.mxu1 %v6951_v56 }
 0x46e   :  { %v6955_v24 = vpack.c.bf16 %v6305_v43, %v885_v49  ;;  %v5572_v43 = vld [vmem:[%s10380_s4 + $0x48] sm:$0xff] }
 0x470   :  { %v6308_v45 = vpop.f32.mrb[22].mxu0  ;;  %6956 = vmatprep.subr.bf16.mxu1 %v6955_v24 }
 0x471   :  { %v895_v62 = vpop.f32.mrb[23].mxu0  ;;  %6958 = vmatpush3.bf16.msra.mxu1 %v6955_v24 }
 0x472   :  { %v6959_v26 = vpack.c.bf16 %v6308_v45, %v895_v62  ;;  %v5576_v45 = vld [vmem:[%s10380_s4 + $0x68] sm:$0xff] }
 0x474   :  { %6960 = vmatprep.subr.bf16.mxu1 %v6959_v26 }
 0x475   :  { %6962 = vmatpush3.bf16.msra.mxu1 %v6959_v26 }
 0x476   :  { %6365 = vmatprep.subr.mxu1 %v8560_v32 }
 0x478   :  { %1313 = vrot.lane.b32.xlu1 %v8130_v8, %s7944_s7 }
 0x47c   :  { %1317 = vrot.lane.b32.xlu1 %v8142_v13, %s7944_s7 }
 0x480   :  { %1321 = vrot.lane.b32.xlu1 %v8154_v18, %s7944_s7 }
 0x484   :  { %7421 = vrot.lane.b32.xlu1 %v8139_v12, %s7945_s8 }
 0x486   :  { %v6355_v9 = vpop.f32.mrb[24].mxu0 }
 0x487   :  { %v1180_v48 = vpop.f32.mrb[25].mxu0  ;;  %v8619_v24 = vadd.f32 %v6355_v9, %v5572_v43 }
 0x488   :  { %v8574_v19 = vadd.f32 %v5571_v63, %v1180_v48  ;;  %7431 = vrot.lane.b32.xlu1 %v8163_v23, %s7945_s8 }
 0x489   :  { %v1222_v48 = vsel %vm674_vm3, %v8619_v24, -inf }
 0x48a   :  { %v6358_v5 = vpop.f32.mrb[26].mxu0  ;;  %v1219_v20 = vsel %vm674_vm3, %v8574_v19, -inf }
 0x48b   :  { %v1190_v59 = vpop.f32.mrb[27].mxu0  ;;  %1220 = vmax.xlane.f32.xlu0 %v1219_v20  ;;  %v8590_v16 = vadd.f32 %v6358_v5, %v5574_v54  ;;  %v5578_v5 = vld [vmem:[%s10380_s4 + $0x78] sm:$0xff] }
 0x48c   :  { %v8586_v61 = vadd.f32 %v5573_v36, %v1190_v59  ;;  %1596 = vrot.lane.b32.xlu1 %v8118_v3, %s7946_s9 }
 0x48d   :  { %v1228_v46 = vsel %vm674_vm3, %v8590_v16, -inf }
 0x48e   :  { %v6361_v37 = vpop.f32.mrb[28].mxu0  ;;  %v1225_v14 = vsel %vm674_vm3, %v8586_v61, -inf }
 0x48f   :  { %v1200_v0 = vpop.f32.mrb[29].mxu0  ;;  %1226 = vmax.xlane.f32.xlu0 %v1225_v14  ;;  %v8624_v26 = vadd.f32 %v6361_v37, %v5576_v45 }
 0x490   :  { %1600 = vrot.lane.b32.xlu1 %v8130_v8, %s7946_s9  ;;  %v8599_v44 = vadd.f32 %v5575_v41, %v1200_v0 }
 0x491   :  { %v1234_v14 = vsel %vm674_vm3, %v8624_v26, -inf }
 0x492   :  { %v6364_v34 = vpop.f32.mrb[30].mxu0  ;;  %v1231_v58 = vsel %vm674_vm3, %v8599_v44, -inf }
 0x493   :  { %v1210_v57 = vpop.f32.mrb[31].mxu0  ;;  %1229 = vmax.xlane.f32.xlu0 %v1228_v46  ;;  %v8632_v59 = vadd.f32 %v6364_v34, %v5578_v5 }
 0x494   :  { %1604 = vrot.lane.b32.xlu1 %v8142_v13, %s7946_s9  ;;  %v8608_v29 = vadd.f32 %v5577_v52, %v1210_v57 }
 0x496   :  { %v1237_v42 = vsel %vm674_vm3, %v8608_v29, -inf }
 0x497   :  { %1232 = vmax.xlane.f32.xlu0 %v1231_v58 }
 0x498   :  { %1608 = vrot.lane.b32.xlu1 %v8154_v18, %s7946_s9 }
 0x49b   :  { %1238 = vmax.xlane.f32.xlu0 %v1237_v42 }
 0x4b1   :  { %v728_v55 = vpop.xlane.xlu0 %727 }
 0x4b2   :  { %7583 = vrcp.f32 %v728_v55  ;;  %v725_v56 = vpop.xlane.xlu1 %724 }
 0x4b3   :  { %7585 = vrcp.f32 %v725_v56 }
 0x4b6   :  { %v731_v49 = vpop.xlane.xlu1 %730 }
 0x4b7   :  { %7587 = vrcp.f32 %v731_v49 }
 0x4ba   :  { %v734_v62 = vpop.xlane.xlu0 %733 }
 0x4bb   :  { %7589 = vrcp.f32 %v734_v62  ;;  %v737_v63 = vpop.xlane.xlu1 %736 }
 0x4bc   :  { %v7584_v36 = vpop.eup %7583  ;;  %7591 = vrcp.f32 %v737_v63  ;;  %1223 = vmax.xlane.f32.xlu1 %v1222_v48 }
 0x4bd   :  { %v7586_v9 = vpop.eup %7585  ;;  %v756_v37 = vmul.f32 %v7584_v36, %v8488_v40 }
 0x4be   :  { %v740_v20 = vpop.xlane.xlu0 %739  ;;  %v755_v54 = vmul.f32 %v7586_v9, %v8490_v2  ;;  %v1240_v2 = vsel %vm674_vm3, %v8632_v59, -inf }
 0x4bf   :  { %7593 = vrcp.f32 %v740_v20 }
 0x4c0   :  { %1235 = vmax.xlane.f32.xlu1 %v1234_v14  ;;  %6325 = vmatprep.mubr.msk.f32.mxu1 %vm674_vm3, %v755_v54 }
 0x4c1   :  { %v7588_v0 = vpop.eup %7587  ;;  %6326 = vmatmul.mubr.msk.f32.vlgmr.msra.gmra.mrb[8].mxu1 %vm674_vm3, %v756_v37 }
 0x4c2   :  { %6366 = vmatpush3.msra.mxu1 %v8560_v32  ;;  %v746_v41 = vpop.xlane.xlu0 %745  ;;  %v757_v46 = vmul.f32 %v7588_v0, %v8497_v11 }
 0x4c3   :  { %7595 = vrcp.f32 %v746_v41 }
 0x4c4   :  { %1241 = vmax.xlane.f32.xlu1 %v1240_v2  ;;  %6328 = vmatprep.mubr.msk.f32.mxu1 %vm674_vm3, %v757_v46 }
 0x4c5   :  { %v7590_v40 = vpop.eup %7589 }
 0x4c6   :  { %v7592_v34 = vpop.eup %7591  ;;  %v1308_v57 = vpop.permute.xlu0 %1307  ;;  %v758_v52 = vmul.f32 %v7590_v40, %v8501_v30 }
 0x4c7   :  { %v759_v58 = vmul.f32 %v7592_v34, %v8503_v33  ;;  %v1310_v33 = vpop.permute.xlu1 %1309 }
 0x4c8   :  { %6329 = vmatmul.mubr.msk.f32.gmra.mrb[10].mxu1 %vm674_vm3, %v758_v52 }
 0x4c9   :  { %v7594_v42 = vpop.eup %7593  ;;  %6331 = vmatprep.mubr.msk.f32.mxu1 %vm674_vm3, %v759_v58 }
 0x4ca   :  { %v1316_v55 = vpop.permute.xlu0 %1315  ;;  %v760_v11 = vmul.f32 %v7594_v42, %v8509_v38 }
 0x4cb   :  { %v1312_v48 = vpop.permute.xlu1 %1311 }
 0x4cc   :  { %6332 = vmatmul.mubr.msk.f32.gmra.mrb[12].mxu1 %vm674_vm3, %v760_v11 }
 0x4cd   :  { %v7596_v9 = vpop.eup %7595 }
 0x4ce   :  { %v1320_v56 = vpop.permute.xlu0 %1319  ;;  %v762_v14 = vmul.f32 %v7596_v9, %v8513_v35 }
 0x4d2   :  { %v7417_v43 = vpop.permute.xlu0 %7416 }
 0x4d3   :  { %v7419_v49 = vunpack.i.h.bf16 %v7417_v43  ;;  %v7418_v45 = vunpack.i.l.bf16 %v7417_v43 }
 0x4d5   :  { %v7003_v62 = vpack.c.bf16 %v7419_v49, %v7418_v45 }
 0x4d6   :  { %v7427_v63 = vpop.permute.xlu0 %7426 }
 0x4d7   :  { %7005 = vmatprep.subr.msk.bf16.mxu0 %vm8219_vm2, %v7003_v62  ;;  %v7429_v46 = vunpack.i.h.bf16 %v7427_v63  ;;  %v7428_v41 = vunpack.i.l.bf16 %v7427_v63 }
 0x4d8   :  { %7008 = vmatpush3.bf16.xpose.msk.msra.mxu0 %vm8219_vm2, %v7003_v62 }
 0x4da   :  { %v1595_v30 = vpop.permute.xlu0 %1594 }
 0x4db   :  { %6423 = vmatprep.mubr.msk.f32.mxu0 %vm536_vm1, %v1595_v30 }
 0x4de   :  { %v1599_v52 = vpop.permute.xlu0 %1598 }
 0x4e2   :  { %v1603_v42 = vpop.permute.xlu0 %1602 }
 0x4e6   :  { %v1607_v43 = vpop.permute.xlu0 %1606 }
 0x4f4   :  { %v743_v38 = vpop.xlane.xlu1 %742 }
 0x4f5   :  { %7597 = vrcp.f32 %v743_v38 }
 0x4f8   :  { %v1314_v36 = vpop.permute.xlu1 %1313 }
 0x4fc   :  { %v1318_v5 = vpop.permute.xlu1 %1317 }
 0x4ff   :  { %v7598_v20 = vpop.eup %7597 }
 0x500   :  { %v1322_v54 = vpop.permute.xlu1 %1321  ;;  %v761_v37 = vmul.f32 %v7598_v20, %v8550_v21  ;;  %v7015_v21 = vpack.c.bf16 %v7429_v46, %v7428_v41 }
 0x502   :  { %6334 = vmatprep.mubr.msk.f32.mxu1 %vm674_vm3, %v761_v37 }
 0x503   :  { %6335 = vmatmul.mubr.msk.f32.gmra.mrb[14].mxu1 %vm674_vm3, %v762_v14 }
 0x504   :  { %6367 = vmatprep.mubr.msk.f32.mxu1 %vm536_vm1, %v1308_v57  ;;  %v7422_v0 = vpop.permute.xlu1 %7421 }
 0x505   :  { %v7424_v2 = vunpack.i.h.bf16 %v7422_v0  ;;  %v7423_v40 = vunpack.i.l.bf16 %v7422_v0 }
 0x507   :  { %v7009_v34 = vpack.c.bf16 %v7424_v2, %v7423_v40  ;;  %6368 = vmatmul.mubr.msk.f32.vlgmr.msra.gmra.mrb[16].mxu1 %vm536_vm1, %v1310_v33 }
 0x508   :  { %6370 = vmatprep.mubr.msk.f32.mxu1 %vm536_vm1, %v1312_v48  ;;  %v7432_v35 = vpop.permute.xlu1 %7431 }
 0x509   :  { %7011 = vmatprep.subr.msk.bf16.mxu0 %vm8219_vm2, %v7009_v34  ;;  %v7434_v57 = vunpack.i.h.bf16 %v7432_v35  ;;  %v7433_v58 = vunpack.i.l.bf16 %v7432_v35 }
 0x50a   :  { %7014 = vmatpush3.bf16.xpose.msk.msra.mxu0 %vm8219_vm2, %v7009_v34 }
 0x50b   :  { %6371 = vmatmul.mubr.msk.f32.gmra.mrb[18].mxu1 %vm536_vm1, %v1314_v36  ;;  %7017 = vmatprep.subr.msk.bf16.mxu0 %vm8219_vm2, %v7015_v21  ;;  %v7021_v11 = vpack.c.bf16 %v7434_v57, %v7433_v58 }
 0x50c   :  { %6373 = vmatprep.mubr.msk.f32.mxu1 %vm536_vm1, %v1316_v55  ;;  %v1597_v45 = vpop.permute.xlu1 %1596 }
 0x50f   :  { %6374 = vmatmul.mubr.msk.f32.gmra.mrb[20].mxu1 %vm536_vm1, %v1318_v5 }
 0x510   :  { %6376 = vmatprep.mubr.msk.f32.mxu1 %vm536_vm1, %v1320_v56  ;;  %v1601_v33 = vpop.permute.xlu1 %1600 }
 0x512   :  { %7020 = vmatpush3.bf16.xpose.msk.msra.mxu0 %vm8219_vm2, %v7015_v21 }
 0x513   :  { %6377 = vmatmul.mubr.msk.f32.gmra.mrb[22].mxu1 %vm536_vm1, %v1322_v54  ;;  %7023 = vmatprep.subr.msk.bf16.mxu0 %vm8219_vm2, %v7021_v11 }
 0x514   :  { %v1605_v36 = vpop.permute.xlu1 %1604 }
 0x518   :  { %v1221_v49 = vpop.xlane.xlu0 %1220  ;;  %v1609_v14 = vpop.permute.xlu1 %1608 }
 0x519   :  { %v1243_v55 = vsub.f32 %v8574_v19, %v1221_v49 }
 0x51a   :  { %7026 = vmatpush3.bf16.xpose.msk.msra.mxu0 %vm8219_vm2, %v7021_v11 }
 0x51b   :  { %v1251_v62 = vmul.f32 1.442695, %v1243_v55 }
 0x51c   :  { %v1227_v63 = vpop.xlane.xlu0 %1226 }
 0x51d   :  { %7599 = vpow2.f32 %v1251_v62  ;;  %v1245_v56 = vsub.f32 %v8586_v61, %v1227_v63 }
 0x51f   :  { %v1255_v30 = vmul.f32 1.442695, %v1245_v56 }
 0x520   :  { %v1230_v48 = vpop.xlane.xlu0 %1229 }
 0x521   :  { %7601 = vpow2.f32 %v1255_v30  ;;  %6424 = vmatmul.mubr.msk.f32.vlgmr.msra.gmra.mrb[32].mxu0 %vm536_vm1, %v1597_v45  ;;  %v1246_v40 = vsub.f32 %v8590_v16, %v1230_v48 }
 0x522   :  { %6426 = vmatprep.mubr.msk.f32.mxu0 %vm536_vm1, %v1599_v52 }
 0x523   :  { %v1257_v21 = vmul.f32 1.442695, %v1246_v40 }
 0x524   :  { %v1233_v38 = vpop.xlane.xlu0 %1232 }
 0x525   :  { %v1247_v19 = vsub.f32 %v8599_v44, %v1233_v38  ;;  %6427 = vmatmul.mubr.msk.f32.gmra.mrb[34].mxu0 %vm536_vm1, %v1601_v33 }
 0x526   :  { %6429 = vmatprep.mubr.msk.f32.mxu0 %vm536_vm1, %v1603_v42  ;;  %v7887_v42 = vld [vmem:[%s10378_s2 + $0x20] sm:$0xff] }
 0x527   :  { %v8686_v5 = vpop.eup %7599  ;;  %v1259_v9 = vmul.f32 1.442695, %v1247_v19 }
 0x528   :  { %v1239_v61 = vpop.xlane.xlu0 %1238  ;;  %v1267_v20 = vsel %vm674_vm3, %v8686_v5, 0.0 }
 0x529   :  { %7603 = vpow2.f32 %v1259_v9  ;;  %v1249_v54 = vsub.f32 %v8608_v29, %v1239_v61  ;;  %6430 = vmatmul.mubr.msk.f32.gmra.mrb[36].mxu0 %vm536_vm1, %v1605_v36  ;;  %1268 = vadd.xlane.f32.xlu0 %v1267_v20 }
 0x52a   :  { %6432 = vmatprep.mubr.msk.f32.mxu0 %vm536_vm1, %v1607_v43 }
 0x52b   :  { %v8693_v44 = vpop.eup %7601  ;;  %v1263_v37 = vmul.f32 1.442695, %v1249_v54 }
 0x52c   :  { %v1273_v0 = vsel %vm674_vm3, %v8693_v44, 0.0 }
 0x52d   :  { %7605 = vpow2.f32 %v1263_v37  ;;  %6433 = vmatmul.mubr.msk.f32.gmra.mrb[38].mxu0 %vm536_vm1, %v1609_v14  ;;  %1274 = vadd.xlane.f32.xlu0 %v1273_v0 }
 0x533   :  { %v8698_v46 = vpop.eup %7603 }
 0x534   :  { %v1279_v29 = vsel %vm674_vm3, %v8698_v46, 0.0 }
 0x535   :  { %1280 = vadd.xlane.f32.xlu0 %v1279_v29 }
 0x537   :  { %v8702_v41 = vpop.eup %7605 }
 0x538   :  { %v1285_v2 = vsel %vm674_vm3, %v8702_v41, 0.0 }
 0x539   :  { %1286 = vadd.xlane.f32.xlu0 %v1285_v2 }
 0x549   :  { %v1224_v34 = vpop.xlane.xlu1 %1223 }
 0x54a   :  { %v1244_v52 = vsub.f32 %v8619_v24, %v1224_v34 }
 0x54c   :  { %v1253_v35 = vmul.f32 1.442695, %v1244_v52 }
 0x54d   :  { %v1236_v57 = vpop.xlane.xlu1 %1235 }
 0x54e   :  { %7607 = vpow2.f32 %v1253_v35  ;;  %v1248_v58 = vsub.f32 %v8624_v26, %v1236_v57  ;;  %v5612_v35 = vld [vmem:[%s10380_s4 + $0x88] sm:$0xff] }
 0x54f   :  { %1868 = vrot.lane.b32.xlu0 %v7887_v42, %s7940_s11  ;;  %7609 = vpow2.f32 %v1257_v21  ;;  %v5611_v42 = vld [vmem:[%s10380_s4 + $0x80] sm:$0xff] }
 0x550   :  { %v1261_v11 = vmul.f32 1.442695, %v1248_v58 }
 0x551   :  { %v1242_v43 = vpop.xlane.xlu1 %1241 }
 0x552   :  { %v1250_v16 = vsub.f32 %v8632_v59, %v1242_v43  ;;  %7611 = vpow2.f32 %v1261_v11 }
 0x553   :  { %1857 = vrot.lane.b32.xlu0 %v8130_v8, %s7947_s15 }
 0x554   :  { %v1265_v24 = vmul.f32 1.442695, %v1250_v16 }
 0x556   :  { %7613 = vpow2.f32 %v1265_v24 }
 0x557   :  { %1861 = vrot.lane.b32.xlu0 %v8142_v13, %s7947_s15 }
 0x558   :  { %v8718_v26 = vpop.eup %7607 }
 0x559   :  { %v1270_v49 = vsel %vm674_vm3, %v8718_v26, 0.0  ;;  %v8722_v55 = vpop.eup %7609 }
 0x55a   :  { %1271 = vadd.xlane.f32.xlu1 %v1270_v49  ;;  %v1276_v59 = vsel %vm674_vm3, %v8722_v55, 0.0 }
 0x55b   :  { %1865 = vrot.lane.b32.xlu0 %v8154_v18, %s7947_s15 }
 0x55c   :  { %v8728_v45 = vpop.eup %7611 }
 0x55d   :  { %v1282_v62 = vsel %vm674_vm3, %v8728_v45, 0.0 }
 0x55e   :  { %1277 = vadd.xlane.f32.xlu1 %v1276_v59 }
 0x55f   :  { %7441 = vrot.lane.b32.xlu0 %v8139_v12, %s7948_s16 }
 0x560   :  { %v8734_v63 = vpop.eup %7613 }
 0x561   :  { %v1288_v56 = vsel %vm674_vm3, %v8734_v63, 0.0 }
 0x562   :  { %1283 = vadd.xlane.f32.xlu1 %v1282_v62 }
 0x563   :  { %7451 = vrot.lane.b32.xlu0 %v8163_v23, %s7948_s16 }
 0x566   :  { %1289 = vadd.xlane.f32.xlu1 %v1288_v56 }
 0x567   :  { %2140 = vrot.lane.b32.xlu0 %v8118_v3, %s7949_s17 }
 0x56b   :  { %2144 = vrot.lane.b32.xlu0 %v8130_v8, %s7949_s17 }
 0x56f   :  { %2148 = vrot.lane.b32.xlu0 %v8142_v13, %s7949_s17 }
 0x573   :  { %2152 = vrot.lane.b32.xlu0 %v8154_v18, %s7949_s17 }
 0x577   :  { %1851 = vrot.lane.b32.xlu1 %v8121_v4, %s7947_s15 }
 0x57b   :  { %1853 = vrot.lane.b32.xlu1 %v8118_v3, %s7947_s15 }
 0x57f   :  { %1855 = vrot.lane.b32.xlu1 %v8133_v10, %s7947_s15 }
 0x583   :  { %1859 = vrot.lane.b32.xlu1 %v8145_v15, %s7947_s15 }
 0x587   :  { %1863 = vrot.lane.b32.xlu1 %v8157_v22, %s7947_s15 }
 0x58b   :  { %7436 = vrot.lane.b32.xlu1 %v8127_v7, %s7948_s16 }
 0x58f   :  { %7446 = vrot.lane.b32.xlu1 %v8151_v17, %s7948_s16 }
 0x593   :  { %2138 = vrot.lane.b32.xlu1 %v8121_v4, %s7949_s17 }
 0x597   :  { %2142 = vrot.lane.b32.xlu1 %v8133_v10, %s7949_s17 }
 0x59b   :  { %2146 = vrot.lane.b32.xlu1 %v8145_v15, %s7949_s17 }
 0x59f   :  { %2150 = vrot.lane.b32.xlu1 %v8157_v22, %s7949_s17 }
 0x5b6   :  { %v1269_v12 = vpop.xlane.xlu0 %1268 }
 0x5b7   :  { %7615 = vrcp.f32 %v1269_v12 }
 0x5ba   :  { %v1275_v30 = vpop.xlane.xlu0 %1274 }
 0x5bb   :  { %7617 = vrcp.f32 %v1275_v30 }
 0x5c1   :  { %v7616_v23 = vpop.eup %7615 }
 0x5c2   :  { %v1299_v7 = vmul.f32 %v7616_v23, %v8686_v5  ;;  %v1281_v19 = vpop.xlane.xlu0 %1280  ;;  %v5613_v23 = vld [vmem:[%s10380_s4 + $0x90] sm:$0xff] }
 0x5c4   :  { %6395 = vmatprep.mubr.msk.f32.mxu1 %vm674_vm3, %v1299_v7 }
 0x5c5   :  { %v7618_v52 = vpop.eup %7617 }
 0x5c6   :  { %v1287_v37 = vpop.xlane.xlu0 %1286  ;;  %v1301_v43 = vmul.f32 %v7618_v52, %v8693_v44 }
 0x5ca   :  { %v8772_v2 = vpop.permute.xlu0 %1868 }
 0x5da   :  { %v6369_v17 = vpop.f32.mrb[16].mxu1 }
 0x5db   :  { %v1409_v33 = vpop.f32.mrb[17].mxu1 }
 0x5dc   :  { %v6987_v48 = vpack.c.bf16 %v6369_v17, %v1409_v33 }
 0x5de   :  { %v6372_v38 = vpop.f32.mrb[18].mxu1  ;;  %6988 = vmatprep.subr.bf16.mxu1 %v6987_v48 }
 0x5df   :  { %v1419_v36 = vpop.f32.mrb[19].mxu1  ;;  %6990 = vmatpush3.bf16.msra.mxu1 %v6987_v48  ;;  %v5614_v48 = vld [vmem:[%s10380_s4 + $0x98] sm:$0xff] }
 0x5e0   :  { %v6991_v9 = vpack.c.bf16 %v6372_v38, %v1419_v36 }
 0x5e2   :  { %v6375_v61 = vpop.f32.mrb[20].mxu1  ;;  %6992 = vmatprep.subr.bf16.mxu1 %v6991_v9 }
 0x5e3   :  { %v1429_v20 = vpop.f32.mrb[21].mxu1  ;;  %6994 = vmatpush3.bf16.msra.mxu1 %v6991_v9 }
 0x5e4   :  { %v6995_v54 = vpack.c.bf16 %v6375_v61, %v1429_v20 }
 0x5e6   :  { %v6378_v14 = vpop.f32.mrb[22].mxu1  ;;  %6996 = vmatprep.subr.bf16.mxu1 %v6995_v54 }
 0x5e7   :  { %v1439_v5 = vpop.f32.mrb[23].mxu1  ;;  %6998 = vmatpush3.bf16.msra.mxu1 %v6995_v54  ;;  %v1272_v0 = vpop.xlane.xlu1 %1271 }
 0x5e8   :  { %v6999_v29 = vpack.c.bf16 %v6378_v14, %v1439_v5  ;;  %7619 = vrcp.f32 %v1272_v0  ;;  %v5616_v5 = vld [vmem:[%s10380_s4 + $0xa8] sm:$0xff] }
 0x5e9   :  { %7621 = vrcp.f32 %v1281_v19 }
 0x5ea   :  { %7000 = vmatprep.subr.bf16.mxu1 %v6999_v29 }
 0x5eb   :  { %7002 = vmatpush3.bf16.msra.mxu1 %v6999_v29  ;;  %v1278_v40 = vpop.xlane.xlu1 %1277 }
 0x5ec   :  { %7623 = vrcp.f32 %v1278_v40  ;;  %6435 = vmatprep.subr.mxu1 %v8772_v2 }
 0x5ed   :  { %7625 = vrcp.f32 %v1287_v37 }
 0x5ef   :  { %v1284_v34 = vpop.xlane.xlu1 %1283 }
 0x5f0   :  { %7627 = vrcp.f32 %v1284_v34 }
 0x5f2   :  { %v7620_v21 = vpop.eup %7619 }
 0x5f3   :  { %v1300_v57 = vmul.f32 %v7620_v21, %v8718_v26  ;;  %v1290_v58 = vpop.xlane.xlu1 %1289  ;;  %v7622_v16 = vpop.eup %7621 }
 0x5f4   :  { %7629 = vrcp.f32 %v1290_v58  ;;  %v6425_v11 = vpop.f32.mrb[32].mxu0  ;;  %v1858_v26 = vpop.permute.xlu0 %1857  ;;  %v1303_v30 = vmul.f32 %v7622_v16, %v8698_v46  ;;  %v5615_v46 = vld [vmem:[%s10380_s4 + $0xa0] sm:$0xff]  ;;  %v5618_v58 = vld [vmem:[%s10380_s4 + $0xb8] sm:$0xff] }
 0x5f5   :  { %v8783_v24 = vadd.f32 %v6425_v11, %v5612_v35  ;;  %6396 = vmatmul.mubr.msk.f32.vlgmr.msra.gmra.mrb[8].mxu1 %vm674_vm3, %v1300_v57  ;;  %v1724_v49 = vpop.f32.mrb[33].mxu0 }
 0x5f6   :  { %v7624_v59 = vpop.eup %7623  ;;  %v8786_v62 = vadd.f32 %v5611_v42, %v1724_v49  ;;  %6398 = vmatprep.mubr.msk.f32.mxu1 %vm674_vm3, %v1301_v43  ;;  %6436 = vmatpush3.msra.mxu1 %v8772_v2 }
 0x5f7   :  { %v1852_v56 = vpop.permute.xlu1 %1851  ;;  %v1766_v12 = vsel %vm674_vm3, %v8783_v24, -inf  ;;  %v1302_v44 = vmul.f32 %v7624_v59, %v8722_v55  ;;  %v7626_v33 = vpop.eup %7625 }
 0x5f8   :  { %1767 = vmax.xlane.f32.xlu0 %v1766_v12  ;;  %v6428_v7 = vpop.f32.mrb[34].mxu0  ;;  %v1763_v17 = vsel %vm674_vm3, %v8786_v62, -inf  ;;  %v1305_v37 = vmul.f32 %v7626_v33, %v8702_v41  ;;  %v1862_v14 = vpop.permute.xlu0 %1861  ;;  %v5617_v41 = vld [vmem:[%s10380_s4 + $0xb0] sm:$0xff] }
 0x5f9   :  { %6399 = vmatmul.mubr.msk.f32.gmra.mrb[10].mxu1 %vm674_vm3, %v1302_v44  ;;  %v1734_v38 = vpop.f32.mrb[35].mxu0  ;;  %1764 = vmax.xlane.f32.xlu1 %v1763_v17  ;;  %v8810_v61 = vadd.f32 %v6428_v7, %v5614_v48 }
 0x5fa   :  { %v7628_v55 = vpop.eup %7627  ;;  %v8803_v19 = vadd.f32 %v5613_v23, %v1734_v38  ;;  %6401 = vmatprep.mubr.msk.f32.mxu1 %vm674_vm3, %v1303_v30 }
 0x5fb   :  { %v1854_v36 = vpop.permute.xlu1 %1853  ;;  %v1304_v9 = vmul.f32 %v7628_v55, %v8728_v45  ;;  %v1772_v35 = vsel %vm674_vm3, %v8810_v61, -inf }
 0x5fc   :  { %v6431_v20 = vpop.f32.mrb[36].mxu0  ;;  %v1769_v54 = vsel %vm674_vm3, %v8803_v19, -inf  ;;  %v1866_v11 = vpop.permute.xlu0 %1865 }
 0x5fd   :  { %6402 = vmatmul.mubr.msk.f32.gmra.mrb[12].mxu1 %vm674_vm3, %v1304_v9  ;;  %v1744_v45 = vpop.f32.mrb[37].mxu0  ;;  %1770 = vmax.xlane.f32.xlu0 %v1769_v54  ;;  %v8826_v52 = vadd.f32 %v6431_v20, %v5616_v5 }
 0x5fe   :  { %v7630_v0 = vpop.eup %7629  ;;  %v8819_v29 = vadd.f32 %v5615_v46, %v1744_v45  ;;  %6404 = vmatprep.mubr.msk.f32.mxu1 %vm674_vm3, %v1305_v37  ;;  %v7888_v46 = vld [vmem:[%s10378_s2 + $0x30] sm:$0xff] }
 0x5ff   :  { %v1856_v40 = vpop.permute.xlu1 %1855  ;;  %v1306_v34 = vmul.f32 %v7630_v0, %v8734_v63  ;;  %v1778_v49 = vsel %vm674_vm3, %v8826_v52, -inf }
 0x600   :  { %v6434_v21 = vpop.f32.mrb[38].mxu0  ;;  %v1775_v57 = vsel %vm674_vm3, %v8819_v29, -inf  ;;  %v7442_v44 = vpop.permute.xlu0 %7441 }
 0x601   :  { %6405 = vmatmul.mubr.msk.f32.gmra.mrb[14].mxu1 %vm674_vm3, %v1306_v34  ;;  %v1754_v63 = vpop.f32.mrb[39].mxu0  ;;  %1773 = vmax.xlane.f32.xlu0 %v1772_v35  ;;  %v8839_v16 = vadd.f32 %v6434_v21, %v5618_v58  ;;  %v7444_v7 = vunpack.i.h.bf16 %v7442_v44  ;;  %v7443_v17 = vunpack.i.l.bf16 %v7442_v44  ;;  %v8883_v35 = vadd.f32 %v8530_v39, %v8115_v1 }
 0x602   :  { %v8836_v42 = vadd.f32 %v5617_v41, %v1754_v63  ;;  %1776 = vmax.xlane.f32.xlu1 %v1775_v57  ;;  %6437 = vmatprep.mubr.msk.f32.mxu1 %vm536_vm1, %v1852_v56 }
 0x603   :  { %v1860_v43 = vpop.permute.xlu1 %1859  ;;  %v1784_v56 = vsel %vm674_vm3, %v8839_v16, -inf  ;;  %v7049_v55 = vpack.c.bf16 %v7444_v7, %v7443_v17 }
 0x604   :  { %v1781_v59 = vsel %vm674_vm3, %v8836_v42, -inf  ;;  %v7452_v54 = vpop.permute.xlu0 %7451 }
 0x605   :  { %6438 = vmatmul.mubr.msk.f32.vlgmr.msra.gmra.mrb[24].mxu1 %vm536_vm1, %v1854_v36  ;;  %1779 = vmax.xlane.f32.xlu0 %v1778_v49  ;;  %v7454_v37 = vunpack.i.h.bf16 %v7452_v54 }
 0x606   :  { %1782 = vmax.xlane.f32.xlu1 %v1781_v59  ;;  %6440 = vmatprep.mubr.msk.f32.mxu1 %vm536_vm1, %v1856_v40 }
 0x607   :  { %v1864_v12 = vpop.permute.xlu1 %1863 }
 0x608   :  { %v2141_v45 = vpop.permute.xlu0 %2140 }
 0x609   :  { %6441 = vmatmul.mubr.msk.f32.gmra.mrb[26].mxu1 %vm536_vm1, %v1858_v26  ;;  %1785 = vmax.xlane.f32.xlu0 %v1784_v56 }
 0x60a   :  { %6443 = vmatprep.mubr.msk.f32.mxu1 %vm536_vm1, %v1860_v43 }
 0x60b   :  { %v7437_v23 = vpop.permute.xlu1 %7436 }
 0x60c   :  { %v7439_v30 = vunpack.i.h.bf16 %v7437_v23  ;;  %v7438_v33 = vunpack.i.l.bf16 %v7437_v23  ;;  %v2145_v40 = vpop.permute.xlu0 %2144 }
 0x60d   :  { %6444 = vmatmul.mubr.msk.f32.gmra.mrb[28].mxu1 %vm536_vm1, %v1862_v14  ;;  %v7453_v14 = vunpack.i.l.bf16 %v7452_v54 }
 0x60e   :  { %v7043_v48 = vpack.c.bf16 %v7439_v30, %v7438_v33  ;;  %6446 = vmatprep.mubr.msk.f32.mxu1 %vm536_vm1, %v1864_v12 }
 0x60f   :  { %v7447_v38 = vpop.permute.xlu1 %7446  ;;  %v7061_v5 = vpack.c.bf16 %v7454_v37, %v7453_v14 }
 0x610   :  { %7045 = vmatprep.subr.msk.bf16.mxu0 %vm8219_vm2, %v7043_v48  ;;  %v7449_v36 = vunpack.i.h.bf16 %v7447_v38  ;;  %v7448_v9 = vunpack.i.l.bf16 %v7447_v38  ;;  %v2149_v41 = vpop.permute.xlu0 %2148 }
 0x611   :  { %6447 = vmatmul.mubr.msk.f32.gmra.mrb[30].mxu1 %vm536_vm1, %v1866_v11  ;;  %7048 = vmatpush3.bf16.xpose.msk.msra.mxu0 %vm8219_vm2, %v7043_v48 }
 0x612   :  { %7051 = vmatprep.subr.msk.bf16.mxu0 %vm8219_vm2, %v7049_v55  ;;  %v7055_v20 = vpack.c.bf16 %v7449_v36, %v7448_v9 }
 0x613   :  { %v2139_v26 = vpop.permute.xlu1 %2138 }
 0x614   :  { %6493 = vmatprep.mubr.msk.f32.mxu0 %vm536_vm1, %v2139_v26  ;;  %v2153_v57 = vpop.permute.xlu0 %2152 }
 0x617   :  { %2412 = vrot.lane.b32.xlu1 %v7888_v46, %s7940_s11  ;;  %v2143_v0 = vpop.permute.xlu1 %2142  ;;  %s7950_s11 = smov 40  }
 0x619   :  { %7054 = vmatpush3.bf16.xpose.msk.msra.mxu0 %vm8219_vm2, %v7049_v55 }
 0x61a   :  { %7057 = vmatprep.subr.msk.bf16.mxu0 %vm8219_vm2, %v7055_v20 }
 0x61b   :  { %v2147_v34 = vpop.permute.xlu1 %2146 }
 0x61f   :  { %v2151_v21 = vpop.permute.xlu1 %2150 }
 0x621   :  { %7060 = vmatpush3.bf16.xpose.msk.msra.mxu0 %vm8219_vm2, %v7055_v20 }
 0x622   :  { %7063 = vmatprep.subr.msk.bf16.mxu0 %vm8219_vm2, %v7061_v5 }
 0x629   :  { %7066 = vmatpush3.bf16.xpose.msk.msra.mxu0 %vm8219_vm2, %v7061_v5 }
 0x630   :  { %6494 = vmatmul.mubr.msk.f32.vlgmr.msra.gmra.mrb[40].mxu0 %vm536_vm1, %v2141_v45 }
 0x631   :  { %6496 = vmatprep.mubr.msk.f32.mxu0 %vm536_vm1, %v2143_v0 }
 0x634   :  { %6497 = vmatmul.mubr.msk.f32.gmra.mrb[42].mxu0 %vm536_vm1, %v2145_v40  ;;  %v8933_v40 = vadd.f32 %v8526_v28, %v8115_v1 }
 0x635   :  { %6499 = vmatprep.mubr.msk.f32.mxu0 %vm536_vm1, %v2147_v34 }
 0x638   :  { %6500 = vmatmul.mubr.msk.f32.gmra.mrb[44].mxu0 %vm536_vm1, %v2149_v41 }
 0x639   :  { %6502 = vmatprep.mubr.msk.f32.mxu0 %vm536_vm1, %v2151_v21 }
 0x63c   :  { %6503 = vmatmul.mubr.msk.f32.gmra.mrb[46].mxu0 %vm536_vm1, %v2153_v57 }
 0x63d   :  { %6563 = vmatprep.mubr.msk.f32.mxu0 %vm536_vm1, %v8883_v35 }
 0x685   :  { %v1768_v58 = vpop.xlane.xlu0 %1767 }
 0x686   :  { %v1788_v63 = vsub.f32 %v8783_v24, %v1768_v58  ;;  %v1765_v11 = vpop.xlane.xlu1 %1764 }
 0x687   :  { %v1787_v43 = vsub.f32 %v8786_v62, %v1765_v11 }
 0x688   :  { %v1797_v49 = vmul.f32 1.442695, %v1788_v63 }
 0x689   :  { %v1795_v59 = vmul.f32 1.442695, %v1787_v43 }
 0x68a   :  { %7631 = vpow2.f32 %v1797_v49  ;;  %v1771_v12 = vpop.xlane.xlu0 %1770 }
 0x68b   :  { %7633 = vpow2.f32 %v1795_v59  ;;  %v1789_v39 = vsub.f32 %v8803_v19, %v1771_v12 }
 0x68d   :  { %v1799_v56 = vmul.f32 1.442695, %v1789_v39 }
 0x68e   :  { %v1774_v44 = vpop.xlane.xlu0 %1773 }
 0x68f   :  { %7635 = vpow2.f32 %v1799_v56  ;;  %v1790_v23 = vsub.f32 %v8810_v61, %v1774_v44  ;;  %v1777_v7 = vpop.xlane.xlu1 %1776  ;;  %v8971_v56 = vadd.f32 %v8532_v47, %v8115_v1  ;;  %v8975_v44 = vadd.f32 %v8536_v60, %v8115_v1 }
 0x690   :  { %v1791_v17 = vsub.f32 %v8819_v29, %v1777_v7 }
 0x691   :  { %v1801_v30 = vmul.f32 1.442695, %v1790_v23  ;;  %v8981_v23 = vadd.f32 %v8546_v51, %v8115_v1 }
 0x692   :  { %v1803_v24 = vmul.f32 1.442695, %v1791_v17  ;;  %v1780_v33 = vpop.xlane.xlu0 %1779 }
 0x693   :  { %7637 = vpow2.f32 %v1801_v30  ;;  %v1792_v62 = vsub.f32 %v8826_v52, %v1780_v33  ;;  %v1783_v0 = vpop.xlane.xlu1 %1782  ;;  %v5654_v30 = vld [vmem:[%s10380_s4 + $0xd8] sm:$0xff] }
 0x694   :  { %v8894_v48 = vpop.eup %7631  ;;  %7639 = vpow2.f32 %v1803_v24  ;;  %v1793_v34 = vsub.f32 %v8836_v42, %v1783_v0  ;;  %v5652_v0 = vld [vmem:[%s10380_s4 + $0xc8] sm:$0xff] }
 0x695   :  { %v8896_v38 = vpop.eup %7633  ;;  %v1805_v19 = vmul.f32 1.442695, %v1792_v62  ;;  %v1814_v55 = vsel %vm674_vm3, %v8894_v48, 0.0 }
 0x696   :  { %1815 = vadd.xlane.f32.xlu0 %v1814_v55  ;;  %v1786_v61 = vpop.xlane.xlu0 %1785  ;;  %v1811_v29 = vsel %vm674_vm3, %v8896_v38, 0.0 }
 0x697   :  { %7641 = vpow2.f32 %v1805_v19  ;;  %v1794_v26 = vsub.f32 %v8839_v16, %v1786_v61  ;;  %1812 = vadd.xlane.f32.xlu1 %v1811_v29  ;;  %v8962_v39 = vpop.permute.xlu1 %2412  ;;  %v5655_v29 = vld [vmem:[%s10380_s4 + $0xe0] sm:$0xff] }
 0x699   :  { %v8903_v36 = vpop.eup %7635  ;;  %v1809_v52 = vmul.f32 1.442695, %v1794_v26 }
 0x69a   :  { %v1817_v9 = vsel %vm674_vm3, %v8903_v36, 0.0 }
 0x69b   :  { %7643 = vpow2.f32 %v1809_v52  ;;  %1818 = vadd.xlane.f32.xlu1 %v1817_v9 }
 0x69d   :  { %v8907_v46 = vpop.eup %7637 }
 0x69e   :  { %v8909_v20 = vpop.eup %7639  ;;  %v1820_v54 = vsel %vm674_vm3, %v8907_v46, 0.0 }
 0x69f   :  { %1821 = vadd.xlane.f32.xlu0 %v1820_v54  ;;  %v1823_v16 = vsel %vm674_vm3, %v8909_v20, 0.0 }
 0x6a0   :  { %1824 = vadd.xlane.f32.xlu1 %v1823_v16  ;;  %v5657_v16 = vld [vmem:[%s10380_s4 + $0xf0] sm:$0xff] }
 0x6a1   :  { %v8915_v37 = vpop.eup %7641 }
 0x6a2   :  { %v1826_v14 = vsel %vm674_vm3, %v8915_v37, 0.0 }
 0x6a3   :  { %1827 = vadd.xlane.f32.xlu0 %v1826_v14 }
 0x6a5   :  { %v8919_v5 = vpop.eup %7643 }
 0x6a6   :  { %v1832_v45 = vsel %vm674_vm3, %v8919_v5, 0.0 }
 0x6a7   :  { %1833 = vadd.xlane.f32.xlu0 %v1832_v45 }
 0x6b1   :  { %2397 = vrot.lane.b32.xlu1 %v8118_v3, %s7950_s11  ;;  %v8940_v3 = vadd.f32 %v8538_v27, %v8115_v1 }
 0x6b5   :  { %2399 = vrot.lane.b32.xlu1 %v8133_v10, %s7950_s11  ;;  %v1807_v10 = vmul.f32 1.442695, %v1793_v34 }
 0x6b7   :  { %7645 = vpow2.f32 %v1807_v10 }
 0x6bd   :  { %2395 = vrot.lane.b32.xlu0 %v8121_v4, %s7950_s11  ;;  %v8944_v4 = vadd.f32 %v8542_v53, %v8115_v1 }
 0x6c1   :  { %2403 = vrot.lane.b32.xlu0 %v8145_v15, %s7950_s11  ;;  %v8948_v15 = vpack.i.bf16 %v8933_v40, %v8883_v35  ;;  %v8958_v28 = vpop.eup %7645 }
 0x6c2   :  { %v1829_v53 = vsel %vm674_vm3, %v8958_v28, 0.0 }
 0x6c5   :  { %2407 = vrot.lane.b32.xlu0 %v8157_v22, %s7950_s11  ;;  %v8954_v22 = vpack.i.bf16 %v8940_v3, %v8944_v4 }
 0x6c9   :  { %7456 = vrot.lane.b32.xlu0 %v8948_v15, %s7939_s19 }
 0x6cd   :  { %7466 = vrot.lane.b32.xlu0 %v8954_v22, %s7939_s19 }
 0x6d8   :  { %v6439_v27 = vpop.f32.mrb[24].mxu1 }
 0x6d9   :  { %1830 = vadd.xlane.f32.xlu1 %v1829_v53  ;;  %v1953_v42 = vpop.f32.mrb[25].mxu1 }
 0x6da   :  { %v7027_v41 = vpack.c.bf16 %v6439_v27, %v1953_v42  ;;  %v5656_v27 = vld [vmem:[%s10380_s4 + $0xe8] sm:$0xff] }
 0x6dc   :  { %v6442_v21 = vpop.f32.mrb[26].mxu1  ;;  %7028 = vmatprep.subr.bf16.mxu1 %v7027_v41 }
 0x6dd   :  { %v1963_v57 = vpop.f32.mrb[27].mxu1  ;;  %7030 = vmatpush3.bf16.msra.mxu1 %v7027_v41  ;;  %v5658_v41 = vld [vmem:[%s10380_s4 + $0xf8] sm:$0xff] }
 0x6de   :  { %v7031_v58 = vpack.c.bf16 %v6442_v21, %v1963_v57 }
 0x6e0   :  { %v6445_v63 = vpop.f32.mrb[28].mxu1  ;;  %7032 = vmatprep.subr.bf16.mxu1 %v7031_v58 }
 0x6e1   :  { %v1973_v11 = vpop.f32.mrb[29].mxu1  ;;  %7034 = vmatpush3.bf16.msra.mxu1 %v7031_v58 }
 0x6e2   :  { %v7035_v43 = vpack.c.bf16 %v6445_v63, %v1973_v11 }
 0x6e4   :  { %v6448_v49 = vpop.f32.mrb[30].mxu1  ;;  %7036 = vmatprep.subr.bf16.mxu1 %v7035_v43 }
 0x6e5   :  { %v1983_v59 = vpop.f32.mrb[31].mxu1  ;;  %7038 = vmatpush3.bf16.msra.mxu1 %v7035_v43 }
 0x6e6   :  { %v7039_v12 = vpack.c.bf16 %v6448_v49, %v1983_v59 }
 0x6e8   :  { %7040 = vmatprep.subr.bf16.mxu1 %v7039_v12 }
 0x6e9   :  { %7042 = vmatpush3.bf16.msra.mxu1 %v7039_v12 }
 0x6ea   :  { %2401 = vrot.lane.b32.xlu1 %v8130_v8, %s7950_s11  ;;  %6505 = vmatprep.subr.mxu1 %v8962_v39  ;;  %v8985_v8 = vadd.f32 %v8548_v31, %v8115_v1  ;;  %v5653_v31 = vld [vmem:[%s10380_s4 + $0xd0] sm:$0xff] }
 0x6ec   :  { %v8995_v47 = vpack.i.bf16 %v8981_v23, %v8985_v8 }
 0x6ee   :  { %2405 = vrot.lane.b32.xlu1 %v8142_v13, %s7950_s11  ;;  %v8989_v13 = vpack.i.bf16 %v8971_v56, %v8975_v44 }
 0x6f2   :  { %2409 = vrot.lane.b32.xlu1 %v8154_v18, %s7950_s11  ;;  %v5651_v18 = vld [vmem:[%s10380_s4 + $0xc0] sm:$0xff] }
 0x6f6   :  { %7461 = vrot.lane.b32.xlu1 %v8989_v13, %s7939_s19 }
 0x6fa   :  { %7471 = vrot.lane.b32.xlu1 %v8995_v47, %s7939_s19 }
 0x703   :  { %v6495_v1 = vpop.f32.mrb[40].mxu0 }
 0x704   :  { %v2268_v60 = vpop.f32.mrb[41].mxu0  ;;  %v9037_v10 = vadd.f32 %v6495_v1, %v5652_v0 }
 0x705   :  { %v9002_v51 = vadd.f32 %v5651_v18, %v2268_v60 }
 0x706   :  { %v2310_v42 = vsel %vm674_vm3, %v9037_v10, -inf }
 0x707   :  { %v6498_v7 = vpop.f32.mrb[42].mxu0  ;;  %v2307_v17 = vsel %vm674_vm3, %v9002_v51, -inf }
 0x708   :  { %v2278_v24 = vpop.f32.mrb[43].mxu0  ;;  %2308 = vmax.xlane.f32.xlu0 %v2307_v17  ;;  %v9014_v62 = vadd.f32 %v6498_v7, %v5654_v30 }
 0x709   :  { %v9012_v33 = vadd.f32 %v5653_v31, %v2278_v24 }
 0x70a   :  { %v2316_v9 = vsel %vm674_vm3, %v9014_v62, -inf }
 0x70b   :  { %v6501_v19 = vpop.f32.mrb[44].mxu0  ;;  %v2313_v55 = vsel %vm674_vm3, %v9012_v33, -inf }
 0x70c   :  { %v2288_v61 = vpop.f32.mrb[45].mxu0  ;;  %2314 = vmax.xlane.f32.xlu0 %v2313_v55  ;;  %v9042_v53 = vadd.f32 %v6501_v19, %v5656_v27 }
 0x70d   :  { %v9021_v26 = vadd.f32 %v5655_v29, %v2288_v61 }
 0x70e   :  { %v2322_v57 = vsel %vm674_vm3, %v9042_v53, -inf }
 0x70f   :  { %v6504_v52 = vpop.f32.mrb[46].mxu0  ;;  %v2319_v45 = vsel %vm674_vm3, %v9021_v26, -inf }
 0x710   :  { %v2298_v54 = vpop.f32.mrb[47].mxu0  ;;  %2317 = vmax.xlane.f32.xlu0 %v2316_v9  ;;  %v9049_v21 = vadd.f32 %v6504_v52, %v5658_v41 }
 0x711   :  { %v9028_v14 = vadd.f32 %v5657_v16, %v2298_v54 }
 0x712   :  { %v2328_v11 = vsel %vm674_vm3, %v9049_v21, -inf }
 0x713   :  { %v2325_v34 = vsel %vm674_vm3, %v9028_v14, -inf }
 0x714   :  { %2320 = vmax.xlane.f32.xlu0 %v2319_v45 }
 0x718   :  { %2326 = vmax.xlane.f32.xlu0 %v2325_v34 }
 0x71e   :  { %2311 = vmax.xlane.f32.xlu1 %v2310_v42 }
 0x722   :  { %2323 = vmax.xlane.f32.xlu1 %v2322_v57 }
 0x723   :  { %v1816_v58 = vpop.xlane.xlu0 %1815 }
 0x724   :  { %7647 = vrcp.f32 %v1816_v58  ;;  %v1813_v63 = vpop.xlane.xlu1 %1812 }
 0x725   :  { %7649 = vrcp.f32 %v1813_v63 }
 0x726   :  { %2329 = vmax.xlane.f32.xlu1 %v2328_v11 }
 0x728   :  { %v1819_v43 = vpop.xlane.xlu1 %1818 }
 0x729   :  { %7651 = vrcp.f32 %v1819_v43 }
 0x72c   :  { %v1822_v49 = vpop.xlane.xlu0 %1821 }
 0x72d   :  { %7653 = vrcp.f32 %v1822_v49  ;;  %v1825_v59 = vpop.xlane.xlu1 %1824 }
 0x72e   :  { %v7648_v12 = vpop.eup %7647  ;;  %7655 = vrcp.f32 %v1825_v59 }
 0x72f   :  { %v7650_v18 = vpop.eup %7649  ;;  %v1844_v31 = vmul.f32 %v7648_v12, %v8894_v48 }
 0x730   :  { %v1828_v1 = vpop.xlane.xlu0 %1827  ;;  %v1843_v60 = vmul.f32 %v7650_v18, %v8896_v38 }
 0x731   :  { %7657 = vrcp.f32 %v1828_v1 }
 0x732   :  { %6465 = vmatprep.mubr.msk.f32.mxu1 %vm674_vm3, %v1843_v60 }
 0x733   :  { %v7652_v7 = vpop.eup %7651  ;;  %6466 = vmatmul.mubr.msk.f32.vlgmr.msra.gmra.mrb[8].mxu1 %vm674_vm3, %v1844_v31 }
 0x734   :  { %6506 = vmatpush3.msra.mxu1 %v8962_v39  ;;  %v1834_v17 = vpop.xlane.xlu0 %1833  ;;  %v1845_v30 = vmul.f32 %v7652_v7, %v8903_v36 }
 0x735   :  { %7659 = vrcp.f32 %v1834_v17 }
 0x736   :  { %6468 = vmatprep.mubr.msk.f32.mxu1 %vm674_vm3, %v1845_v30 }
 0x737   :  { %v7654_v24 = vpop.eup %7653 }
 0x738   :  { %v7656_v19 = vpop.eup %7655  ;;  %v2396_v55 = vpop.permute.xlu0 %2395  ;;  %v1846_v38 = vmul.f32 %v7654_v24, %v8907_v46 }
 0x739   :  { %v1847_v48 = vmul.f32 %v7656_v19, %v8909_v20  ;;  %v2398_v46 = vpop.permute.xlu1 %2397 }
 0x73a   :  { %6469 = vmatmul.mubr.msk.f32.gmra.mrb[10].mxu1 %vm674_vm3, %v1846_v38 }
 0x73b   :  { %v7658_v61 = vpop.eup %7657  ;;  %6471 = vmatprep.mubr.msk.f32.mxu1 %vm674_vm3, %v1847_v48 }
 0x73c   :  { %v2404_v29 = vpop.permute.xlu0 %2403  ;;  %v1848_v52 = vmul.f32 %v7658_v61, %v8915_v37 }
 0x73d   :  { %v2400_v20 = vpop.permute.xlu1 %2399 }
 0x73e   :  { %6472 = vmatmul.mubr.msk.f32.gmra.mrb[12].mxu1 %vm674_vm3, %v1848_v52 }
 0x73f   :  { %v7660_v27 = vpop.eup %7659 }
 0x740   :  { %v2408_v36 = vpop.permute.xlu0 %2407  ;;  %v1850_v58 = vmul.f32 %v7660_v27, %v8919_v5 }
 0x744   :  { %v7457_v9 = vpop.permute.xlu0 %7456 }
 0x745   :  { %v7459_v54 = vunpack.i.h.bf16 %v7457_v9  ;;  %v7458_v16 = vunpack.i.l.bf16 %v7457_v9 }
 0x747   :  { %v7083_v45 = vpack.c.bf16 %v7459_v54, %v7458_v16 }
 0x748   :  { %v7467_v63 = vpop.permute.xlu0 %7466 }
 0x749   :  { %7085 = vmatprep.subr.msk.bf16.mxu0 %vm8219_vm2, %v7083_v45  ;;  %v7469_v43 = vunpack.i.h.bf16 %v7467_v63  ;;  %v7468_v49 = vunpack.i.l.bf16 %v7467_v63 }
 0x74a   :  { %7088 = vmatpush3.bf16.xpose.msk.msra.mxu0 %vm8219_vm2, %v7083_v45 }
 0x766   :  { %v1831_v0 = vpop.xlane.xlu1 %1830 }
 0x767   :  { %7661 = vrcp.f32 %v1831_v0 }
 0x76a   :  { %v2402_v34 = vpop.permute.xlu1 %2401 }
 0x76e   :  { %v2406_v37 = vpop.permute.xlu1 %2405 }
 0x771   :  { %v7662_v42 = vpop.eup %7661 }
 0x772   :  { %v2410_v41 = vpop.permute.xlu1 %2409  ;;  %v1849_v57 = vmul.f32 %v7662_v42, %v8958_v28  ;;  %v7095_v28 = vpack.c.bf16 %v7469_v43, %v7468_v49 }
 0x774   :  { %6474 = vmatprep.mubr.msk.f32.mxu1 %vm674_vm3, %v1849_v57 }
 0x775   :  { %6475 = vmatmul.mubr.msk.f32.gmra.mrb[14].mxu1 %vm674_vm3, %v1850_v58 }
 0x776   :  { %6507 = vmatprep.mubr.msk.f32.mxu1 %vm536_vm1, %v2396_v55  ;;  %v7462_v11 = vpop.permute.xlu1 %7461 }
 0x777   :  { %v7464_v59 = vunpack.i.h.bf16 %v7462_v11  ;;  %v7463_v12 = vunpack.i.l.bf16 %v7462_v11 }
 0x779   :  { %v7089_v18 = vpack.c.bf16 %v7464_v59, %v7463_v12  ;;  %6508 = vmatmul.mubr.msk.f32.vlgmr.msra.gmra.mrb[32].mxu1 %vm536_vm1, %v2398_v46 }
 0x77a   :  { %6510 = vmatprep.mubr.msk.f32.mxu1 %vm536_vm1, %v2400_v20  ;;  %v7472_v5 = vpop.permute.xlu1 %7471 }
 0x77b   :  { %7091 = vmatprep.subr.msk.bf16.mxu0 %vm8219_vm2, %v7089_v18  ;;  %v7474_v1 = vunpack.i.h.bf16 %v7472_v5  ;;  %v7473_v60 = vunpack.i.l.bf16 %v7472_v5 }
 0x77c   :  { %7094 = vmatpush3.bf16.xpose.msk.msra.mxu0 %vm8219_vm2, %v7089_v18 }
 0x77d   :  { %6511 = vmatmul.mubr.msk.f32.gmra.mrb[34].mxu1 %vm536_vm1, %v2402_v34  ;;  %7097 = vmatprep.subr.msk.bf16.mxu0 %vm8219_vm2, %v7095_v28  ;;  %v7101_v31 = vpack.c.bf16 %v7474_v1, %v7473_v60 }
 0x77e   :  { %6513 = vmatprep.mubr.msk.f32.mxu1 %vm536_vm1, %v2404_v29 }
 0x781   :  { %6514 = vmatmul.mubr.msk.f32.gmra.mrb[36].mxu1 %vm536_vm1, %v2406_v37 }
 0x782   :  { %6516 = vmatprep.mubr.msk.f32.mxu1 %vm536_vm1, %v2408_v36 }
 0x784   :  { %7100 = vmatpush3.bf16.xpose.msk.msra.mxu0 %vm8219_vm2, %v7095_v28 }
 0x785   :  { %6517 = vmatmul.mubr.msk.f32.gmra.mrb[38].mxu1 %vm536_vm1, %v2410_v41  ;;  %7103 = vmatprep.subr.msk.bf16.mxu0 %vm8219_vm2, %v7101_v31 }
 0x78c   :  { %7106 = vmatpush3.bf16.xpose.msk.msra.mxu0 %vm8219_vm2, %v7101_v31 }
 0x793   :  { %6564 = vmatmul.mubr.msk.f32.vlgmr.msra.gmra.mrb[48].mxu0 %vm536_vm1, %v8933_v40 }
 0x794   :  { %6566 = vmatprep.mubr.msk.f32.mxu0 %vm536_vm1, %v8975_v44 }
 0x795   :  { %v2309_v7 = vpop.xlane.xlu0 %2308 }
 0x796   :  { %v2331_v17 = vsub.f32 %v9002_v51, %v2309_v7 }
 0x797   :  { %6567 = vmatmul.mubr.msk.f32.gmra.mrb[50].mxu0 %vm536_vm1, %v8971_v56 }
 0x798   :  { %v2339_v30 = vmul.f32 1.442695, %v2331_v17  ;;  %6569 = vmatprep.mubr.msk.f32.mxu0 %vm536_vm1, %v8944_v4 }
 0x799   :  { %v2315_v24 = vpop.xlane.xlu0 %2314 }
 0x79a   :  { %7663 = vpow2.f32 %v2339_v30  ;;  %v2333_v19 = vsub.f32 %v9012_v33, %v2315_v24 }
 0x79b   :  { %6570 = vmatmul.mubr.msk.f32.gmra.mrb[52].mxu0 %vm536_vm1, %v8940_v3 }
 0x79c   :  { %v2343_v55 = vmul.f32 1.442695, %v2333_v19  ;;  %6572 = vmatprep.mubr.msk.f32.mxu0 %vm536_vm1, %v8985_v8 }
 0x79d   :  { %v2318_v38 = vpop.xlane.xlu0 %2317 }
 0x79e   :  { %7665 = vpow2.f32 %v2343_v55  ;;  %v2334_v45 = vsub.f32 %v9014_v62, %v2318_v38 }
 0x79f   :  { %6573 = vmatmul.mubr.msk.f32.gmra.mrb[54].mxu0 %vm536_vm1, %v8981_v23 }
 0x7a0   :  { %v2345_v20 = vmul.f32 1.442695, %v2334_v45 }
 0x7a1   :  { %v2321_v51 = vpop.xlane.xlu0 %2320 }
 0x7a2   :  { %v2335_v48 = vsub.f32 %v9021_v26, %v2321_v51 }
 0x7a4   :  { %v9113_v61 = vpop.eup %7663  ;;  %v2347_v29 = vmul.f32 1.442695, %v2335_v48 }
 0x7a5   :  { %v2327_v52 = vpop.xlane.xlu0 %2326  ;;  %v2355_v33 = vsel %vm674_vm3, %v9113_v61, 0.0 }
 0x7a6   :  { %7667 = vpow2.f32 %v2347_v29  ;;  %v2337_v36 = vsub.f32 %v9028_v14, %v2327_v52  ;;  %2356 = vadd.xlane.f32.xlu0 %v2355_v33 }
 0x7a8   :  { %v9118_v9 = vpop.eup %7665  ;;  %v2351_v54 = vmul.f32 1.442695, %v2337_v36 }
 0x7a9   :  { %v2361_v16 = vsel %vm674_vm3, %v9118_v9, 0.0 }
 0x7aa   :  { %7669 = vpow2.f32 %v2351_v54  ;;  %2362 = vadd.xlane.f32.xlu0 %v2361_v16 }
 0x7ab   :  { %v2312_v26 = vpop.xlane.xlu1 %2311 }
 0x7ac   :  { %v2332_v46 = vsub.f32 %v9037_v10, %v2312_v26 }
 0x7ae   :  { %v2341_v0 = vmul.f32 1.442695, %v2332_v46 }
 0x7af   :  { %v2324_v34 = vpop.xlane.xlu1 %2323 }
 0x7b0   :  { %v9124_v37 = vpop.eup %7667  ;;  %7671 = vpow2.f32 %v2341_v0  ;;  %v2336_v14 = vsub.f32 %v9042_v53, %v2324_v34 }
 0x7b1   :  { %v2367_v27 = vsel %vm674_vm3, %v9124_v37, 0.0  ;;  %7673 = vpow2.f32 %v2345_v20 }
 0x7b2   :  { %v2349_v42 = vmul.f32 1.442695, %v2336_v14  ;;  %2368 = vadd.xlane.f32.xlu0 %v2367_v27 }
 0x7b3   :  { %v2330_v62 = vpop.xlane.xlu1 %2329 }
 0x7b4   :  { %v9129_v41 = vpop.eup %7669  ;;  %v2338_v57 = vsub.f32 %v9049_v21, %v2330_v62  ;;  %7675 = vpow2.f32 %v2349_v42 }
 0x7b5   :  { %v2373_v10 = vsel %vm674_vm3, %v9129_v41, 0.0 }
 0x7b6   :  { %v2353_v58 = vmul.f32 1.442695, %v2338_v57  ;;  %2374 = vadd.xlane.f32.xlu0 %v2373_v10 }
 0x7b8   :  { %7677 = vpow2.f32 %v2353_v58 }
 0x7ba   :  { %v9134_v63 = vpop.eup %7671 }
 0x7bb   :  { %v2358_v53 = vsel %vm674_vm3, %v9134_v63, 0.0  ;;  %v9138_v11 = vpop.eup %7673 }
 0x7bc   :  { %2359 = vadd.xlane.f32.xlu1 %v2358_v53  ;;  %v2364_v43 = vsel %vm674_vm3, %v9138_v11, 0.0 }
 0x7be   :  { %v9142_v49 = vpop.eup %7675 }
 0x7bf   :  { %v2370_v21 = vsel %vm674_vm3, %v9142_v49, 0.0 }
 0x7c0   :  { %2365 = vadd.xlane.f32.xlu1 %v2364_v43 }
 0x7c2   :  { %v9146_v59 = vpop.eup %7677 }
 0x7c3   :  { %v2376_v12 = vsel %vm674_vm3, %v9146_v59, 0.0 }
 0x7c4   :  { %2371 = vadd.xlane.f32.xlu1 %v2370_v21 }
 0x7c8   :  { %2377 = vadd.xlane.f32.xlu1 %v2376_v12 }
 0x7cc   :  { %2930 = vrot.lane.b32.xlu0 %v8883_v35, %s7941_s12 }
 0x7d0   :  { %2938 = vrot.lane.b32.xlu0 %v8944_v4, %s7941_s12 }
 0x7d4   :  { %2942 = vrot.lane.b32.xlu0 %v8985_v8, %s7941_s12 }
 0x7d8   :  { %7476 = vrot.lane.b32.xlu0 %v8948_v15, %s7942_s13 }
 0x7d9   :  { %2932 = vrot.lane.b32.xlu1 %v8933_v40, %s7941_s12 }
 0x7dc   :  { %7486 = vrot.lane.b32.xlu0 %v8954_v22, %s7942_s13 }
 0x7dd   :  { %2934 = vrot.lane.b32.xlu1 %v8975_v44, %s7941_s12 }
 0x7e0   :  { %3204 = vrot.lane.b32.xlu0 %v8883_v35, %s7943_s14 }
 0x7e1   :  { %2936 = vrot.lane.b32.xlu1 %v8971_v56, %s7941_s12 }
 0x7e4   :  { %3208 = vrot.lane.b32.xlu0 %v8975_v44, %s7943_s14 }
 0x7e5   :  { %2940 = vrot.lane.b32.xlu1 %v8940_v3, %s7941_s12 }
 0x7e8   :  { %3212 = vrot.lane.b32.xlu0 %v8944_v4, %s7943_s14 }
 0x7e9   :  { %2944 = vrot.lane.b32.xlu1 %v8981_v23, %s7941_s12 }
 0x7ec   :  { %3216 = vrot.lane.b32.xlu0 %v8985_v8, %s7943_s14 }
 0x7ed   :  { %7481 = vrot.lane.b32.xlu1 %v8989_v13, %s7942_s13 }
 0x7f1   :  { %7491 = vrot.lane.b32.xlu1 %v8995_v47, %s7942_s13 }
 0x7f5   :  { %3206 = vrot.lane.b32.xlu1 %v8933_v40, %s7943_s14 }
 0x7f9   :  { %3210 = vrot.lane.b32.xlu1 %v8971_v56, %s7943_s14 }
 0x7fd   :  { %3214 = vrot.lane.b32.xlu1 %v8940_v3, %s7943_s14 }
 0x801   :  { %3218 = vrot.lane.b32.xlu1 %v8981_v23, %s7943_s14 }
 0x833   :  { %v2357_v18 = vpop.xlane.xlu0 %2356 }
 0x834   :  { %7679 = vrcp.f32 %v2357_v18 }
 0x837   :  { %v2363_v28 = vpop.xlane.xlu0 %2362 }
 0x83e   :  { %v7680_v5 = vpop.eup %7679 }
 0x83f   :  { %v2369_v1 = vpop.xlane.xlu0 %2368  ;;  %v2387_v60 = vmul.f32 %v7680_v5, %v9113_v61 }
 0x841   :  { %6535 = vmatprep.mubr.msk.f32.mxu1 %vm674_vm3, %v2387_v60 }
 0x843   :  { %v2375_v31 = vpop.xlane.xlu0 %2374 }
 0x847   :  { %v9192_v7 = vpop.permute.xlu0 %2930 }
 0x849   :  { %v2360_v17 = vpop.xlane.xlu1 %2359 }
 0x84a   :  { %7681 = vrcp.f32 %v2360_v17 }
 0x84b   :  { %v9194_v30 = vpop.permute.xlu0 %2938  ;;  %7683 = vrcp.f32 %v2363_v28 }
 0x84c   :  { %v6509_v24 = vpop.f32.mrb[32].mxu1 }
 0x84d   :  { %v2497_v19 = vpop.f32.mrb[33].mxu1  ;;  %v2366_v55 = vpop.xlane.xlu1 %2365 }
 0x84e   :  { %v7067_v38 = vpack.c.bf16 %v6509_v24, %v2497_v19  ;;  %7685 = vrcp.f32 %v2366_v55  ;;  %v7890_v19 = vld [vmem:[%s10380_s4] sm:$0xff] }
 0x84f   :  { %v9196_v51 = vpop.permute.xlu0 %2942  ;;  %7687 = vrcp.f32 %v2369_v1 }
 0x850   :  { %v6512_v48 = vpop.f32.mrb[34].mxu1  ;;  %7068 = vmatprep.subr.bf16.mxu1 %v7067_v38 }
 0x851   :  { %v2507_v29 = vpop.f32.mrb[35].mxu1  ;;  %7070 = vmatpush3.bf16.msra.mxu1 %v7067_v38  ;;  %v2372_v61 = vpop.xlane.xlu1 %2371 }
 0x852   :  { %v7071_v52 = vpack.c.bf16 %v6512_v48, %v2507_v29  ;;  %7689 = vrcp.f32 %v2372_v61 }
 0x853   :  { %v7477_v33 = vpop.permute.xlu0 %7476  ;;  %7691 = vrcp.f32 %v2375_v31 }
 0x854   :  { %v7479_v36 = vunpack.i.h.bf16 %v7477_v33  ;;  %v7478_v54 = vunpack.i.l.bf16 %v7477_v33  ;;  %v6515_v16 = vpop.f32.mrb[36].mxu1  ;;  %7072 = vmatprep.subr.bf16.mxu1 %v7071_v52  ;;  %v7682_v62 = vpop.eup %7681 }
 0x855   :  { %v2517_v45 = vpop.f32.mrb[37].mxu1  ;;  %7074 = vmatpush3.bf16.msra.mxu1 %v7071_v52  ;;  %v2378_v26 = vpop.xlane.xlu1 %2377  ;;  %v2388_v53 = vmul.f32 %v7682_v62, %v9134_v63  ;;  %v7891_v52 = vld [vmem:[%s10380_s4 + $0x10] sm:$0xff] }
 0x856   :  { %v7123_v46 = vpack.c.bf16 %v7479_v36, %v7478_v54  ;;  %v7075_v20 = vpack.c.bf16 %v6515_v16, %v2517_v45  ;;  %v7684_v10 = vpop.eup %7683  ;;  %7693 = vrcp.f32 %v2378_v26 }
 0x857   :  { %v9198_v0 = vpop.permute.xlu0 %7486  ;;  %v2389_v21 = vmul.f32 %v7684_v10, %v9118_v9  ;;  %v7894_v10 = vld [vmem:[%s10380_s4 + $0x20] sm:$0xff] }
 0x858   :  { %v6518_v34 = vpop.f32.mrb[38].mxu1  ;;  %7076 = vmatprep.subr.bf16.mxu1 %v7075_v20  ;;  %7125 = vmatprep.subr.msk.bf16.mxu0 %vm8219_vm2, %v7123_v46  ;;  %v7686_v43 = vpop.eup %7685  ;;  %v7489_v36 = vunpack.i.h.bf16 %v9198_v0  ;;  %v7488_v54 = vunpack.i.l.bf16 %v9198_v0  ;;  %v7893_v0 = vld [vmem:[%s10380_s4 + $0x28] sm:$0xff] }
 0x859   :  { %v2527_v14 = vpop.f32.mrb[39].mxu1  ;;  %7078 = vmatpush3.bf16.msra.mxu1 %v7075_v20  ;;  %v9202_v27 = vpop.permute.xlu1 %2932  ;;  %7128 = vmatpush3.bf16.xpose.msk.msra.mxu0 %vm8219_vm2, %v7123_v46  ;;  %v2390_v28 = vmul.f32 %v7686_v43, %v9138_v11 }
 0x85a   :  { %v7079_v42 = vpack.c.bf16 %v6518_v34, %v2527_v14  ;;  %v7688_v12 = vpop.eup %7687 }
 0x85b   :  { %v3205_v57 = vpop.permute.xlu0 %3204  ;;  %v2391_v1 = vmul.f32 %v7688_v12, %v9124_v37 }
 0x85c   :  { %7080 = vmatprep.subr.bf16.mxu1 %v7079_v42  ;;  %6633 = vmatprep.mubr.msk.f32.mxu0 %vm536_vm1, %v3205_v57  ;;  %v7690_v5 = vpop.eup %7689  ;;  %v7135_v57 = vpack.c.bf16 %v7489_v36, %v7488_v54 }
 0x85d   :  { %7082 = vmatpush3.bf16.msra.mxu1 %v7079_v42  ;;  %v2935_v58 = vpop.permute.xlu1 %2934  ;;  %v7692_v60 = vpop.eup %7691  ;;  %v2392_v31 = vmul.f32 %v7690_v5, %v9142_v49 }
 0x85e   :  { %6575 = vmatprep.subr.mxu1 %v8343_v25  ;;  %v2393_v37 = vmul.f32 %v7692_v60, %v9129_v41 }
 0x860   :  { %6536 = vmatmul.mubr.msk.f32.vlgmr.msra.gmra.mrb[8].mxu1 %vm674_vm3, %v2388_v53  ;;  %v7694_v17 = vpop.eup %7693 }
 0x861   :  { %6538 = vmatprep.mubr.msk.f32.mxu1 %vm674_vm3, %v2389_v21  ;;  %6576 = vmatpush3.msra.mxu1 %v8343_v25  ;;  %v2937_v18 = vpop.permute.xlu1 %2936  ;;  %v7889_v25 = vld [vmem:[%s10380_s4 + $0x8] sm:$0xff]  ;;  %v2394_v41 = vmul.f32 %v7694_v17, %v9146_v59  ;;  %v7892_v59 = vld [vmem:[%s10380_s4 + $0x18] sm:$0xff] }
 0x864   :  { %6539 = vmatmul.mubr.msk.f32.gmra.mrb[10].mxu1 %vm674_vm3, %v2390_v28 }
 0x865   :  { %6541 = vmatprep.mubr.msk.f32.mxu1 %vm674_vm3, %v2391_v1  ;;  %v9217_v63 = vpop.permute.xlu1 %2940 }
 0x866   :  { %v6565_v9 = vpop.f32.mrb[48].mxu0 }
 0x867   :  { %v9223_v24 = vadd.f32 %v7889_v25, %v6565_v9  ;;  %v2803_v11 = vpop.f32.mrb[49].mxu0  ;;  %v7896_v9 = vld [vmem:[%s10380_s4 + $0x30] sm:$0xff] }
 0x868   :  { %v9229_v55 = vadd.f32 %v7890_v19, %v2803_v11  ;;  %6542 = vmatmul.mubr.msk.f32.gmra.mrb[12].mxu1 %vm674_vm3, %v2392_v31 }
 0x869   :  { %6544 = vmatprep.mubr.msk.f32.mxu1 %vm674_vm3, %v2393_v37  ;;  %v2945_v49 = vpop.permute.xlu1 %2944  ;;  %v2845_v38 = vsel %vm674_vm3, %v9223_v24, -inf }
 0x86a   :  { %2846 = vmax.xlane.f32.xlu1 %v2845_v38  ;;  %v6568_v48 = vpop.f32.mrb[50].mxu0  ;;  %v2842_v29 = vsel %vm674_vm3, %v9229_v55, -inf }
 0x86b   :  { %v2813_v61 = vpop.f32.mrb[51].mxu0  ;;  %2843 = vmax.xlane.f32.xlu0 %v2842_v29  ;;  %v9251_v45 = vadd.f32 %v7892_v59, %v6568_v48 }
 0x86c   :  { %v9241_v33 = vadd.f32 %v7891_v52, %v2813_v61  ;;  %6545 = vmatmul.mubr.msk.f32.gmra.mrb[14].mxu1 %vm674_vm3, %v2394_v41 }
 0x86d   :  { %6577 = vmatprep.mubr.msk.f32.mxu1 %vm536_vm1, %v9192_v7  ;;  %v7482_v16 = vpop.permute.xlu1 %7481 }
 0x86e   :  { %v7484_v26 = vunpack.i.h.bf16 %v7482_v16  ;;  %v7483_v46 = vunpack.i.l.bf16 %v7482_v16  ;;  %v6571_v20 = vpop.f32.mrb[52].mxu0  ;;  %v2848_v34 = vsel %vm674_vm3, %v9241_v33, -inf }
 0x86f   :  { %v9258_v14 = vadd.f32 %v7893_v0, %v6571_v20  ;;  %v2823_v7 = vpop.f32.mrb[53].mxu0  ;;  %2849 = vmax.xlane.f32.xlu0 %v2848_v34 }
 0x870   :  { %v7129_v42 = vpack.c.bf16 %v7484_v26, %v7483_v46  ;;  %6578 = vmatmul.mubr.msk.f32.vlgmr.msra.gmra.mrb[40].mxu1 %vm536_vm1, %v9202_v27  ;;  %v9268_v53 = vadd.f32 %v7894_v10, %v2823_v7  ;;  %v2851_v27 = vsel %vm674_vm3, %v9251_v45, -inf }
 0x871   :  { %6580 = vmatprep.mubr.msk.f32.mxu1 %vm536_vm1, %v2935_v58  ;;  %v2857_v62 = vsel %vm674_vm3, %v9258_v14, -inf  ;;  %v7492_v21 = vpop.permute.xlu1 %7491  ;;  %v7895_v58 = vld [vmem:[%s10380_s4 + $0x38] sm:$0xff] }
 0x872   :  { %7131 = vmatprep.subr.msk.bf16.mxu0 %vm8219_vm2, %v7129_v42  ;;  %2858 = vmax.xlane.f32.xlu1 %v2857_v62  ;;  %v6574_v43 = vpop.f32.mrb[54].mxu0  ;;  %v7494_v1 = vunpack.i.h.bf16 %v7492_v21  ;;  %v7493_v60 = vunpack.i.l.bf16 %v7492_v21 }
 0x873   :  { %v9277_v12 = vadd.f32 %v7895_v58, %v6574_v43  ;;  %v2833_v28 = vpop.f32.mrb[55].mxu0  ;;  %7134 = vmatpush3.bf16.xpose.msk.msra.mxu0 %vm8219_vm2, %v7129_v42  ;;  %2852 = vmax.xlane.f32.xlu0 %v2851_v27 }
 0x874   :  { %6581 = vmatmul.mubr.msk.f32.gmra.mrb[42].mxu1 %vm536_vm1, %v2937_v18  ;;  %7137 = vmatprep.subr.msk.bf16.mxu0 %vm8219_vm2, %v7135_v57  ;;  %v9291_v31 = vadd.f32 %v7896_v9, %v2833_v28  ;;  %v2854_v18 = vsel %vm674_vm3, %v9268_v53, -inf }
 0x875   :  { %6583 = vmatprep.mubr.msk.f32.mxu1 %vm536_vm1, %v9194_v30  ;;  %v2863_v5 = vsel %vm674_vm3, %v9277_v12, -inf  ;;  %v7141_v30 = vpack.c.bf16 %v7494_v1, %v7493_v60  ;;  %v3207_v25 = vpop.permute.xlu1 %3206 }
 0x876   :  { %2864 = vmax.xlane.f32.xlu1 %v2863_v5  ;;  %v2860_v17 = vsel %vm674_vm3, %v9291_v31, -inf }
 0x877   :  { %2855 = vmax.xlane.f32.xlu0 %v2854_v18 }
 0x878   :  { %6584 = vmatmul.mubr.msk.f32.gmra.mrb[44].mxu1 %vm536_vm1, %v9217_v63  ;;  %v3209_v63 = vpop.permute.xlu0 %3208 }
 0x879   :  { %6586 = vmatprep.mubr.msk.f32.mxu1 %vm536_vm1, %v9196_v51  ;;  %v3211_v11 = vpop.permute.xlu1 %3210 }
 0x87b   :  { %7140 = vmatpush3.bf16.xpose.msk.msra.mxu0 %vm8219_vm2, %v7135_v57  ;;  %2861 = vmax.xlane.f32.xlu0 %v2860_v17 }
 0x87c   :  { %6587 = vmatmul.mubr.msk.f32.gmra.mrb[46].mxu1 %vm536_vm1, %v2945_v49  ;;  %7143 = vmatprep.subr.msk.bf16.mxu0 %vm8219_vm2, %v7141_v30  ;;  %v3213_v51 = vpop.permute.xlu0 %3212 }
 0x87d   :  { %v3215_v37 = vpop.permute.xlu1 %3214 }
 0x880   :  { %v3217_v19 = vpop.permute.xlu0 %3216 }
 0x881   :  { %v3219_v49 = vpop.permute.xlu1 %3218 }
 0x883   :  { %7146 = vmatpush3.bf16.xpose.msk.msra.mxu0 %vm8219_vm2, %v7141_v30 }
 0x88a   :  { %6634 = vmatmul.mubr.msk.f32.vlgmr.msra.gmra.mrb[56].mxu0 %vm536_vm1, %v3207_v25 }
 0x88b   :  { %6636 = vmatprep.mubr.msk.f32.mxu0 %vm536_vm1, %v3209_v63 }
 0x88e   :  { %6637 = vmatmul.mubr.msk.f32.gmra.mrb[58].mxu0 %vm536_vm1, %v3211_v11 }
 0x88f   :  { %6639 = vmatprep.mubr.msk.f32.mxu0 %vm536_vm1, %v3213_v51 }
 0x892   :  { %6640 = vmatmul.mubr.msk.f32.gmra.mrb[60].mxu0 %vm536_vm1, %v3215_v37 }
 0x893   :  { %6642 = vmatprep.mubr.msk.f32.mxu0 %vm536_vm1, %v3217_v19 }
 0x896   :  { %6643 = vmatmul.mubr.msk.f32.gmra.mrb[62].mxu0 %vm536_vm1, %v3219_v49 }
 0x8f7   :  { %v2847_v38 = vpop.xlane.xlu1 %2846 }
 0x8f8   :  { %v2867_v48 = vsub.f32 %v9223_v24, %v2847_v38  ;;  %v2844_v29 = vpop.xlane.xlu0 %2843 }
 0x8f9   :  { %v2866_v41 = vsub.f32 %v9229_v55, %v2844_v29 }
 0x8fa   :  { %v2876_v61 = vmul.f32 1.442695, %v2867_v48 }
 0x8fb   :  { %v2874_v52 = vmul.f32 1.442695, %v2866_v41 }
 0x8fc   :  { %7695 = vpow2.f32 %v2876_v61  ;;  %v2850_v36 = vpop.xlane.xlu0 %2849 }
 0x8fd   :  { %7697 = vpow2.f32 %v2874_v52  ;;  %v2868_v54 = vsub.f32 %v9241_v33, %v2850_v36 }
 0x8ff   :  { %v2878_v16 = vmul.f32 1.442695, %v2868_v54  ;;  %v2859_v59 = vpop.xlane.xlu1 %2858 }
 0x900   :  { %v2871_v26 = vsub.f32 %v9258_v14, %v2859_v59  ;;  %v2853_v46 = vpop.xlane.xlu0 %2852 }
 0x901   :  { %7699 = vpow2.f32 %v2878_v16  ;;  %v2869_v20 = vsub.f32 %v9251_v45, %v2853_v46 }
 0x902   :  { %v2884_v34 = vmul.f32 1.442695, %v2871_v26 }
 0x903   :  { %v2880_v24 = vmul.f32 1.442695, %v2869_v20  ;;  %v2865_v0 = vpop.xlane.xlu1 %2864 }
 0x904   :  { %v2873_v55 = vsub.f32 %v9277_v12, %v2865_v0  ;;  %v2856_v7 = vpop.xlane.xlu0 %2855 }
 0x905   :  { %7701 = vpow2.f32 %v2880_v24  ;;  %v2870_v42 = vsub.f32 %v9268_v53, %v2856_v7 }
 0x906   :  { %v9322_v62 = vpop.eup %7695  ;;  %7703 = vpow2.f32 %v2884_v34  ;;  %v2888_v57 = vmul.f32 1.442695, %v2873_v55 }
 0x907   :  { %v9324_v33 = vpop.eup %7697  ;;  %v2882_v14 = vmul.f32 1.442695, %v2870_v42  ;;  %v2893_v10 = vsel %vm674_vm3, %v9322_v62, 0.0 }
 0x908   :  { %2894 = vadd.xlane.f32.xlu1 %v2893_v10  ;;  %v2862_v45 = vpop.xlane.xlu0 %2861  ;;  %v2890_v43 = vsel %vm674_vm3, %v9324_v33, 0.0 }
 0x909   :  { %7705 = vpow2.f32 %v2882_v14  ;;  %v2872_v27 = vsub.f32 %v9291_v31, %v2862_v45  ;;  %2891 = vadd.xlane.f32.xlu0 %v2890_v43  ;;  %v7898_v43 = vld [vmem:[%s10380_s4 + $0x50] sm:$0xff] }
 0x90a   :  { %7707 = vpow2.f32 %v2888_v57  ;;  %v7897_v57 = vld [vmem:[%s10380_s4 + $0x40] sm:$0xff] }
 0x90b   :  { %v9331_v53 = vpop.eup %7699  ;;  %v2886_v21 = vmul.f32 1.442695, %v2872_v27 }
 0x90c   :  { %v2896_v58 = vsel %vm674_vm3, %v9331_v53, 0.0 }
 0x90d   :  { %7709 = vpow2.f32 %v2886_v21  ;;  %2897 = vadd.xlane.f32.xlu0 %v2896_v58  ;;  %v7899_v58 = vld [vmem:[%s10380_s4 + $0x48] sm:$0xff] }
 0x90f   :  { %v9335_v12 = vpop.eup %7701 }
 0x910   :  { %v2899_v28 = vsel %vm674_vm3, %v9335_v12, 0.0  ;;  %v9339_v5 = vpop.eup %7703 }
 0x911   :  { %2900 = vadd.xlane.f32.xlu1 %v2899_v28  ;;  %v2905_v60 = vsel %vm674_vm3, %v9339_v5, 0.0 }
 0x913   :  { %v9341_v1 = vpop.eup %7705 }
 0x914   :  { %v2902_v9 = vsel %vm674_vm3, %v9341_v1, 0.0  ;;  %v9347_v31 = vpop.eup %7707 }
 0x915   :  { %2906 = vadd.xlane.f32.xlu1 %v2905_v60  ;;  %2903 = vadd.xlane.f32.xlu0 %v2902_v9  ;;  %v2911_v30 = vsel %vm674_vm3, %v9347_v31, 0.0  ;;  %v7900_v60 = vld [vmem:[%s10380_s4 + $0x58] sm:$0xff] }
 0x917   :  { %v9349_v18 = vpop.eup %7709 }
 0x918   :  { %v2908_v17 = vsel %vm674_vm3, %v9349_v18, 0.0 }
 0x919   :  { %2912 = vadd.xlane.f32.xlu1 %v2911_v30  ;;  %2909 = vadd.xlane.f32.xlu0 %v2908_v17  ;;  %v7901_v17 = vld [vmem:[%s10380_s4 + $0x68] sm:$0xff] }
 0x92a   :  { %3463 = vrot.lane.b32.xlu1 %v8933_v40, %s7944_s7 }
 0x92e   :  { %3465 = vrot.lane.b32.xlu1 %v8975_v44, %s7944_s7 }
 0x92f   :  { %3461 = vrot.lane.b32.xlu0 %v8883_v35, %s7944_s7 }
 0x932   :  { %3467 = vrot.lane.b32.xlu1 %v8971_v56, %s7944_s7 }
 0x933   :  { %v9363_v25 = vpop.f32.mrb[8].mxu1  ;;  %3469 = vrot.lane.b32.xlu0 %v8944_v4, %s7944_s7 }
 0x934   :  { %v9367_v63 = vpop.f32.mrb[9].mxu1 }
 0x936   :  { %3471 = vrot.lane.b32.xlu1 %v8940_v3, %s7944_s7 }
 0x937   :  { %v9371_v11 = vpop.f32.mrb[10].mxu1  ;;  %3473 = vrot.lane.b32.xlu0 %v8985_v8, %s7944_s7 }
 0x938   :  { %v9375_v51 = vpop.f32.mrb[11].mxu1 }
 0x93a   :  { %3475 = vrot.lane.b32.xlu1 %v8981_v23, %s7944_s7 }
 0x93b   :  { %v9379_v37 = vpop.f32.mrb[12].mxu1  ;;  %7496 = vrot.lane.b32.xlu0 %v8948_v15, %s7945_s8 }
 0x93c   :  { %v9383_v19 = vpop.f32.mrb[13].mxu1 }
 0x93e   :  { %7501 = vrot.lane.b32.xlu1 %v8989_v13, %s7945_s8 }
 0x93f   :  { %v9387_v49 = vpop.f32.mrb[14].mxu1  ;;  %7506 = vrot.lane.b32.xlu0 %v8954_v22, %s7945_s8 }
 0x940   :  { %v9391_v38 = vpop.f32.mrb[15].mxu1 }
 0x942   :  { %7511 = vrot.lane.b32.xlu1 %v8995_v47, %s7945_s8 }
 0x943   :  { %v6579_v48 = vpop.f32.mrb[40].mxu1  ;;  %3735 = vrot.lane.b32.xlu0 %v8883_v35, %s7946_s9 }
 0x944   :  { %v3028_v29 = vpop.f32.mrb[41].mxu1 }
 0x945   :  { %v7107_v41 = vpack.c.bf16 %v6579_v48, %v3028_v29  ;;  %v7902_v29 = vld [vmem:[%s10380_s4 + $0x60] sm:$0xff] }
 0x946   :  { %3737 = vrot.lane.b32.xlu1 %v8933_v40, %s7946_s9 }
 0x947   :  { %v6582_v61 = vpop.f32.mrb[42].mxu1  ;;  %7108 = vmatprep.subr.bf16.mxu1 %v7107_v41  ;;  %3739 = vrot.lane.b32.xlu0 %v8975_v44, %s7946_s9 }
 0x948   :  { %v3038_v52 = vpop.f32.mrb[43].mxu1  ;;  %7110 = vmatpush3.bf16.msra.mxu1 %v7107_v41 }
 0x949   :  { %v7111_v36 = vpack.c.bf16 %v6582_v61, %v3038_v52 }
 0x94a   :  { %3741 = vrot.lane.b32.xlu1 %v8971_v56, %s7946_s9 }
 0x94b   :  { %v6585_v54 = vpop.f32.mrb[44].mxu1  ;;  %7112 = vmatprep.subr.bf16.mxu1 %v7111_v36  ;;  %3743 = vrot.lane.b32.xlu0 %v8944_v4, %s7946_s9 }
 0x94c   :  { %v3048_v16 = vpop.f32.mrb[45].mxu1  ;;  %7114 = vmatpush3.bf16.msra.mxu1 %v7111_v36  ;;  %v7903_v36 = vld [vmem:[%s10380_s4 + $0x78] sm:$0xff] }
 0x94d   :  { %v7115_v59 = vpack.c.bf16 %v6585_v54, %v3048_v16  ;;  %v7904_v16 = vld [vmem:[%s10380_s4 + $0x70] sm:$0xff] }
 0x94e   :  { %3745 = vrot.lane.b32.xlu1 %v8940_v3, %s7946_s9 }
 0x94f   :  { %v6588_v26 = vpop.f32.mrb[46].mxu1  ;;  %7116 = vmatprep.subr.bf16.mxu1 %v7115_v59  ;;  %3747 = vrot.lane.b32.xlu0 %v8985_v8, %s7946_s9 }
 0x950   :  { %v3058_v46 = vpop.f32.mrb[47].mxu1  ;;  %7118 = vmatpush3.bf16.msra.mxu1 %v7115_v59 }
 0x951   :  { %v7119_v20 = vpack.c.bf16 %v6588_v26, %v3058_v46 }
 0x952   :  { %3749 = vrot.lane.b32.xlu1 %v8981_v23, %s7946_s9 }
 0x953   :  { %7120 = vmatprep.subr.bf16.mxu1 %v7119_v20 }
 0x954   :  { %7122 = vmatpush3.bf16.msra.mxu1 %v7119_v20 }
 0x955   :  { %6645 = vmatprep.subr.mxu1 %v8560_v32 }
 0x95d   :  { %v6635_v34 = vpop.f32.mrb[56].mxu0 }
 0x95e   :  { %v3334_v24 = vpop.f32.mrb[57].mxu0  ;;  %v9427_v28 = vadd.f32 %v7899_v58, %v6635_v34 }
 0x95f   :  { %v9415_v14 = vadd.f32 %v7897_v57, %v3334_v24 }
 0x960   :  { %v3376_v61 = vsel %vm674_vm3, %v9427_v28, -inf }
 0x961   :  { %v6638_v0 = vpop.f32.mrb[58].mxu0  ;;  %v3373_v21 = vsel %vm674_vm3, %v9415_v14, -inf }
 0x962   :  { %v3344_v55 = vpop.f32.mrb[59].mxu0  ;;  %v9432_v9 = vadd.f32 %v7900_v60, %v6638_v0 }
 0x963   :  { %v9420_v27 = vadd.f32 %v7898_v43, %v3344_v55 }
 0x964   :  { %v3382_v52 = vsel %vm674_vm3, %v9432_v9, -inf }
 0x965   :  { %v6641_v7 = vpop.f32.mrb[60].mxu0  ;;  %v3379_v30 = vsel %vm674_vm3, %v9420_v27, -inf }
 0x966   :  { %v3354_v42 = vpop.f32.mrb[61].mxu0  ;;  %v9439_v48 = vadd.f32 %v7901_v17, %v6641_v7 }
 0x967   :  { %v9444_v41 = vadd.f32 %v7902_v29, %v3354_v42 }
 0x968   :  { %v3388_v26 = vsel %vm674_vm3, %v9439_v48, -inf }
 0x969   :  { %v6644_v10 = vpop.f32.mrb[62].mxu0  ;;  %v3385_v46 = vsel %vm674_vm3, %v9444_v41, -inf }
 0x96a   :  { %v3364_v45 = vpop.f32.mrb[63].mxu0  ;;  %v9453_v54 = vadd.f32 %v7903_v36, %v6644_v10 }
 0x96b   :  { %v9458_v59 = vadd.f32 %v7904_v16, %v3364_v45 }
 0x96c   :  { %v3394_v20 = vsel %vm674_vm3, %v9453_v54, -inf }
 0x96d   :  { %v3391_v34 = vsel %vm674_vm3, %v9458_v59, -inf }
 0x96e   :  { %3374 = vmax.xlane.f32.xlu0 %v3373_v21 }
 0x972   :  { %3380 = vmax.xlane.f32.xlu0 %v3379_v30 }
 0x976   :  { %3377 = vmax.xlane.f32.xlu1 %v3376_v61  ;;  %3383 = vmax.xlane.f32.xlu0 %v3382_v52 }
 0x97a   :  { %3389 = vmax.xlane.f32.xlu1 %v3388_v26  ;;  %3386 = vmax.xlane.f32.xlu0 %v3385_v46 }
 0x97e   :  { %3395 = vmax.xlane.f32.xlu1 %v3394_v20  ;;  %3392 = vmax.xlane.f32.xlu0 %v3391_v34 }
 0x995   :  { %v2895_v24 = vpop.xlane.xlu1 %2894 }
 0x996   :  { %7711 = vrcp.f32 %v2895_v24  ;;  %v2892_v0 = vpop.xlane.xlu0 %2891 }
 0x997   :  { %7713 = vrcp.f32 %v2892_v0 }
 0x99a   :  { %v2898_v55 = vpop.xlane.xlu0 %2897 }
 0x99b   :  { %7715 = vrcp.f32 %v2898_v55 }
 0x99e   :  { %v2901_v7 = vpop.xlane.xlu1 %2900 }
 0x99f   :  { %7717 = vrcp.f32 %v2901_v7 }
 0x9a0   :  { %v7712_v42 = vpop.eup %7711 }
 0x9a1   :  { %v7714_v57 = vpop.eup %7713  ;;  %v2923_v21 = vmul.f32 %v7712_v42, %v9322_v62 }
 0x9a2   :  { %v2907_v10 = vpop.xlane.xlu1 %2906  ;;  %v2904_v45 = vpop.xlane.xlu0 %2903  ;;  %v2922_v43 = vmul.f32 %v7714_v57, %v9324_v33 }
 0x9a3   :  { %7719 = vrcp.f32 %v2907_v10 }
 0x9a4   :  { %7721 = vrcp.f32 %v2904_v45  ;;  %6605 = vmatprep.mubr.msk.f32.mxu1 %vm674_vm3, %v2922_v43 }
 0x9a5   :  { %v7716_v58 = vpop.eup %7715  ;;  %6606 = vmatmul.mubr.msk.f32.vlgmr.msra.gmra.mrb[48].mxu1 %vm674_vm3, %v2923_v21 }
 0x9a6   :  { %6646 = vmatpush3.msra.mxu1 %v8560_v32  ;;  %v2913_v60 = vpop.xlane.xlu1 %2912  ;;  %v2910_v30 = vpop.xlane.xlu0 %2909  ;;  %v2924_v17 = vmul.f32 %v7716_v58, %v9331_v53 }
 0x9a7   :  { %7723 = vrcp.f32 %v2913_v60 }
 0x9a8   :  { %7725 = vrcp.f32 %v2910_v30  ;;  %6608 = vmatprep.mubr.msk.f32.mxu1 %vm674_vm3, %v2924_v17 }
 0x9a9   :  { %v7718_v33 = vpop.eup %7717 }
 0x9aa   :  { %v3464_v29 = vpop.permute.xlu1 %3463  ;;  %v3462_v62 = vpop.permute.xlu0 %3461  ;;  %v2925_v61 = vmul.f32 %v7718_v33, %v9335_v12 }
 0x9ac   :  { %6609 = vmatmul.mubr.msk.f32.gmra.mrb[50].mxu1 %vm674_vm3, %v2925_v61 }
 0x9ad   :  { %v7720_v52 = vpop.eup %7719 }
 0x9ae   :  { %v7722_v36 = vpop.eup %7721  ;;  %v3466_v16 = vpop.permute.xlu1 %3465  ;;  %v2927_v32 = vmul.f32 %v7720_v52, %v9339_v5 }
 0x9af   :  { %v3470_v26 = vpop.permute.xlu0 %3469  ;;  %v2926_v46 = vmul.f32 %v7722_v36, %v9341_v1 }
 0x9b1   :  { %v7724_v53 = vpop.eup %7723  ;;  %6611 = vmatprep.mubr.msk.f32.mxu1 %vm674_vm3, %v2926_v46 }
 0x9b2   :  { %v7726_v20 = vpop.eup %7725  ;;  %6612 = vmatmul.mubr.msk.f32.gmra.mrb[52].mxu1 %vm674_vm3, %v2927_v32  ;;  %v3468_v34 = vpop.permute.xlu1 %3467  ;;  %v2929_v12 = vmul.f32 %v7724_v53, %v9347_v31 }
 0x9b3   :  { %v3474_v24 = vpop.permute.xlu0 %3473  ;;  %v2928_v0 = vmul.f32 %v7726_v20, %v9349_v18 }
 0x9b5   :  { %6614 = vmatprep.mubr.msk.f32.mxu1 %vm674_vm3, %v2928_v0 }
 0x9b6   :  { %6615 = vmatmul.mubr.msk.f32.gmra.mrb[54].mxu1 %vm674_vm3, %v2929_v12  ;;  %v3472_v55 = vpop.permute.xlu1 %3471 }
 0x9b7   :  { %v7497_v5 = vpop.permute.xlu0 %7496  ;;  %6647 = vmatprep.mubr.msk.f32.mxu1 %vm536_vm1, %v3462_v62 }
 0x9b8   :  { %v7499_v1 = vunpack.i.h.bf16 %v7497_v5  ;;  %v7498_v7 = vunpack.i.l.bf16 %v7497_v5 }
 0x9ba   :  { %v7163_v42 = vpack.c.bf16 %v7499_v1, %v7498_v7  ;;  %6648 = vmatmul.mubr.msk.f32.vlgmr.msra.gmra.mrb[56].mxu1 %vm536_vm1, %v3464_v29  ;;  %v3476_v57 = vpop.permute.xlu1 %3475 }
 0x9bb   :  { %v7507_v10 = vpop.permute.xlu0 %7506  ;;  %6650 = vmatprep.mubr.msk.f32.mxu1 %vm536_vm1, %v3466_v16 }
 0x9bc   :  { %7165 = vmatprep.subr.msk.bf16.mxu0 %vm8219_vm2, %v7163_v42  ;;  %v7509_v45 = vunpack.i.h.bf16 %v7507_v10  ;;  %v7508_v43 = vunpack.i.l.bf16 %v7507_v10 }
 0x9bd   :  { %7168 = vmatpush3.bf16.xpose.msk.msra.mxu0 %vm8219_vm2, %v7163_v42 }
 0x9be   :  { %6651 = vmatmul.mubr.msk.f32.gmra.mrb[58].mxu1 %vm536_vm1, %v3468_v34  ;;  %v7502_v31 = vpop.permute.xlu1 %7501  ;;  %v7175_v30 = vpack.c.bf16 %v7509_v45, %v7508_v43 }
 0x9bf   :  { %v3736_v18 = vpop.permute.xlu0 %3735  ;;  %v7504_v21 = vunpack.i.h.bf16 %v7502_v31  ;;  %v7503_v58 = vunpack.i.l.bf16 %v7502_v31  ;;  %6653 = vmatprep.mubr.msk.f32.mxu1 %vm536_vm1, %v3470_v26 }
 0x9c0   :  { %6703 = vmatprep.mubr.msk.f32.mxu0 %vm536_vm1, %v3736_v18 }
 0x9c1   :  { %v7169_v60 = vpack.c.bf16 %v7504_v21, %v7503_v58 }
 0x9c2   :  { %6654 = vmatmul.mubr.msk.f32.gmra.mrb[60].mxu1 %vm536_vm1, %v3472_v55  ;;  %v7512_v17 = vpop.permute.xlu1 %7511 }
 0x9c3   :  { %6656 = vmatprep.mubr.msk.f32.mxu1 %vm536_vm1, %v3474_v24  ;;  %7171 = vmatprep.subr.msk.bf16.mxu0 %vm8219_vm2, %v7169_v60  ;;  %v7514_v33 = vunpack.i.h.bf16 %v7512_v17  ;;  %v7513_v29 = vunpack.i.l.bf16 %v7512_v17  ;;  %v3740_v52 = vpop.permute.xlu0 %3739 }
 0x9c5   :  { %7174 = vmatpush3.bf16.xpose.msk.msra.mxu0 %vm8219_vm2, %v7169_v60  ;;  %v7181_v62 = vpack.c.bf16 %v7514_v33, %v7513_v29 }
 0x9c6   :  { %7177 = vmatprep.subr.msk.bf16.mxu0 %vm8219_vm2, %v7175_v30  ;;  %6657 = vmatmul.mubr.msk.f32.gmra.mrb[62].mxu1 %vm536_vm1, %v3476_v57  ;;  %v3738_v61 = vpop.permute.xlu1 %3737 }
 0x9c7   :  { %v3744_v16 = vpop.permute.xlu0 %3743 }
 0x9ca   :  { %v3742_v36 = vpop.permute.xlu1 %3741 }
 0x9cb   :  { %v3748_v32 = vpop.permute.xlu0 %3747 }
 0x9cd   :  { %7180 = vmatpush3.bf16.xpose.msk.msra.mxu0 %vm8219_vm2, %v7175_v30 }
 0x9ce   :  { %7183 = vmatprep.subr.msk.bf16.mxu0 %vm8219_vm2, %v7181_v62  ;;  %v3746_v26 = vpop.permute.xlu1 %3745 }
 0x9d2   :  { %v3750_v46 = vpop.permute.xlu1 %3749 }
 0x9d5   :  { %7186 = vmatpush3.bf16.xpose.msk.msra.mxu0 %vm8219_vm2, %v7181_v62 }
 0x9dc   :  { %6704 = vmatmul.mubr.msk.f32.vlgmr.msra.gmra.mrb[64].mxu0 %vm536_vm1, %v3738_v61 }
 0x9dd   :  { %6706 = vmatprep.mubr.msk.f32.mxu0 %vm536_vm1, %v3740_v52 }
 0x9e0   :  { %6707 = vmatmul.mubr.msk.f32.gmra.mrb[66].mxu0 %vm536_vm1, %v3742_v36 }
 0x9e1   :  { %6709 = vmatprep.mubr.msk.f32.mxu0 %vm536_vm1, %v3744_v16 }
 0x9e4   :  { %6710 = vmatmul.mubr.msk.f32.gmra.mrb[68].mxu0 %vm536_vm1, %v3746_v26 }
 0x9e5   :  { %6712 = vmatprep.mubr.msk.f32.mxu0 %vm536_vm1, %v3748_v32 }
 0x9e8   :  { %6713 = vmatmul.mubr.msk.f32.gmra.mrb[70].mxu0 %vm536_vm1, %v3750_v46 }
 0x9fb   :  { %v3375_v53 = vpop.xlane.xlu0 %3374 }
 0x9fc   :  { %v3397_v20 = vsub.f32 %v9415_v14, %v3375_v53 }
 0x9fe   :  { %v3405_v34 = vmul.f32 1.442695, %v3397_v20 }
 0x9ff   :  { %v3381_v24 = vpop.xlane.xlu0 %3380 }
 0xa00   :  { %7727 = vpow2.f32 %v3405_v34  ;;  %v3399_v12 = vsub.f32 %v9420_v27, %v3381_v24 }
 0xa02   :  { %v3409_v0 = vmul.f32 1.442695, %v3399_v12 }
 0xa03   :  { %v3378_v55 = vpop.xlane.xlu1 %3377  ;;  %v3384_v5 = vpop.xlane.xlu0 %3383 }
 0xa04   :  { %7729 = vpow2.f32 %v3409_v0  ;;  %v3398_v1 = vsub.f32 %v9427_v28, %v3378_v55  ;;  %v3400_v7 = vsub.f32 %v9432_v9, %v3384_v5 }
 0xa06   :  { %v3407_v42 = vmul.f32 1.442695, %v3398_v1  ;;  %v3411_v57 = vmul.f32 1.442695, %v3400_v7 }
 0xa07   :  { %v3390_v10 = vpop.xlane.xlu1 %3389  ;;  %v3387_v31 = vpop.xlane.xlu0 %3386 }
 0xa08   :  { %7731 = vpow2.f32 %v3407_v42  ;;  %v3402_v14 = vsub.f32 %v9439_v48, %v3390_v10  ;;  %v3401_v18 = vsub.f32 %v9444_v41, %v3387_v31 }
 0xa09   :  { %7733 = vpow2.f32 %v3411_v57 }
 0xa0a   :  { %v9523_v45 = vpop.eup %7727  ;;  %v3415_v27 = vmul.f32 1.442695, %v3402_v14  ;;  %v3413_v43 = vmul.f32 1.442695, %v3401_v18 }
 0xa0b   :  { %v3396_v21 = vpop.xlane.xlu1 %3395  ;;  %v3393_v58 = vpop.xlane.xlu0 %3392  ;;  %v3421_v28 = vsel %vm674_vm3, %v9523_v45, 0.0 }
 0xa0c   :  { %v3404_v9 = vsub.f32 %v9453_v54, %v3396_v21  ;;  %v3403_v60 = vsub.f32 %v9458_v59, %v3393_v58  ;;  %3422 = vadd.xlane.f32.xlu0 %v3421_v28  ;;  %7735 = vpow2.f32 %v3413_v43 }
 0xa0d   :  { %7737 = vpow2.f32 %v3415_v27 }
 0xa0e   :  { %v9529_v30 = vpop.eup %7729  ;;  %v3419_v48 = vmul.f32 1.442695, %v3404_v9  ;;  %v3417_v41 = vmul.f32 1.442695, %v3403_v60 }
 0xa0f   :  { %v3427_v17 = vsel %vm674_vm3, %v9529_v30, 0.0 }
 0xa10   :  { %3428 = vadd.xlane.f32.xlu0 %v3427_v17  ;;  %7739 = vpow2.f32 %v3417_v41 }
 0xa11   :  { %7741 = vpow2.f32 %v3419_v48 }
 0xa12   :  { %v9533_v33 = vpop.eup %7731 }
 0xa13   :  { %v3424_v54 = vsel %vm674_vm3, %v9533_v33, 0.0  ;;  %v9537_v29 = vpop.eup %7733 }
 0xa14   :  { %3425 = vadd.xlane.f32.xlu1 %v3424_v54  ;;  %v3430_v62 = vsel %vm674_vm3, %v9537_v29, 0.0 }
 0xa16   :  { %v9539_v59 = vpop.eup %7735 }
 0xa17   :  { %v9543_v61 = vpop.eup %7737  ;;  %v3433_v52 = vsel %vm674_vm3, %v9539_v59, 0.0 }
 0xa18   :  { %3431 = vadd.xlane.f32.xlu1 %v3430_v62  ;;  %3434 = vadd.xlane.f32.xlu0 %v3433_v52  ;;  %v3436_v16 = vsel %vm674_vm3, %v9543_v61, 0.0 }
 0xa1a   :  { %v9547_v36 = vpop.eup %7739 }
 0xa1b   :  { %v9551_v26 = vpop.eup %7741  ;;  %v3439_v32 = vsel %vm674_vm3, %v9547_v36, 0.0 }
 0xa1c   :  { %3437 = vadd.xlane.f32.xlu1 %v3436_v16  ;;  %3440 = vadd.xlane.f32.xlu0 %v3439_v32  ;;  %v3442_v46 = vsel %vm674_vm3, %v9551_v26, 0.0 }
 0xa20   :  { %3443 = vadd.xlane.f32.xlu1 %v3442_v46 }
 0xa31   :  { %3994 = vrot.lane.b32.xlu1 %v8933_v40, %s7947_s15 }
 0xa32   :  { %3992 = vrot.lane.b32.xlu0 %v8883_v35, %s7947_s15 }
 0xa35   :  { %3996 = vrot.lane.b32.xlu1 %v8975_v44, %s7947_s15 }
 0xa36   :  { %4000 = vrot.lane.b32.xlu0 %v8944_v4, %s7947_s15 }
 0xa39   :  { %3998 = vrot.lane.b32.xlu1 %v8971_v56, %s7947_s15 }
 0xa3a   :  { %4004 = vrot.lane.b32.xlu0 %v8985_v8, %s7947_s15 }
 0xa3d   :  { %4002 = vrot.lane.b32.xlu1 %v8940_v3, %s7947_s15 }
 0xa3e   :  { %7516 = vrot.lane.b32.xlu0 %v8948_v15, %s7948_s16 }
 0xa41   :  { %4006 = vrot.lane.b32.xlu1 %v8981_v23, %s7947_s15 }
 0xa42   :  { %7526 = vrot.lane.b32.xlu0 %v8954_v22, %s7948_s16 }
 0xa45   :  { %7521 = vrot.lane.b32.xlu1 %v8989_v13, %s7948_s16 }
 0xa46   :  { %4266 = vrot.lane.b32.xlu0 %v8883_v35, %s7949_s17 }
 0xa49   :  { %7531 = vrot.lane.b32.xlu1 %v8995_v47, %s7948_s16 }
 0xa4a   :  { %4270 = vrot.lane.b32.xlu0 %v8975_v44, %s7949_s17 }
 0xa4d   :  { %4268 = vrot.lane.b32.xlu1 %v8933_v40, %s7949_s17 }
 0xa4e   :  { %4274 = vrot.lane.b32.xlu0 %v8944_v4, %s7949_s17 }
 0xa51   :  { %4272 = vrot.lane.b32.xlu1 %v8971_v56, %s7949_s17 }
 0xa52   :  { %4278 = vrot.lane.b32.xlu0 %v8985_v8, %s7949_s17 }
 0xa55   :  { %4276 = vrot.lane.b32.xlu1 %v8940_v3, %s7949_s17 }
 0xa59   :  { %4280 = vrot.lane.b32.xlu1 %v8981_v23, %s7949_s17 }
 0xa8d   :  { %v6649_v15 = vpop.f32.mrb[56].mxu1 }
 0xa8e   :  { %v3559_v22 = vpop.f32.mrb[57].mxu1 }
 0xa8f   :  { %v7147_v13 = vpack.c.bf16 %v6649_v15, %v3559_v22 }
 0xa91   :  { %v6652_v47 = vpop.f32.mrb[58].mxu1  ;;  %7148 = vmatprep.subr.bf16.mxu1 %v7147_v13 }
 0xa92   :  { %v3569_v53 = vpop.f32.mrb[59].mxu1  ;;  %7150 = vmatpush3.bf16.msra.mxu1 %v7147_v13 }
 0xa93   :  { %v7151_v20 = vpack.c.bf16 %v6652_v47, %v3569_v53  ;;  %v7907_v53 = vld [vmem:[%s10380_s4 + $0x90] sm:$0xff] }
 0xa95   :  { %v6655_v34 = vpop.f32.mrb[60].mxu1  ;;  %7152 = vmatprep.subr.bf16.mxu1 %v7151_v20 }
 0xa96   :  { %v3579_v24 = vpop.f32.mrb[61].mxu1  ;;  %7154 = vmatpush3.bf16.msra.mxu1 %v7151_v20 }
 0xa97   :  { %v7155_v12 = vpack.c.bf16 %v6655_v34, %v3579_v24 }
 0xa99   :  { %v6658_v0 = vpop.f32.mrb[62].mxu1  ;;  %7156 = vmatprep.subr.bf16.mxu1 %v7155_v12  ;;  %v3423_v55 = vpop.xlane.xlu0 %3422 }
 0xa9a   :  { %v3589_v5 = vpop.f32.mrb[63].mxu1  ;;  %7158 = vmatpush3.bf16.msra.mxu1 %v7155_v12  ;;  %7743 = vrcp.f32 %v3423_v55 }
 0xa9b   :  { %v7159_v1 = vpack.c.bf16 %v6658_v0, %v3589_v5 }
 0xa9d   :  { %7160 = vmatprep.subr.bf16.mxu1 %v7159_v1  ;;  %v3429_v7 = vpop.xlane.xlu0 %3428 }
 0xa9e   :  { %7162 = vmatpush3.bf16.msra.mxu1 %v7159_v1  ;;  %7745 = vrcp.f32 %v3429_v7  ;;  %v7909_v7 = vld [vmem:[%s10380_s4 + $0xa8] sm:$0xff] }
 0xa9f   :  { %6715 = vmatprep.subr.mxu1 %v8772_v2 }
 0xaa1   :  { %v3426_v42 = vpop.xlane.xlu1 %3425 }
 0xaa2   :  { %7747 = vrcp.f32 %v3426_v42 }
 0xaa4   :  { %v7744_v57 = vpop.eup %7743 }
 0xaa5   :  { %v3432_v10 = vpop.xlane.xlu1 %3431  ;;  %v3453_v31 = vmul.f32 %v7744_v57, %v9523_v45  ;;  %v3435_v14 = vpop.xlane.xlu0 %3434  ;;  %v7905_v45 = vld [vmem:[%s10380_s4 + $0x88] sm:$0xff] }
 0xaa6   :  { %7749 = vrcp.f32 %v3432_v10 }
 0xaa7   :  { %7751 = vrcp.f32 %v3435_v14  ;;  %6675 = vmatprep.mubr.msk.f32.mxu1 %vm674_vm3, %v3453_v31 }
 0xaa8   :  { %v7746_v43 = vpop.eup %7745 }
 0xaa9   :  { %v3438_v18 = vpop.xlane.xlu1 %3437  ;;  %v3441_v27 = vpop.xlane.xlu0 %3440  ;;  %v3455_v48 = vmul.f32 %v7746_v43, %v9529_v30  ;;  %v7910_v43 = vld [vmem:[%s10380_s4 + $0xa0] sm:$0xff] }
 0xaaa   :  { %7753 = vrcp.f32 %v3438_v18 }
 0xaab   :  { %7755 = vrcp.f32 %v3441_v27 }
 0xaac   :  { %v7748_v21 = vpop.eup %7747 }
 0xaad   :  { %v3454_v58 = vmul.f32 %v7748_v21, %v9533_v33  ;;  %v3444_v28 = vpop.xlane.xlu1 %3443  ;;  %v3993_v9 = vpop.permute.xlu0 %3992  ;;  %v7906_v33 = vld [vmem:[%s10380_s4 + $0x80] sm:$0xff] }
 0xaae   :  { %7757 = vrcp.f32 %v3444_v28 }
 0xaaf   :  { %v6705_v60 = vpop.f32.mrb[64].mxu0  ;;  %6676 = vmatmul.mubr.msk.f32.vlgmr.msra.gmra.mrb[48].mxu1 %vm674_vm3, %v3454_v58 }
 0xab0   :  { %v9605_v41 = vadd.f32 %v7905_v45, %v6705_v60  ;;  %v3865_v17 = vpop.f32.mrb[65].mxu0  ;;  %v7750_v54 = vpop.eup %7749  ;;  %6716 = vmatpush3.msra.mxu1 %v8772_v2  ;;  %6678 = vmatprep.mubr.msk.f32.mxu1 %vm674_vm3, %v3455_v48  ;;  %v7911_v60 = vld [vmem:[%s10380_s4 + $0xb8] sm:$0xff] }
 0xab1   :  { %v9611_v62 = vadd.f32 %v7906_v33, %v3865_v17  ;;  %v7752_v30 = vpop.eup %7751  ;;  %v3995_v52 = vpop.permute.xlu1 %3994  ;;  %v3456_v32 = vmul.f32 %v7750_v54, %v9537_v29 }
 0xab2   :  { %v3907_v16 = vsel %vm674_vm3, %v9605_v41, -inf  ;;  %v9618_v46 = vpop.permute.xlu0 %4000  ;;  %v3457_v13 = vmul.f32 %v7752_v30, %v9539_v59  ;;  %v7908_v59 = vld [vmem:[%s10380_s4 + $0x98] sm:$0xff]  ;;  %v7912_v30 = vld [vmem:[%s10380_s4 + $0xb0] sm:$0xff] }
 0xab3   :  { %3908 = vmax.xlane.f32.xlu1 %v3907_v16  ;;  %v6708_v15 = vpop.f32.mrb[66].mxu0  ;;  %v3904_v22 = vsel %vm674_vm3, %v9611_v62, -inf  ;;  %6679 = vmatmul.mubr.msk.f32.gmra.mrb[50].mxu1 %vm674_vm3, %v3456_v32 }
 0xab4   :  { %v3875_v2 = vpop.f32.mrb[67].mxu0  ;;  %3905 = vmax.xlane.f32.xlu0 %v3904_v22  ;;  %v7754_v47 = vpop.eup %7753  ;;  %6681 = vmatprep.mubr.msk.f32.mxu1 %vm674_vm3, %v3457_v13  ;;  %v9634_v12 = vadd.f32 %v7908_v59, %v6708_v15 }
 0xab5   :  { %v9627_v20 = vadd.f32 %v7907_v53, %v3875_v2  ;;  %v7756_v29 = vpop.eup %7755  ;;  %v3997_v34 = vpop.permute.xlu1 %3996  ;;  %v3458_v24 = vmul.f32 %v7754_v47, %v9543_v61 }
 0xab6   :  { %v4005_v0 = vpop.permute.xlu0 %4004  ;;  %v3459_v1 = vmul.f32 %v7756_v29, %v9547_v36  ;;  %v3913_v27 = vsel %vm674_vm3, %v9634_v12, -inf }
 0xab7   :  { %v6711_v55 = vpop.f32.mrb[68].mxu0  ;;  %v3910_v5 = vsel %vm674_vm3, %v9627_v20, -inf  ;;  %6682 = vmatmul.mubr.msk.f32.gmra.mrb[52].mxu1 %vm674_vm3, %v3458_v24 }
 0xab8   :  { %v9642_v42 = vadd.f32 %v7909_v7, %v6711_v55  ;;  %v3885_v61 = vpop.f32.mrb[69].mxu0  ;;  %3911 = vmax.xlane.f32.xlu0 %v3910_v5  ;;  %v7758_v57 = vpop.eup %7757  ;;  %6684 = vmatprep.mubr.msk.f32.mxu1 %vm674_vm3, %v3459_v1 }
 0xab9   :  { %v3999_v10 = vpop.permute.xlu1 %3998  ;;  %v3460_v14 = vmul.f32 %v7758_v57, %v9551_v26  ;;  %v9654_v21 = vadd.f32 %v7910_v43, %v3885_v61 }
 0xaba   :  { %v3919_v31 = vsel %vm674_vm3, %v9642_v42, -inf  ;;  %v7517_v36 = vpop.permute.xlu0 %7516 }
 0xabb   :  { %3920 = vmax.xlane.f32.xlu1 %v3919_v31  ;;  %v6714_v18 = vpop.f32.mrb[70].mxu0  ;;  %v7519_v58 = vunpack.i.h.bf16 %v7517_v36  ;;  %v7518_v28 = vunpack.i.l.bf16 %v7517_v36  ;;  %6685 = vmatmul.mubr.msk.f32.gmra.mrb[54].mxu1 %vm674_vm3, %v3460_v14 }
 0xabc   :  { %v9659_v48 = vadd.f32 %v7911_v60, %v6714_v18  ;;  %v3895_v26 = vpop.f32.mrb[71].mxu0  ;;  %3914 = vmax.xlane.f32.xlu0 %v3913_v27  ;;  %6717 = vmatprep.mubr.msk.f32.mxu1 %vm536_vm1, %v3993_v9  ;;  %v3916_v9 = vsel %vm674_vm3, %v9654_v21, -inf }
 0xabd   :  { %v7203_v45 = vpack.c.bf16 %v7519_v58, %v7518_v28  ;;  %v4003_v17 = vpop.permute.xlu1 %4002  ;;  %v9668_v16 = vadd.f32 %v7912_v30, %v3895_v26 }
 0xabe   :  { %v3925_v54 = vsel %vm674_vm3, %v9659_v48, -inf  ;;  %v7527_v33 = vpop.permute.xlu0 %7526 }
 0xabf   :  { %3926 = vmax.xlane.f32.xlu1 %v3925_v54  ;;  %7205 = vmatprep.subr.msk.bf16.mxu0 %vm8219_vm2, %v7203_v45  ;;  %v3922_v22 = vsel %vm674_vm3, %v9668_v16, -inf  ;;  %v7529_v13 = vunpack.i.h.bf16 %v7527_v33  ;;  %v7528_v2 = vunpack.i.l.bf16 %v7527_v33 }
 0xac0   :  { %6718 = vmatmul.mubr.msk.f32.vlgmr.msra.gmra.mrb[64].mxu1 %vm536_vm1, %v3995_v52  ;;  %7208 = vmatpush3.bf16.xpose.msk.msra.mxu0 %vm8219_vm2, %v7203_v45 }
 0xac1   :  { %3917 = vmax.xlane.f32.xlu0 %v3916_v9  ;;  %6720 = vmatprep.mubr.msk.f32.mxu1 %vm536_vm1, %v3997_v34  ;;  %v4007_v32 = vpop.permute.xlu1 %4006  ;;  %v7215_v34 = vpack.c.bf16 %v7529_v13, %v7528_v2 }
 0xac2   :  { %v4267_v15 = vpop.permute.xlu0 %4266 }
 0xac3   :  { %6773 = vmatprep.mubr.msk.f32.mxu0 %vm536_vm1, %v4267_v15 }
 0xac4   :  { %6721 = vmatmul.mubr.msk.f32.gmra.mrb[66].mxu1 %vm536_vm1, %v3999_v10 }
 0xac5   :  { %3923 = vmax.xlane.f32.xlu0 %v3922_v22  ;;  %6723 = vmatprep.mubr.msk.f32.mxu1 %vm536_vm1, %v9618_v46  ;;  %v7522_v52 = vpop.permute.xlu1 %7521 }
 0xac6   :  { %v7524_v47 = vunpack.i.h.bf16 %v7522_v52  ;;  %v7523_v53 = vunpack.i.l.bf16 %v7522_v52  ;;  %v4271_v5 = vpop.permute.xlu0 %4270 }
 0xac8   :  { %6724 = vmatmul.mubr.msk.f32.gmra.mrb[68].mxu1 %vm536_vm1, %v4003_v17  ;;  %v7209_v29 = vpack.c.bf16 %v7524_v47, %v7523_v53 }
 0xac9   :  { %6726 = vmatprep.mubr.msk.f32.mxu1 %vm536_vm1, %v4005_v0  ;;  %v7532_v24 = vpop.permute.xlu1 %7531 }
 0xaca   :  { %7211 = vmatprep.subr.msk.bf16.mxu0 %vm8219_vm2, %v7209_v29  ;;  %v7534_v46 = vunpack.i.h.bf16 %v7532_v24  ;;  %v7533_v59 = vunpack.i.l.bf16 %v7532_v24  ;;  %v4275_v7 = vpop.permute.xlu0 %4274 }
 0xacb   :  { %7214 = vmatpush3.bf16.xpose.msk.msra.mxu0 %vm8219_vm2, %v7209_v29 }
 0xacc   :  { %6727 = vmatmul.mubr.msk.f32.gmra.mrb[70].mxu1 %vm536_vm1, %v4007_v32  ;;  %7217 = vmatprep.subr.msk.bf16.mxu0 %vm8219_vm2, %v7215_v34  ;;  %v7221_v55 = vpack.c.bf16 %v7534_v46, %v7533_v59 }
 0xacd   :  { %v4269_v0 = vpop.permute.xlu1 %4268 }
 0xace   :  { %v4279_v57 = vpop.permute.xlu0 %4278 }
 0xad1   :  { %v4273_v1 = vpop.permute.xlu1 %4272 }
 0xad3   :  { %7220 = vmatpush3.bf16.xpose.msk.msra.mxu0 %vm8219_vm2, %v7215_v34 }
 0xad4   :  { %7223 = vmatprep.subr.msk.bf16.mxu0 %vm8219_vm2, %v7221_v55 }
 0xad5   :  { %v4277_v61 = vpop.permute.xlu1 %4276 }
 0xad9   :  { %v4281_v10 = vpop.permute.xlu1 %4280 }
 0xadb   :  { %7226 = vmatpush3.bf16.xpose.msk.msra.mxu0 %vm8219_vm2, %v7221_v55 }
 0xae2   :  { %6774 = vmatmul.mubr.msk.f32.vlgmr.msra.gmra.mrb[72].mxu0 %vm536_vm1, %v4269_v0 }
 0xae3   :  { %6776 = vmatprep.mubr.msk.f32.mxu0 %vm536_vm1, %v4271_v5 }
 0xae6   :  { %6777 = vmatmul.mubr.msk.f32.gmra.mrb[74].mxu0 %vm536_vm1, %v4273_v1 }
 0xae7   :  { %6779 = vmatprep.mubr.msk.f32.mxu0 %vm536_vm1, %v4275_v7 }
 0xaea   :  { %6780 = vmatmul.mubr.msk.f32.gmra.mrb[76].mxu0 %vm536_vm1, %v4277_v61 }
 0xaeb   :  { %6782 = vmatprep.mubr.msk.f32.mxu0 %vm536_vm1, %v4279_v57 }
 0xaee   :  { %6783 = vmatmul.mubr.msk.f32.gmra.mrb[78].mxu0 %vm536_vm1, %v4281_v10  ;;  %v7913_v10 = vld [vmem:[%s10380_s4 + $0xc8] sm:$0xff] }
 0xb40   :  { %v3909_v50 = vpop.xlane.xlu1 %3908 }
 0xb41   :  { %v3929_v31 = vsub.f32 %v9605_v41, %v3909_v50  ;;  %v3906_v14 = vpop.xlane.xlu0 %3905 }
 0xb42   :  { %v3928_v36 = vsub.f32 %v9611_v62, %v3906_v14  ;;  %v7914_v14 = vld [vmem:[%s10380_s4 + $0xc0] sm:$0xff] }
 0xb43   :  { %v3938_v18 = vmul.f32 1.442695, %v3929_v31 }
 0xb44   :  { %v3936_v27 = vmul.f32 1.442695, %v3928_v36 }
 0xb45   :  { %7759 = vpow2.f32 %v3938_v18  ;;  %v3912_v43 = vpop.xlane.xlu0 %3911 }
 0xb46   :  { %7761 = vpow2.f32 %v3936_v27  ;;  %v3930_v58 = vsub.f32 %v9627_v20, %v3912_v43 }
 0xb48   :  { %v3940_v28 = vmul.f32 1.442695, %v3930_v58  ;;  %v3921_v60 = vpop.xlane.xlu1 %3920 }
 0xb49   :  { %v3933_v26 = vsub.f32 %v9642_v42, %v3921_v60  ;;  %v3915_v45 = vpop.xlane.xlu0 %3914 }
 0xb4a   :  { %7763 = vpow2.f32 %v3940_v28  ;;  %v3931_v17 = vsub.f32 %v9634_v12, %v3915_v45  ;;  %v7915_v28 = vld [vmem:[%s10380_s4 + $0xd0] sm:$0xff] }
 0xb4b   :  { %v3946_v54 = vmul.f32 1.442695, %v3933_v26  ;;  %v7916_v26 = vld [vmem:[%s10380_s4 + $0xd8] sm:$0xff] }
 0xb4c   :  { %v3942_v41 = vmul.f32 1.442695, %v3931_v17  ;;  %v3927_v33 = vpop.xlane.xlu1 %3926 }
 0xb4d   :  { %v3935_v62 = vsub.f32 %v9659_v48, %v3927_v33 }
 0xb4e   :  { %7765 = vpow2.f32 %v3942_v41  ;;  %v3918_v30 = vpop.xlane.xlu0 %3917  ;;  %v7917_v41 = vld [vmem:[%s10380_s4 + $0xe8] sm:$0xff] }
 0xb4f   :  { %v9712_v9 = vpop.eup %7759  ;;  %v3932_v32 = vsub.f32 %v9654_v21, %v3918_v30  ;;  %7767 = vpow2.f32 %v3946_v54  ;;  %v3950_v15 = vmul.f32 1.442695, %v3935_v62 }
 0xb50   :  { %v9715_v20 = vpop.eup %7761  ;;  %v3955_v42 = vsel %vm674_vm3, %v9712_v9, 0.0 }
 0xb51   :  { %v3944_v22 = vmul.f32 1.442695, %v3932_v32  ;;  %3956 = vadd.xlane.f32.xlu1 %v3955_v42  ;;  %v3952_v12 = vsel %vm674_vm3, %v9715_v20, 0.0  ;;  %v7918_v32 = vld [vmem:[%s10380_s4 + $0xe0] sm:$0xff] }
 0xb52   :  { %v3924_v52 = vpop.xlane.xlu0 %3923  ;;  %3953 = vadd.xlane.f32.xlu0 %v3952_v12  ;;  %v7919_v12 = vld [vmem:[%s10380_s4 + $0xf8] sm:$0xff] }
 0xb53   :  { %7769 = vpow2.f32 %v3944_v22  ;;  %v3934_v48 = vsub.f32 %v9668_v16, %v3924_v52 }
 0xb54   :  { %v9722_v13 = vpop.eup %7763  ;;  %7771 = vpow2.f32 %v3950_v15 }
 0xb55   :  { %v3948_v21 = vmul.f32 1.442695, %v3934_v48  ;;  %v3958_v2 = vsel %vm674_vm3, %v9722_v13, 0.0 }
 0xb56   :  { %3959 = vadd.xlane.f32.xlu0 %v3958_v2  ;;  %v7920_v2 = vld [vmem:[%s10380_s4 + $0xf0] sm:$0xff] }
 0xb57   :  { %7773 = vpow2.f32 %v3948_v21 }
 0xb58   :  { %v9726_v47 = vpop.eup %7765 }
 0xb59   :  { %v3961_v53 = vsel %vm674_vm3, %v9726_v47, 0.0  ;;  %v9730_v29 = vpop.eup %7767 }
 0xb5a   :  { %3962 = vadd.xlane.f32.xlu1 %v3961_v53  ;;  %v3967_v16 = vsel %vm674_vm3, %v9730_v29, 0.0 }
 0xb5d   :  { %v9732_v34 = vpop.eup %7769 }
 0xb5e   :  { %v9736_v24 = vpop.eup %7771  ;;  %3968 = vadd.xlane.f32.xlu1 %v3967_v16  ;;  %v3964_v46 = vsel %vm674_vm3, %v9732_v34, 0.0 }
 0xb5f   :  { %3965 = vadd.xlane.f32.xlu0 %v3964_v46  ;;  %v3973_v55 = vsel %vm674_vm3, %v9736_v24, 0.0 }
 0xb61   :  { %v9740_v59 = vpop.eup %7773 }
 0xb62   :  { %3974 = vadd.xlane.f32.xlu1 %v3973_v55  ;;  %v3970_v0 = vsel %vm674_vm3, %v9740_v59, 0.0 }
 0xb63   :  { %3971 = vadd.xlane.f32.xlu0 %v3970_v0 }
 0xb73   :  { %4525 = vrot.lane.b32.xlu1 %v8933_v40, %s7950_s11 }
 0xb77   :  { %4527 = vrot.lane.b32.xlu1 %v8975_v44, %s7950_s11 }
 0xb79   :  { %4523 = vrot.lane.b32.xlu0 %v8883_v35, %s7950_s11 }
 0xb7b   :  { %4529 = vrot.lane.b32.xlu1 %v8971_v56, %s7950_s11 }
 0xb7d   :  { %4531 = vrot.lane.b32.xlu0 %v8944_v4, %s7950_s11 }
 0xb7f   :  { %4533 = vrot.lane.b32.xlu1 %v8940_v3, %s7950_s11 }
 0xb81   :  { %4535 = vrot.lane.b32.xlu0 %v8985_v8, %s7950_s11 }
 0xb83   :  { %4537 = vrot.lane.b32.xlu1 %v8981_v23, %s7950_s11 }
 0xb93   :  { %v6719_v40 = vpop.f32.mrb[64].mxu1 }
 0xb94   :  { %v4090_v44 = vpop.f32.mrb[65].mxu1 }
 0xb95   :  { %v7187_v5 = vpack.c.bf16 %v6719_v40, %v4090_v44 }
 0xb97   :  { %v6722_v1 = vpop.f32.mrb[66].mxu1  ;;  %7188 = vmatprep.subr.bf16.mxu1 %v7187_v5 }
 0xb98   :  { %v4100_v35 = vpop.f32.mrb[67].mxu1  ;;  %7190 = vmatpush3.bf16.msra.mxu1 %v7187_v5 }
 0xb99   :  { %v7191_v56 = vpack.c.bf16 %v6722_v1, %v4100_v35 }
 0xb9b   :  { %v6725_v7 = vpop.f32.mrb[68].mxu1  ;;  %7192 = vmatprep.subr.bf16.mxu1 %v7191_v56 }
 0xb9c   :  { %v4110_v4 = vpop.f32.mrb[69].mxu1  ;;  %7194 = vmatpush3.bf16.msra.mxu1 %v7191_v56 }
 0xb9d   :  { %v7195_v61 = vpack.c.bf16 %v6725_v7, %v4110_v4 }
 0xb9f   :  { %v6728_v3 = vpop.f32.mrb[70].mxu1  ;;  %7196 = vmatprep.subr.bf16.mxu1 %v7195_v61 }
 0xba0   :  { %v4120_v57 = vpop.f32.mrb[71].mxu1  ;;  %7198 = vmatpush3.bf16.msra.mxu1 %v7195_v61 }
 0xba1   :  { %v7199_v8 = vpack.c.bf16 %v6728_v3, %v4120_v57 }
 0xba3   :  { %7200 = vmatprep.subr.bf16.mxu1 %v7199_v8 }
 0xba4   :  { %7202 = vmatpush3.bf16.msra.mxu1 %v7199_v8 }
 0xba5   :  { %6785 = vmatprep.subr.mxu1 %v8962_v39 }
 0xbb5   :  { %v6775_v23 = vpop.f32.mrb[72].mxu0 }
 0xbb6   :  { %v9766_v50 = vadd.f32 %v7913_v10, %v6775_v23  ;;  %v4396_v31 = vpop.f32.mrb[73].mxu0 }
 0xbb7   :  { %v9771_v36 = vadd.f32 %v7914_v14, %v4396_v31 }
 0xbb8   :  { %v4438_v18 = vsel %vm674_vm3, %v9766_v50, -inf }
 0xbb9   :  { %v6778_v27 = vpop.f32.mrb[74].mxu0  ;;  %4439 = vmax.xlane.f32.xlu1 %v4438_v18  ;;  %v4435_v43 = vsel %vm674_vm3, %v9771_v36, -inf }
 0xbba   :  { %v4406_v58 = vpop.f32.mrb[75].mxu0  ;;  %4436 = vmax.xlane.f32.xlu0 %v4435_v43  ;;  %v9785_v45 = vadd.f32 %v7916_v26, %v6778_v27 }
 0xbbb   :  { %v9780_v60 = vadd.f32 %v7915_v28, %v4406_v58 }
 0xbbc   :  { %v4444_v22 = vsel %vm674_vm3, %v9785_v45, -inf }
 0xbbd   :  { %v6781_v17 = vpop.f32.mrb[76].mxu0  ;;  %v4441_v54 = vsel %vm674_vm3, %v9780_v60, -inf }
 0xbbe   :  { %v9792_v33 = vadd.f32 %v7917_v41, %v6781_v17  ;;  %v4416_v62 = vpop.f32.mrb[77].mxu0  ;;  %4442 = vmax.xlane.f32.xlu0 %v4441_v54 }
 0xbbf   :  { %v9799_v15 = vadd.f32 %v7918_v32, %v4416_v62 }
 0xbc0   :  { %v4450_v30 = vsel %vm674_vm3, %v9792_v33, -inf }
 0xbc1   :  { %v6784_v42 = vpop.f32.mrb[78].mxu0  ;;  %4451 = vmax.xlane.f32.xlu1 %v4450_v30  ;;  %v4447_v16 = vsel %vm674_vm3, %v9799_v15, -inf }
 0xbc2   :  { %v9806_v52 = vadd.f32 %v7919_v12, %v6784_v42  ;;  %v4426_v48 = vpop.f32.mrb[79].mxu0  ;;  %4445 = vmax.xlane.f32.xlu0 %v4444_v22 }
 0xbc3   :  { %v9813_v53 = vadd.f32 %v7920_v2, %v4426_v48 }
 0xbc4   :  { %v4456_v21 = vsel %vm674_vm3, %v9806_v52, -inf }
 0xbc5   :  { %4457 = vmax.xlane.f32.xlu1 %v4456_v21  ;;  %v4453_v46 = vsel %vm674_vm3, %v9813_v53, -inf }
 0xbc6   :  { %4448 = vmax.xlane.f32.xlu0 %v4447_v16 }
 0xbca   :  { %4454 = vmax.xlane.f32.xlu0 %v4453_v46 }
 0xbde   :  { %v3957_v55 = vpop.xlane.xlu1 %3956 }
 0xbdf   :  { %7775 = vrcp.f32 %v3957_v55  ;;  %v3954_v0 = vpop.xlane.xlu0 %3953 }
 0xbe0   :  { %7777 = vrcp.f32 %v3954_v0 }
 0xbe3   :  { %v3960_v40 = vpop.xlane.xlu0 %3959 }
 0xbe4   :  { %7779 = vrcp.f32 %v3960_v40 }
 0xbe7   :  { %v3963_v44 = vpop.xlane.xlu1 %3962 }
 0xbe8   :  { %7781 = vrcp.f32 %v3963_v44 }
 0xbe9   :  { %v7776_v5 = vpop.eup %7775 }
 0xbea   :  { %v7778_v1 = vpop.eup %7777  ;;  %v3985_v7 = vmul.f32 %v7776_v5, %v9712_v9 }
 0xbeb   :  { %v3969_v35 = vpop.xlane.xlu1 %3968  ;;  %v3984_v56 = vmul.f32 %v7778_v1, %v9715_v20 }
 0xbec   :  { %7783 = vrcp.f32 %v3969_v35  ;;  %v3966_v4 = vpop.xlane.xlu0 %3965 }
 0xbed   :  { %7785 = vrcp.f32 %v3966_v4  ;;  %6745 = vmatprep.mubr.msk.f32.mxu1 %vm674_vm3, %v3984_v56  ;;  %v494_v56 = vsub.s32 3, %v8071_v6 }
 0xbee   :  { %v7780_v61 = vpop.eup %7779  ;;  %6746 = vmatmul.mubr.msk.f32.vlgmr.msra.gmra.mrb[48].mxu1 %vm674_vm3, %v3985_v7 }
 0xbef   :  { %6786 = vmatpush3.msra.mxu1 %v8962_v39  ;;  %v3975_v3 = vpop.xlane.xlu1 %3974  ;;  %v3986_v57 = vmul.f32 %v7780_v61, %v9722_v13  ;;  %v9870_v61 = vld [vmem:[%s10379_s1] sm:$0xff] }
 0xbf0   :  { %7787 = vrcp.f32 %v3975_v3  ;;  %v3972_v8 = vpop.xlane.xlu0 %3971 }
 0xbf1   :  { %7789 = vrcp.f32 %v3972_v8  ;;  %6748 = vmatprep.mubr.msk.f32.mxu1 %vm674_vm3, %v3986_v57 }
 0xbf2   :  { %v7782_v20 = vpop.eup %7781 }
 0xbf3   :  { %v3987_v9 = vmul.f32 %v7782_v20, %v9726_v47  ;;  %v4526_v10 = vpop.permute.xlu1 %4525  ;;  %v7922_v20 = vld [vmem:[%s10377_s0 + $0x8] sm:$0xff] }
 0xbf4   :  { %v4524_v58 = vpop.permute.xlu0 %4523 }
 0xbf5   :  { %6749 = vmatmul.mubr.msk.f32.gmra.mrb[50].mxu1 %vm674_vm3, %v3987_v9 }
 0xbf6   :  { %v7784_v23 = vpop.eup %7783 }
 0xbf7   :  { %v7786_v31 = vpop.eup %7785  ;;  %v3989_v14 = vmul.f32 %v7784_v23, %v9730_v29  ;;  %v4528_v43 = vpop.permute.xlu1 %4527  ;;  %v7923_v23 = vld [vmem:[%s10377_s0] sm:$0xff] }
 0xbf8   :  { %v3988_v39 = vmul.f32 %v7786_v31, %v9732_v34  ;;  %v4532_v34 = vpop.permute.xlu0 %4531 }
 0xbfa   :  { %v7788_v18 = vpop.eup %7787  ;;  %6751 = vmatprep.mubr.msk.f32.mxu1 %vm674_vm3, %v3988_v39 }
 0xbfb   :  { %v7790_v13 = vpop.eup %7789  ;;  %6752 = vmatmul.mubr.msk.f32.gmra.mrb[52].mxu1 %vm674_vm3, %v3989_v14  ;;  %v3991_v27 = vmul.f32 %v7788_v18, %v9736_v24  ;;  %v4530_v29 = vpop.permute.xlu1 %4529 }
 0xbfc   :  { %v3990_v47 = vmul.f32 %v7790_v13, %v9740_v59  ;;  %v4536_v24 = vpop.permute.xlu0 %4535  ;;  %v7924_v13 = vld [vmem:[%s10377_s0 + $0x18] sm:$0xff] }
 0xbfe   :  { %6754 = vmatprep.mubr.msk.f32.mxu1 %vm674_vm3, %v3990_v47 }
 0xbff   :  { %6755 = vmatmul.mubr.msk.f32.gmra.mrb[54].mxu1 %vm674_vm3, %v3991_v27  ;;  %v4534_v28 = vpop.permute.xlu1 %4533 }
 0xc00   :  { %6787 = vmatprep.mubr.msk.f32.mxu1 %vm536_vm1, %v4524_v58 }
 0xc03   :  { %6788 = vmatmul.mubr.msk.f32.vlgmr.msra.gmra.mrb[72].mxu1 %vm536_vm1, %v4526_v10  ;;  %v4538_v59 = vpop.permute.xlu1 %4537 }
 0xc04   :  { %6790 = vmatprep.mubr.msk.f32.mxu1 %vm536_vm1, %v4528_v43  ;;  %v7925_v43 = vld [vmem:[%s10377_s0 + $0x10] sm:$0xff] }
 0xc07   :  { %6791 = vmatmul.mubr.msk.f32.gmra.mrb[74].mxu1 %vm536_vm1, %v4530_v29 }
 0xc08   :  { %6793 = vmatprep.mubr.msk.f32.mxu1 %vm536_vm1, %v4532_v34 }
 0xc0b   :  { %6794 = vmatmul.mubr.msk.f32.gmra.mrb[76].mxu1 %vm536_vm1, %v4534_v28 }
 0xc0c   :  { %6796 = vmatprep.mubr.msk.f32.mxu1 %vm536_vm1, %v4536_v24  ;;  %v7926_v24 = vld [vmem:[%s10377_s0 + $0x28] sm:$0xff] }
 0xc0f   :  { %6797 = vmatmul.mubr.msk.f32.gmra.mrb[78].mxu1 %vm536_vm1, %v4538_v59 }
 0xc46   :  { %v4440_v26 = vpop.xlane.xlu1 %4439 }
 0xc47   :  { %v4460_v17 = vsub.f32 %v9766_v50, %v4440_v26  ;;  %v4437_v54 = vpop.xlane.xlu0 %4436 }
 0xc48   :  { %v4459_v41 = vsub.f32 %v9771_v36, %v4437_v54 }
 0xc49   :  { %v4469_v62 = vmul.f32 1.442695, %v4460_v17 }
 0xc4a   :  { %v4467_v30 = vmul.f32 1.442695, %v4459_v41 }
 0xc4b   :  { %7791 = vpow2.f32 %v4469_v62  ;;  %v4443_v32 = vpop.xlane.xlu0 %4442  ;;  %v7928_v62 = vld [vmem:[%s10377_s0 + $0x38] sm:$0xff] }
 0xc4c   :  { %7793 = vpow2.f32 %v4467_v30  ;;  %v4461_v42 = vsub.f32 %v9780_v60, %v4443_v32 }
 0xc4e   :  { %v4471_v22 = vmul.f32 1.442695, %v4461_v42  ;;  %v4452_v12 = vpop.xlane.xlu1 %4451 }
 0xc4f   :  { %v4464_v48 = vsub.f32 %v9792_v33, %v4452_v12  ;;  %v4446_v21 = vpop.xlane.xlu0 %4445 }
 0xc50   :  { %7795 = vpow2.f32 %v4471_v22  ;;  %v4462_v2 = vsub.f32 %v9785_v45, %v4446_v21 }
 0xc51   :  { %v4477_v16 = vmul.f32 1.442695, %v4464_v48 }
 0xc52   :  { %v4473_v50 = vmul.f32 1.442695, %v4462_v2  ;;  %v4458_v46 = vpop.xlane.xlu1 %4457 }
 0xc53   :  { %v4466_v36 = vsub.f32 %v9806_v52, %v4458_v46  ;;  %v4449_v55 = vpop.xlane.xlu0 %4448 }
 0xc54   :  { %7797 = vpow2.f32 %v4473_v50  ;;  %v4463_v0 = vsub.f32 %v9799_v15, %v4449_v55 }
 0xc55   :  { %v9851_v40 = vpop.eup %7791  ;;  %7799 = vpow2.f32 %v4477_v16  ;;  %v4481_v44 = vmul.f32 1.442695, %v4466_v36 }
 0xc56   :  { %v9853_v60 = vpop.eup %7793  ;;  %v4475_v33 = vmul.f32 1.442695, %v4463_v0  ;;  %v4486_v5 = vsel %vm674_vm3, %v9851_v40, 0.0 }
 0xc57   :  { %4487 = vadd.xlane.f32.xlu1 %v4486_v5  ;;  %v4455_v45 = vpop.xlane.xlu0 %4454  ;;  %v4483_v1 = vsel %vm674_vm3, %v9853_v60, 0.0 }
 0xc58   :  { %7801 = vpow2.f32 %v4475_v33  ;;  %v4465_v52 = vsub.f32 %v9813_v53, %v4455_v45  ;;  %4484 = vadd.xlane.f32.xlu0 %v4483_v1  ;;  %v9873_v53 = vrot.slane %v9870_v61, %v494_v56 }
 0xc59   :  { %7803 = vpow2.f32 %v4481_v44 }
 0xc5a   :  { %v9860_v15 = vpop.eup %7795  ;;  %v4479_v35 = vmul.f32 1.442695, %v4465_v52  ;;  %v497_v9 = vadd.f32 %v7922_v20, %v9873_v53  ;;  %v496_v10 = vadd.f32 %v7923_v23, %v9873_v53  ;;  %v499_v27 = vadd.f32 %v7924_v13, %v9873_v53 }
 0xc5b   :  { %v4489_v7 = vsel %vm674_vm3, %v9860_v15, 0.0  ;;  %v498_v47 = vadd.f32 %v7925_v43, %v9873_v53  ;;  %v501_v59 = vadd.f32 %v7926_v24, %v9873_v53  ;;  %v503_v30 = vadd.f32 %v7928_v62, %v9873_v53 }
 0xc5c   :  { %7805 = vpow2.f32 %v4479_v35  ;;  %4490 = vadd.xlane.f32.xlu0 %v4489_v7  ;;  %v9906_v58 = vadd.f32 %v9363_v25, %v497_v9  ;;  %v9909_v29 = vadd.f32 %v9367_v63, %v496_v10  ;;  %v7927_v25 = vld [vmem:[%s10377_s0 + $0x20] sm:$0xff]  ;;  %v9924_v26 = vadd.f32 %v9371_v11, %v499_v27  ;;  %v7929_v11 = vld [vmem:[%s10377_s0 + $0x30] sm:$0xff] }
 0xc5d   :  { %v500_v63 = vadd.f32 %v7927_v25, %v9873_v53  ;;  %v9927_v17 = vadd.f32 %v9375_v51, %v498_v47  ;;  %v502_v51 = vadd.f32 %v7929_v11, %v9873_v53  ;;  %v9942_v32 = vadd.f32 %v9379_v37, %v501_v59 }
 0xc5e   :  { %v9865_v4 = vpop.eup %7797  ;;  %v4800_v54 = vsel %vm45_vm0, %v9906_v58, 0.0  ;;  %v4797_v41 = vsel %vm45_vm0, %v9909_v29, 0.0  ;;  %v4806_v22 = vsel %vm45_vm0, %v9924_v26, 0.0  ;;  %v9952_v48 = vadd.f32 %v9387_v49, %v503_v30 }
 0xc5f   :  { %v4492_v3 = vsel %vm674_vm3, %v9865_v4, 0.0  ;;  %v9877_v57 = vpop.eup %7799  ;;  %v9945_v42 = vadd.f32 %v9383_v19, %v500_v63  ;;  %v4803_v12 = vsel %vm45_vm0, %v9927_v17, 0.0  ;;  %v9955_v21 = vadd.f32 %v9391_v38, %v502_v51 }
 0xc60   :  { %4493 = vadd.xlane.f32.xlu1 %v4492_v3  ;;  %v4498_v31 = vsel %vm674_vm3, %v9877_v57, 0.0  ;;  %v4812_v37 = vsel %vm45_vm0, %v9942_v32, 0.0  ;;  %v4818_v2 = vsel %vm45_vm0, %v9952_v48, 0.0 }
 0xc61   :  { %v4809_v19 = vsel %vm45_vm0, %v9945_v42, 0.0  ;;  %v4815_v16 = vsel %vm45_vm0, %v9955_v21, 0.0 }
 0xc62   :  { %v9879_v8 = vpop.eup %7801 }
 0xc63   :  { %v4495_v14 = vsel %vm674_vm3, %v9879_v8, 0.0  ;;  %v9893_v39 = vpop.eup %7803 }
 0xc64   :  { %4499 = vadd.xlane.f32.xlu1 %v4498_v31  ;;  %4496 = vadd.xlane.f32.xlu0 %v4495_v14  ;;  %v4504_v34 = vsel %vm674_vm3, %v9893_v39, 0.0 }
 0xc66   :  { %v9895_v18 = vpop.eup %7805 }
 0xc67   :  { %v4501_v28 = vsel %vm674_vm3, %v9895_v18, 0.0 }
 0xc68   :  { %4505 = vadd.xlane.f32.xlu1 %v4504_v34  ;;  %4502 = vadd.xlane.f32.xlu0 %v4501_v28 }
 0xc6c   :  { %4801 = vadd.xlane.f32.xlu1 %v4800_v54  ;;  %4798 = vadd.xlane.f32.xlu0 %v4797_v41 }
 0xc70   :  { %4807 = vadd.xlane.f32.xlu1 %v4806_v22  ;;  %4804 = vadd.xlane.f32.xlu0 %v4803_v12  ;;  %v7932_v12 = vld [vmem:[%s10377_s0 + $0x58] sm:$0xff] }
 0xc74   :  { %4813 = vadd.xlane.f32.xlu1 %v4812_v37  ;;  %4810 = vadd.xlane.f32.xlu0 %v4809_v19  ;;  %v2676_v37 = vadd.f32 %v7932_v12, %v9873_v53  ;;  %v7933_v19 = vld [vmem:[%s10377_s0 + $0x50] sm:$0xff] }
 0xc78   :  { %4819 = vadd.xlane.f32.xlu1 %v4818_v2  ;;  %4816 = vadd.xlane.f32.xlu0 %v4815_v16  ;;  %v2675_v2 = vadd.f32 %v7933_v19, %v9873_v53 }
 0xcd6   :  { %v6789_v49 = vpop.f32.mrb[72].mxu1 }
 0xcd7   :  { %v4621_v50 = vpop.f32.mrb[73].mxu1 }
 0xcd8   :  { %v7227_v38 = vpack.c.bf16 %v6789_v49, %v4621_v50 }
 0xcda   :  { %v6792_v46 = vpop.f32.mrb[74].mxu1  ;;  %7228 = vmatprep.subr.bf16.mxu1 %v7227_v38 }
 0xcdb   :  { %v4631_v36 = vpop.f32.mrb[75].mxu1  ;;  %7230 = vmatpush3.bf16.msra.mxu1 %v7227_v38 }
 0xcdc   :  { %v7231_v55 = vpack.c.bf16 %v6792_v46, %v4631_v36 }
 0xcde   :  { %v6795_v0 = vpop.f32.mrb[76].mxu1  ;;  %7232 = vmatprep.subr.bf16.mxu1 %v7231_v55 }
 0xcdf   :  { %v4641_v44 = vpop.f32.mrb[77].mxu1  ;;  %7234 = vmatpush3.bf16.msra.mxu1 %v7231_v55 }
 0xce0   :  { %v7235_v33 = vpack.c.bf16 %v6795_v0, %v4641_v44  ;;  %v7934_v0 = vld [vmem:[%s10377_s0 + $0x68] sm:$0xff] }
 0xce1   :  { %v2678_v44 = vadd.f32 %v7934_v0, %v9873_v53 }
 0xce2   :  { %v6798_v5 = vpop.f32.mrb[78].mxu1  ;;  %7236 = vmatprep.subr.bf16.mxu1 %v7235_v33 }
 0xce3   :  { %v4651_v45 = vpop.f32.mrb[79].mxu1  ;;  %7238 = vmatpush3.bf16.msra.mxu1 %v7235_v33 }
 0xce4   :  { %v7239_v1 = vpack.c.bf16 %v6798_v5, %v4651_v45  ;;  %v4488_v52 = vpop.xlane.xlu1 %4487  ;;  %v7935_v5 = vld [vmem:[%s10377_s0 + $0x60] sm:$0xff] }
 0xce5   :  { %7807 = vrcp.f32 %v4488_v52  ;;  %v4485_v35 = vpop.xlane.xlu0 %4484  ;;  %v2677_v45 = vadd.f32 %v7935_v5, %v9873_v53 }
 0xce6   :  { %7240 = vmatprep.subr.bf16.mxu1 %v7239_v1  ;;  %7809 = vrcp.f32 %v4485_v35 }
 0xce7   :  { %7242 = vmatpush3.bf16.msra.mxu1 %v7239_v1 }
 0xce9   :  { %v4491_v56 = vpop.xlane.xlu0 %4490 }
 0xcea   :  { %7811 = vrcp.f32 %v4491_v56 }
 0xced   :  { %v4494_v7 = vpop.xlane.xlu1 %4493 }
 0xcee   :  { %7813 = vrcp.f32 %v4494_v7 }
 0xcef   :  { %v7808_v3 = vpop.eup %7807 }
 0xcf0   :  { %v7810_v20 = vpop.eup %7809  ;;  %v4516_v31 = vmul.f32 %v7808_v3, %v9851_v40  ;;  %v7936_v3 = vld [vmem:[%s10377_s0 + $0x78] sm:$0xff] }
 0xcf1   :  { %v4500_v9 = vpop.xlane.xlu1 %4499  ;;  %v4497_v23 = vpop.xlane.xlu0 %4496  ;;  %v4515_v10 = vmul.f32 %v7810_v20, %v9853_v60  ;;  %v2680_v20 = vadd.f32 %v7936_v3, %v9873_v53 }
 0xcf2   :  { %7815 = vrcp.f32 %v4500_v9 }
 0xcf3   :  { %7817 = vrcp.f32 %v4497_v23  ;;  %6815 = vmatprep.mubr.msk.f32.mxu1 %vm674_vm3, %v4515_v10  ;;  %v7937_v10 = vld [vmem:[%s10377_s0 + $0x70] sm:$0xff] }
 0xcf4   :  { %v7812_v14 = vpop.eup %7811  ;;  %6816 = vmatmul.mubr.msk.f32.vlgmr.msra.gmra.mrb[48].mxu1 %vm674_vm3, %v4516_v31  ;;  %v2679_v31 = vadd.f32 %v7937_v10, %v9873_v53 }
 0xcf5   :  { %v4506_v13 = vpop.xlane.xlu1 %4505  ;;  %v4503_v27 = vpop.xlane.xlu0 %4502  ;;  %v4517_v43 = vmul.f32 %v7812_v14, %v9860_v15 }
 0xcf6   :  { %7819 = vrcp.f32 %v4506_v13 }
 0xcf7   :  { %7821 = vrcp.f32 %v4503_v27  ;;  %6818 = vmatprep.mubr.msk.f32.mxu1 %vm674_vm3, %v4517_v43 }
 0xcf8   :  { %v7814_v47 = vpop.eup %7813 }
 0xcf9   :  { %v4518_v60 = vmul.f32 %v7814_v47, %v9865_v4  ;;  %v7930_v4 = vld [vmem:[%s10377_s0 + $0x48] sm:$0xff]  ;;  %v4802_v30 = vpop.xlane.xlu1 %4801  ;;  %v4799_v51 = vpop.xlane.xlu0 %4798 }
 0xcfa   :  { %v4846_v1 = vmul.f32 0.03125, %v4802_v30  ;;  %v4845_v52 = vmul.f32 0.03125, %v4799_v51 }
 0xcfb   :  { %6819 = vmatmul.mubr.msk.f32.gmra.mrb[50].mxu1 %vm674_vm3, %v4518_v60 }
 0xcfc   :  { %v7816_v40 = vpop.eup %7815  ;;  %v10034_v14 = vsub.f32 %v9906_v58, %v4846_v1  ;;  %v10039_v47 = vsub.f32 %v9909_v29, %v4845_v52 }
 0xcfd   :  { %v7818_v34 = vpop.eup %7817  ;;  %v4520_v28 = vmul.f32 %v7816_v40, %v9877_v57  ;;  %v2674_v57 = vadd.f32 %v7930_v4, %v9873_v53  ;;  %v4808_v38 = vpop.xlane.xlu1 %4807 }
 0xcfe   :  { %v4519_v24 = vmul.f32 %v7818_v34, %v9879_v8  ;;  %v7931_v8 = vld [vmem:[%s10377_s0 + $0x40] sm:$0xff]  ;;  %v4805_v36 = vpop.xlane.xlu0 %4804  ;;  %v4848_v13 = vmul.f32 0.03125, %v4808_v38 }
 0xcff   :  { %v2673_v54 = vadd.f32 %v7931_v8, %v9873_v53  ;;  %v4847_v60 = vmul.f32 0.03125, %v4805_v36 }
 0xd00   :  { %v7820_v59 = vpop.eup %7819  ;;  %6821 = vmatprep.mubr.msk.f32.mxu1 %vm674_vm3, %v4519_v24 }
 0xd01   :  { %v7822_v25 = vpop.eup %7821  ;;  %6822 = vmatmul.mubr.msk.f32.gmra.mrb[52].mxu1 %vm674_vm3, %v4520_v28  ;;  %v4522_v15 = vmul.f32 %v7820_v59, %v9893_v39  ;;  %v4814_v9 = vpop.xlane.xlu1 %4813  ;;  %v10048_v59 = vsub.f32 %v9924_v26, %v4848_v13  ;;  %v10055_v4 = vsub.f32 %v9927_v17, %v4847_v60 }
 0xd02   :  { %v4521_v63 = vmul.f32 %v7822_v25, %v9895_v18  ;;  %v4811_v27 = vpop.xlane.xlu0 %4810  ;;  %v4850_v25 = vmul.f32 0.03125, %v4814_v9  ;;  %v44_v9 = vld [vmem:[%s10378_s2 + $0x38] sm:$0xff] }
 0xd04   :  { %6824 = vmatprep.mubr.msk.f32.mxu1 %vm674_vm3, %v4521_v63  ;;  %v4878_v63 = vmul.f32 %v10034_v14, %v10034_v14  ;;  %v10062_v30 = vsub.f32 %v9942_v32, %v4850_v25 }
 0xd05   :  { %6825 = vmatmul.mubr.msk.f32.gmra.mrb[54].mxu1 %vm674_vm3, %v4522_v15  ;;  %v4820_v8 = vpop.xlane.xlu1 %4819 }
 0xd06   :  { %v4896_v51 = vsel %vm45_vm0, %v4878_v63, 0.0  ;;  %v4882_v38 = vmul.f32 %v10062_v30, %v10062_v30 }
 0xdc7   :  { %v6817_v41 = vpop.f32.mrb[48].mxu1 }
 0xdc8   :  { %v9989_v39 = vadd.f32 %v6817_v41, %v2674_v57  ;;  %v4750_v18 = vpop.f32.mrb[49].mxu1  ;;  %v4849_v57 = vmul.f32 0.03125, %v4811_v27  ;;  %v4877_v41 = vmul.f32 %v10039_v47, %v10039_v47 }
 0xdc9   :  { %v9991_v62 = vadd.f32 %v4750_v18, %v2673_v54  ;;  %v4817_v18 = vpop.xlane.xlu0 %4816 }
 0xdca   :  { %v4824_v11 = vsel %vm45_vm0, %v9989_v39, 0.0  ;;  %v10068_v12 = vsub.f32 %v9945_v42, %v4849_v57  ;;  %v4893_v19 = vsel %vm45_vm0, %v4877_v41, 0.0 }
 0xdcb   :  { %4825 = vadd.xlane.f32.xlu1 %v4824_v11  ;;  %v4821_v22 = vsel %vm45_vm0, %v9991_v62, 0.0  ;;  %v4852_v11 = vmul.f32 0.03125, %v4820_v8 }
 0xdcc   :  { %4822 = vadd.xlane.f32.xlu0 %v4821_v22  ;;  %v4880_v22 = vmul.f32 %v10048_v59, %v10048_v59  ;;  %v4881_v0 = vmul.f32 %v10068_v12, %v10068_v12 }
 0xdce   :  { %v6820_v16 = vpop.f32.mrb[50].mxu1  ;;  %v4905_v5 = vsel %vm45_vm0, %v4881_v0, 0.0 }
 0xdcf   :  { %v10005_v49 = vadd.f32 %v6820_v16, %v2676_v37  ;;  %v4760_v50 = vpop.f32.mrb[51].mxu1  ;;  %v4851_v37 = vmul.f32 0.03125, %v4817_v18  ;;  %v10074_v16 = vsub.f32 %v9952_v48, %v4852_v11 }
 0xdd0   :  { %v10007_v46 = vadd.f32 %v4760_v50, %v2675_v2  ;;  %v4879_v2 = vmul.f32 %v10055_v4, %v10055_v4  ;;  %v4902_v50 = vsel %vm45_vm0, %v4880_v22, 0.0 }
 0xdd1   :  { %v4830_v55 = vsel %vm45_vm0, %v10005_v49, 0.0  ;;  %v10080_v36 = vsub.f32 %v9955_v21, %v4851_v37 }
 0xdd2   :  { %4831 = vadd.xlane.f32.xlu1 %v4830_v55  ;;  %v4827_v33 = vsel %vm45_vm0, %v10007_v46, 0.0  ;;  %v4899_v55 = vsel %vm45_vm0, %v4879_v2, 0.0 }
 0xdd3   :  { %4828 = vadd.xlane.f32.xlu0 %v4827_v33  ;;  %v4884_v33 = vmul.f32 %v10074_v16, %v10074_v16 }
 0xdd4   :  { %v6823_v35 = vpop.f32.mrb[52].mxu1 }
 0xdd5   :  { %v10021_v56 = vadd.f32 %v6823_v35, %v2678_v44  ;;  %v4770_v7 = vpop.f32.mrb[53].mxu1  ;;  %v4908_v44 = vsel %vm45_vm0, %v4882_v38, 0.0  ;;  %v4914_v1 = vsel %vm45_vm0, %v4884_v33, 0.0  ;;  %v38_v35 = vld [vmem:[%s10378_s2 + $0x8] sm:$0xff] }
 0xdd6   :  { %v10027_v23 = vadd.f32 %v4770_v7, %v2677_v45  ;;  %v4883_v45 = vmul.f32 %v10080_v36, %v10080_v36  ;;  %v40_v7 = vld [vmem:[%s10378_s2 + $0x18] sm:$0xff] }
 0xdd7   :  { %v4836_v43 = vsel %vm45_vm0, %v10021_v56, 0.0  ;;  %v7243_v3 = vpack.c.bf16 %v40_v7, %v38_v35 }
 0xdd8   :  { %4837 = vadd.xlane.f32.xlu1 %v4836_v43  ;;  %v6826_v40 = vpop.f32.mrb[54].mxu1  ;;  %v4833_v34 = vsel %vm45_vm0, %v10027_v23, 0.0  ;;  %v4911_v52 = vsel %vm45_vm0, %v4883_v45, 0.0 }
 0xdd9   :  { %v10043_v28 = vadd.f32 %v6826_v40, %v2680_v20  ;;  %4834 = vadd.xlane.f32.xlu0 %v4833_v34  ;;  %v4780_v53 = vpop.f32.mrb[55].mxu1  ;;  %7244 = vmatprep.subr.bf16.mxu0 %v7243_v3  ;;  %v42_v20 = vld [vmem:[%s10378_s2 + $0x28] sm:$0xff] }
 0xdda   :  { %v10045_v24 = vadd.f32 %v4780_v53, %v2679_v31  ;;  %7246 = vmatpush3.bf16.msra.mxu0 %v7243_v3  ;;  %v7247_v10 = vpack.c.bf16 %v44_v9, %v42_v20 }
 0xddb   :  { %v4842_v15 = vsel %vm45_vm0, %v10043_v28, 0.0 }
 0xddc   :  { %4843 = vadd.xlane.f32.xlu1 %v4842_v15  ;;  %v4839_v54 = vsel %vm45_vm0, %v10045_v24, 0.0  ;;  %7248 = vmatprep.subr.bf16.mxu0 %v7247_v10 }
 0xddd   :  { %4840 = vadd.xlane.f32.xlu0 %v4839_v54 }
 0xdde   :  { %7250 = vmatpush3.bf16.msra.mxu0 %v7247_v10 }
 0xde0   :  { %4897 = vadd.xlane.f32.xlu1 %v4896_v51 }
 0xde1   :  { %4894 = vadd.xlane.f32.xlu0 %v4893_v19 }
 0xde4   :  { %4903 = vadd.xlane.f32.xlu1 %v4902_v50 }
 0xde5   :  { %4900 = vadd.xlane.f32.xlu0 %v4899_v55 }
 0xde8   :  { %4909 = vadd.xlane.f32.xlu1 %v4908_v44 }
 0xde9   :  { %4906 = vadd.xlane.f32.xlu0 %v4905_v5 }
 0xdec   :  { %4915 = vadd.xlane.f32.xlu1 %v4914_v1 }
 0xded   :  { %4912 = vadd.xlane.f32.xlu0 %v4911_v52 }
 0xe58   :  { %v4826_v31 = vpop.xlane.xlu1 %4825 }
 0xe59   :  { %v4854_v13 = vmul.f32 0.03125, %v4826_v31  ;;  %v4823_v27 = vpop.xlane.xlu0 %4822 }
 0xe5a   :  { %v4853_v43 = vmul.f32 0.03125, %v4823_v27 }
 0xe5b   :  { %v10106_v60 = vsub.f32 %v9989_v39, %v4854_v13 }
 0xe5c   :  { %v10109_v40 = vsub.f32 %v9991_v62, %v4853_v43 }
 0xe5d   :  { %v4886_v34 = vmul.f32 %v10106_v60, %v10106_v60 }
 0xe5e   :  { %v4885_v53 = vmul.f32 %v10109_v40, %v10109_v40 }
 0xe5f   :  { %v4832_v25 = vpop.xlane.xlu1 %4831  ;;  %v4920_v15 = vsel %vm45_vm0, %v4886_v34, 0.0 }
 0xe60   :  { %v4856_v63 = vmul.f32 0.03125, %v4832_v25  ;;  %4921 = vadd.xlane.f32.xlu1 %v4920_v15  ;;  %v4829_v57 = vpop.xlane.xlu0 %4828  ;;  %v4917_v8 = vsel %vm45_vm0, %v4885_v53, 0.0 }
 0xe61   :  { %v4855_v54 = vmul.f32 0.03125, %v4829_v57  ;;  %4918 = vadd.xlane.f32.xlu0 %v4917_v8 }
 0xe62   :  { %v10118_v41 = vsub.f32 %v10005_v49, %v4856_v63 }
 0xe63   :  { %v10121_v18 = vsub.f32 %v10007_v46, %v4855_v54 }
 0xe64   :  { %v4888_v11 = vmul.f32 %v10118_v41, %v10118_v41 }
 0xe65   :  { %v4838_v51 = vpop.xlane.xlu1 %4837  ;;  %v4887_v22 = vmul.f32 %v10121_v18, %v10121_v18 }
 0xe66   :  { %v4858_v37 = vmul.f32 0.03125, %v4838_v51  ;;  %v4835_v19 = vpop.xlane.xlu0 %4834  ;;  %v4926_v2 = vsel %vm45_vm0, %v4888_v11, 0.0 }
 0xe67   :  { %v4857_v50 = vmul.f32 0.03125, %v4835_v19  ;;  %4927 = vadd.xlane.f32.xlu1 %v4926_v2  ;;  %v4923_v38 = vsel %vm45_vm0, %v4887_v22, 0.0  ;;  %v5007_v2 = vsub.s32 4, %v8071_v6 }
 0xe68   :  { %v10130_v55 = vsub.f32 %v10021_v56, %v4858_v37  ;;  %4924 = vadd.xlane.f32.xlu0 %v4923_v38 }
 0xe69   :  { %v10133_v0 = vsub.f32 %v10027_v23, %v4857_v50  ;;  %v4844_v44 = vpop.xlane.xlu1 %4843 }
 0xe6a   :  { %v4860_v33 = vmul.f32 0.03125, %v4844_v44  ;;  %v4841_v5 = vpop.xlane.xlu0 %4840  ;;  %v4890_v45 = vmul.f32 %v10130_v55, %v10130_v55 }
 0xe6b   :  { %v4859_v1 = vmul.f32 0.03125, %v4841_v5  ;;  %v4889_v52 = vmul.f32 %v10133_v0, %v10133_v0  ;;  %v5027_v5 = vsub.s32 5, %v8071_v6 }
 0xe6c   :  { %v10140_v35 = vsub.f32 %v10043_v28, %v4860_v33  ;;  %v4932_v7 = vsel %vm45_vm0, %v4890_v45, 0.0 }
 0xe6d   :  { %v10144_v3 = vsub.f32 %v10045_v24, %v4859_v1  ;;  %4933 = vadd.xlane.f32.xlu1 %v4932_v7  ;;  %v4898_v20 = vpop.xlane.xlu1 %4897  ;;  %v4929_v9 = vsel %vm45_vm0, %v4889_v52, 0.0  ;;  %v10156_v52 = vrot.slane %v9870_v61, %v5007_v2 }
 0xe6e   :  { %v4942_v10 = vmul.f32 0.03125, %v4898_v20  ;;  %4930 = vadd.xlane.f32.xlu0 %v4929_v9  ;;  %v4895_v31 = vpop.xlane.xlu0 %4894  ;;  %v4892_v13 = vmul.f32 %v10140_v35, %v10140_v35 }
 0xe6f   :  { %v4941_v27 = vmul.f32 0.03125, %v4895_v31  ;;  %v4891_v43 = vmul.f32 %v10144_v3, %v10144_v3 }
 0xe70   :  { %v4958_v34 = vadd.f32 1e-05, %v4942_v10  ;;  %v4938_v53 = vsel %vm45_vm0, %v4892_v13, 0.0 }
 0xe71   :  { %v4957_v25 = vadd.f32 1e-05, %v4941_v27  ;;  %4939 = vadd.xlane.f32.xlu1 %v4938_v53  ;;  %v4904_v15 = vpop.xlane.xlu1 %4903  ;;  %v4935_v63 = vsel %vm45_vm0, %v4891_v43, 0.0  ;;  %v10160_v27 = vrot.slane %v9870_v61, %v5027_v5 }
 0xe72   :  { %7823 = vrsqrt.f32 %v4958_v34  ;;  %v4944_v57 = vmul.f32 0.03125, %v4904_v15  ;;  %4936 = vadd.xlane.f32.xlu0 %v4935_v63  ;;  %v4901_v8 = vpop.xlane.xlu0 %4900 }
 0xe73   :  { %7825 = vrsqrt.f32 %v4957_v25  ;;  %v4943_v54 = vmul.f32 0.03125, %v4901_v8 }
 0xe74   :  { %v4960_v11 = vadd.f32 1e-05, %v4944_v57 }
 0xe75   :  { %v4959_v51 = vadd.f32 1e-05, %v4943_v54  ;;  %v4910_v22 = vpop.xlane.xlu1 %4909 }
 0xe76   :  { %7827 = vrsqrt.f32 %v4960_v11  ;;  %v4946_v37 = vmul.f32 0.03125, %v4910_v22  ;;  %v4907_v19 = vpop.xlane.xlu0 %4906 }
 0xe77   :  { %7829 = vrsqrt.f32 %v4959_v51  ;;  %v4945_v50 = vmul.f32 0.03125, %v4907_v19 }
 0xe78   :  { %v4962_v38 = vadd.f32 1e-05, %v4946_v37 }
 0xe79   :  { %v4961_v44 = vadd.f32 1e-05, %v4945_v50  ;;  %v4916_v33 = vpop.xlane.xlu1 %4915 }
 0xe7a   :  { %7831 = vrsqrt.f32 %v4962_v38  ;;  %v4948_v45 = vmul.f32 0.03125, %v4916_v33  ;;  %v4913_v1 = vpop.xlane.xlu0 %4912 }
 0xe7b   :  { %7833 = vrsqrt.f32 %v4961_v44  ;;  %v4947_v7 = vmul.f32 0.03125, %v4913_v1 }
 0xe7c   :  { %v7824_v20 = vpop.eup %7823  ;;  %v4964_v9 = vadd.f32 1e-05, %v4948_v45 }
 0xe7d   :  { %v7826_v10 = vpop.eup %7825  ;;  %v4990_v31 = vmul.f32 %v7824_v20, %v10034_v14  ;;  %v4963_v13 = vadd.f32 1e-05, %v4947_v7  ;;  %v5324_v20 = vld [vmem:[%s10381_s3 + $0x10] sm:$0xff] }
 0xe7e   :  { %7835 = vrsqrt.f32 %v4964_v9  ;;  %v4989_v43 = vmul.f32 %v7826_v10, %v10039_v47  ;;  %v5325_v10 = vld [vmem:[%s10381_s3 + $0x18] sm:$0xff] }
 0xe7f   :  { %v5010_v34 = vmul.f32 %v10156_v52, %v4990_v31  ;;  %7837 = vrsqrt.f32 %v4963_v13  ;;  %v7255_v31 = vpack.c.bf16 %v5325_v10, %v5324_v20  ;;  %v5326_v13 = vld [vmem:[%s10381_s3 + $0x20] sm:$0xff] }
 0xe80   :  { %v7828_v53 = vpop.eup %7827  ;;  %v5009_v25 = vmul.f32 %v10156_v52, %v4989_v43  ;;  %v5327_v43 = vld [vmem:[%s10381_s3 + $0x28] sm:$0xff] }
 0xe81   :  { %v7830_v15 = vpop.eup %7829  ;;  %v4992_v63 = vmul.f32 %v7828_v53, %v10048_v59  ;;  %v5030_v8 = vadd.f32 %v10160_v27, %v5010_v34  ;;  %v7259_v34 = vpack.c.bf16 %v5327_v43, %v5326_v13  ;;  %v5328_v53 = vld [vmem:[%s10381_s3 + $0x30] sm:$0xff] }
 0xe82   :  { %v5029_v57 = vadd.f32 %v10160_v27, %v5009_v25  ;;  %v4991_v14 = vmul.f32 %v7830_v15, %v10055_v4  ;;  %v5329_v25 = vld [vmem:[%s10381_s3 + $0x38] sm:$0xff] }
 0xe83   :  { %v5012_v54 = vmul.f32 %v10156_v52, %v4992_v63  ;;  %v7263_v15 = vpack.c.bf16 %v5329_v25, %v5328_v53  ;;  %v5330_v63 = vld [vmem:[%s10381_s3 + $0x40] sm:$0xff] }
 0xe84   :  { %v7832_v11 = vpop.eup %7831  ;;  %6835 = vmatprep.mubr.msk.f32.mxu0 %vm45_vm0, %v5029_v57  ;;  %v5011_v47 = vmul.f32 %v10156_v52, %v4991_v14  ;;  %v5331_v57 = vld [vmem:[%s10381_s3 + $0x48] sm:$0xff] }
 0xe85   :  { %v7834_v51 = vpop.eup %7833  ;;  %6836 = vmatmul.mubr.msk.f32.vlgmr.msra.gmra.mrb[80].mxu0 %vm45_vm0, %v5030_v8  ;;  %v4994_v22 = vmul.f32 %v7832_v11, %v10062_v30  ;;  %v5032_v4 = vadd.f32 %v10160_v27, %v5012_v54  ;;  %v7267_v14 = vpack.c.bf16 %v5331_v57, %v5330_v63  ;;  %v5332_v8 = vld [vmem:[%s10381_s3 + $0x50] sm:$0xff]  ;;  %v5333_v54 = vld [vmem:[%s10381_s3 + $0x58] sm:$0xff] }
 0xe86   :  { %v5031_v59 = vadd.f32 %v10160_v27, %v5011_v47  ;;  %v4993_v37 = vmul.f32 %v7834_v51, %v10068_v12  ;;  %v7271_v11 = vpack.c.bf16 %v5333_v54, %v5332_v8  ;;  %v5334_v47 = vld [vmem:[%s10381_s3 + $0x60] sm:$0xff]  ;;  %v5335_v51 = vld [vmem:[%s10381_s3 + $0x68] sm:$0xff] }
 0xe87   :  { %v5014_v19 = vmul.f32 %v10156_v52, %v4994_v22  ;;  %v7275_v22 = vpack.c.bf16 %v5335_v51, %v5334_v47 }
 0xe88   :  { %v7836_v2 = vpop.eup %7835  ;;  %6838 = vmatprep.mubr.msk.f32.mxu0 %vm45_vm0, %v5031_v59  ;;  %v5013_v50 = vmul.f32 %v10156_v52, %v4993_v37  ;;  %v5336_v59 = vld [vmem:[%s10381_s3 + $0x70] sm:$0xff]  ;;  %v5337_v37 = vld [vmem:[%s10381_s3 + $0x78] sm:$0xff] }
 0xe89   :  { %v7838_v38 = vpop.eup %7837  ;;  %6839 = vmatmul.mubr.msk.f32.gmra.mrb[82].mxu0 %vm45_vm0, %v5032_v4  ;;  %v4996_v44 = vmul.f32 %v7836_v2, %v10074_v16  ;;  %v5034_v12 = vadd.f32 %v10160_v27, %v5014_v19  ;;  %v5322_v16 = vld [vmem:[%s10381_s3] sm:$0xff]  ;;  %v7279_v4 = vpack.c.bf16 %v5337_v37, %v5336_v59 }
 0xe8a   :  { %v5033_v30 = vadd.f32 %v10160_v27, %v5013_v50  ;;  %v4995_v33 = vmul.f32 %v7838_v38, %v10080_v36  ;;  %v5323_v36 = vld [vmem:[%s10381_s3 + $0x8] sm:$0xff] }
 0xe8b   :  { %v5016_v5 = vmul.f32 %v10156_v52, %v4996_v44  ;;  %v7251_v9 = vpack.c.bf16 %v5323_v36, %v5322_v16 }
 0xe8c   :  { %6841 = vmatprep.mubr.msk.f32.mxu0 %vm45_vm0, %v5033_v30  ;;  %v5015_v45 = vmul.f32 %v10156_v52, %v4995_v33 }
 0xe8d   :  { %6842 = vmatmul.mubr.msk.f32.gmra.mrb[84].mxu0 %vm45_vm0, %v5034_v12  ;;  %v5036_v7 = vadd.f32 %v10160_v27, %v5016_v5  ;;  %7252 = vmatprep.subr.bf16.mxu0 %v7251_v9 }
 0xe8e   :  { %v5035_v1 = vadd.f32 %v10160_v27, %v5015_v45  ;;  %7283 = vmatprep.subr.bf16.mxu1 %v7251_v9  ;;  %7254 = vmatpush3.bf16.msra.mxu0 %v7251_v9 }
 0xe8f   :  { %7291 = vmatpush3.bf16.msra.mxu1 %v7251_v9  ;;  %7256 = vmatprep.subr.bf16.mxu0 %v7255_v31 }
 0xe90   :  { %6844 = vmatprep.mubr.msk.f32.mxu0 %vm45_vm0, %v5035_v1  ;;  %7284 = vmatprep.subr.bf16.mxu1 %v7255_v31 }
 0xe91   :  { %6845 = vmatmul.mubr.msk.f32.gmra.mrb[86].mxu0 %vm45_vm0, %v5036_v7 }
 0xe92   :  { %7258 = vmatpush3.bf16.msra.mxu0 %v7255_v31 }
 0xe93   :  { %7292 = vmatpush3.bf16.msra.mxu1 %v7255_v31  ;;  %7260 = vmatprep.subr.bf16.mxu0 %v7259_v34 }
 0xe94   :  { %7285 = vmatprep.subr.bf16.mxu1 %v7259_v34 }
 0xe96   :  { %7262 = vmatpush3.bf16.msra.mxu0 %v7259_v34 }
 0xe97   :  { %7293 = vmatpush3.bf16.msra.mxu1 %v7259_v34  ;;  %7264 = vmatprep.subr.bf16.mxu0 %v7263_v15 }
 0xe98   :  { %7286 = vmatprep.subr.bf16.mxu1 %v7263_v15 }
 0xe9a   :  { %7266 = vmatpush3.bf16.msra.mxu0 %v7263_v15 }
 0xe9b   :  { %7294 = vmatpush3.bf16.msra.mxu1 %v7263_v15  ;;  %7268 = vmatprep.subr.bf16.mxu0 %v7267_v14 }
 0xe9c   :  { %7287 = vmatprep.subr.bf16.mxu1 %v7267_v14 }
 0xe9e   :  { %7270 = vmatpush3.bf16.msra.mxu0 %v7267_v14 }
 0xe9f   :  { %7295 = vmatpush3.bf16.msra.mxu1 %v7267_v14  ;;  %7272 = vmatprep.subr.bf16.mxu0 %v7271_v11 }
 0xea0   :  { %7288 = vmatprep.subr.bf16.mxu1 %v7271_v11 }
 0xea2   :  { %7274 = vmatpush3.bf16.msra.mxu0 %v7271_v11 }
 0xea3   :  { %7296 = vmatpush3.bf16.msra.mxu1 %v7271_v11  ;;  %7276 = vmatprep.subr.bf16.mxu0 %v7275_v22 }
 0xea4   :  { %7289 = vmatprep.subr.bf16.mxu1 %v7275_v22 }
 0xea6   :  { %7278 = vmatpush3.bf16.msra.mxu0 %v7275_v22 }
 0xea7   :  { %7297 = vmatpush3.bf16.msra.mxu1 %v7275_v22  ;;  %7280 = vmatprep.subr.bf16.mxu0 %v7279_v4 }
 0xea8   :  { %7290 = vmatprep.subr.bf16.mxu1 %v7279_v4 }
 0xeaa   :  { %7282 = vmatpush3.bf16.msra.mxu0 %v7279_v4 }
 0xeab   :  { %7298 = vmatpush3.bf16.msra.mxu1 %v7279_v4 }
 0xeed   :  { %v4922_v19 = vpop.xlane.xlu1 %4921 }
 0xeee   :  { %v4950_v2 = vmul.f32 0.03125, %v4922_v19  ;;  %v4919_v50 = vpop.xlane.xlu0 %4918 }
 0xeef   :  { %v4949_v38 = vmul.f32 0.03125, %v4919_v50 }
 0xef0   :  { %v4966_v44 = vadd.f32 1e-05, %v4950_v2 }
 0xef1   :  { %v4965_v30 = vadd.f32 1e-05, %v4949_v38 }
 0xef2   :  { %7839 = vrsqrt.f32 %v4966_v44 }
 0xef3   :  { %7841 = vrsqrt.f32 %v4965_v30 }
 0xef4   :  { %v4928_v33 = vpop.xlane.xlu1 %4927 }
 0xef5   :  { %v4952_v12 = vmul.f32 0.03125, %v4928_v33  ;;  %v4925_v5 = vpop.xlane.xlu0 %4924 }
 0xef6   :  { %v4951_v45 = vmul.f32 0.03125, %v4925_v5 }
 0xef7   :  { %v4968_v1 = vadd.f32 1e-05, %v4952_v12 }
 0xef8   :  { %v4967_v7 = vadd.f32 1e-05, %v4951_v45 }
 0xef9   :  { %7843 = vrsqrt.f32 %v4968_v1 }
 0xefa   :  { %7845 = vrsqrt.f32 %v4967_v7  ;;  %v4934_v16 = vpop.xlane.xlu1 %4933 }
 0xefb   :  { %v4954_v36 = vmul.f32 0.03125, %v4934_v16  ;;  %v4931_v20 = vpop.xlane.xlu0 %4930 }
 0xefc   :  { %v7840_v9 = vpop.eup %7839  ;;  %v4953_v10 = vmul.f32 0.03125, %v4931_v20 }
 0xefd   :  { %v7842_v31 = vpop.eup %7841  ;;  %v4970_v13 = vadd.f32 1e-05, %v4954_v36  ;;  %v4998_v43 = vmul.f32 %v7840_v9, %v10106_v60 }
 0xefe   :  { %v4969_v34 = vadd.f32 1e-05, %v4953_v10  ;;  %v4940_v53 = vpop.xlane.xlu1 %4939  ;;  %v4997_v25 = vmul.f32 %v7842_v31, %v10109_v40 }
 0xeff   :  { %7847 = vrsqrt.f32 %v4970_v13  ;;  %v4956_v15 = vmul.f32 0.03125, %v4940_v53  ;;  %v4937_v63 = vpop.xlane.xlu0 %4936  ;;  %v5018_v57 = vmul.f32 %v10156_v52, %v4998_v43 }
 0xf00   :  { %7849 = vrsqrt.f32 %v4969_v34  ;;  %v4955_v14 = vmul.f32 0.03125, %v4937_v63  ;;  %v5017_v8 = vmul.f32 %v10156_v52, %v4997_v25 }
 0xf01   :  { %v4972_v54 = vadd.f32 1e-05, %v4956_v15  ;;  %v5038_v60 = vadd.f32 %v10160_v27, %v5018_v57 }
 0xf02   :  { %v4971_v11 = vadd.f32 1e-05, %v4955_v14  ;;  %v5037_v47 = vadd.f32 %v10160_v27, %v5017_v8 }
 0xf03   :  { %v7844_v51 = vpop.eup %7843  ;;  %7851 = vrsqrt.f32 %v4972_v54 }
 0xf04   :  { %v7846_v22 = vpop.eup %7845  ;;  %7853 = vrsqrt.f32 %v4971_v11  ;;  %6847 = vmatprep.mubr.msk.f32.mxu0 %vm45_vm0, %v5037_v47  ;;  %v5000_v40 = vmul.f32 %v7844_v51, %v10118_v41 }
 0xf05   :  { %6848 = vmatmul.mubr.msk.f32.gmra.mrb[88].mxu0 %vm45_vm0, %v5038_v60  ;;  %v4999_v59 = vmul.f32 %v7846_v22, %v10121_v18 }
 0xf06   :  { %v5020_v37 = vmul.f32 %v10156_v52, %v5000_v40 }
 0xf07   :  { %v5019_v4 = vmul.f32 %v10156_v52, %v4999_v59 }
 0xf08   :  { %v5040_v38 = vadd.f32 %v10160_v27, %v5020_v37 }
 0xf09   :  { %v7848_v19 = vpop.eup %7847  ;;  %v5039_v2 = vadd.f32 %v10160_v27, %v5019_v4 }
 0xf0a   :  { %v7850_v50 = vpop.eup %7849  ;;  %v5002_v44 = vmul.f32 %v7848_v19, %v10130_v55 }
 0xf0b   :  { %6850 = vmatprep.mubr.msk.f32.mxu0 %vm45_vm0, %v5039_v2  ;;  %v5001_v41 = vmul.f32 %v7850_v50, %v10133_v0 }
 0xf0c   :  { %6851 = vmatmul.mubr.msk.f32.gmra.mrb[90].mxu0 %vm45_vm0, %v5040_v38  ;;  %v5022_v18 = vmul.f32 %v10156_v52, %v5002_v44 }
 0xf0d   :  { %v7852_v30 = vpop.eup %7851  ;;  %v5021_v33 = vmul.f32 %v10156_v52, %v5001_v41 }
 0xf0e   :  { %v7854_v12 = vpop.eup %7853  ;;  %v5004_v5 = vmul.f32 %v7852_v30, %v10140_v35  ;;  %v5042_v55 = vadd.f32 %v10160_v27, %v5022_v18  ;;  %v5047_v35 = vsub.s32 6, %v8071_v6 }
 0xf0f   :  { %v5041_v45 = vadd.f32 %v10160_v27, %v5021_v33  ;;  %v5003_v1 = vmul.f32 %v7854_v12, %v10144_v3 }
 0xf10   :  { %v5024_v7 = vmul.f32 %v10156_v52, %v5004_v5  ;;  %v10275_v3 = vrot.slane %v9870_v61, %v5047_v35 }
 0xf11   :  { %6853 = vmatprep.mubr.msk.f32.mxu0 %vm45_vm0, %v5041_v45  ;;  %v5023_v0 = vmul.f32 %v10156_v52, %v5003_v1 }
 0xf12   :  { %6854 = vmatmul.mubr.msk.f32.gmra.mrb[92].mxu0 %vm45_vm0, %v5042_v55  ;;  %v5044_v36 = vadd.f32 %v10160_v27, %v5024_v7 }
 0xf13   :  { %v5043_v16 = vadd.f32 %v10160_v27, %v5023_v0 }
 0xf15   :  { %6856 = vmatprep.mubr.msk.f32.mxu0 %vm45_vm0, %v5043_v16 }
 0xf16   :  { %6857 = vmatmul.mubr.msk.f32.gmra.mrb[94].mxu0 %vm45_vm0, %v5044_v36 }
 0xf58   :  { %v6837_v20 = vpop.f32.mrb[80].mxu0 }
 0xf59   :  { %v5169_v9 = vadd.f32 %v6837_v20, %v10275_v3  ;;  %v5163_v10 = vpop.f32.mrb[81].mxu0 }
 0xf5a   :  { %v5164_v52 = vadd.f32 %v5163_v10, %v10275_v3 }
 0xf5b   :  { %v5259_v31 = vmul.f32 0.70710677, %v5169_v9  ;;  %v5243_v50 = vmul.f32 0.5, %v5169_v9 }
 0xf5c   :  { %v5258_v13 = vmul.f32 0.70710677, %v5164_v52  ;;  %v6840_v43 = vpop.f32.mrb[82].mxu0  ;;  %v5242_v19 = vmul.f32 0.5, %v5164_v52 }
 0xf5d   :  { %7855 = verf.f32 %v5259_v31  ;;  %v5179_v27 = vadd.f32 %v6840_v43, %v10275_v3  ;;  %v5173_v34 = vpop.f32.mrb[83].mxu0 }
 0xf5e   :  { %7857 = verf.f32 %v5258_v13  ;;  %v5174_v53 = vadd.f32 %v5173_v34, %v10275_v3 }
 0xf5f   :  { %v5261_v25 = vmul.f32 0.70710677, %v5179_v27  ;;  %v5245_v5 = vmul.f32 0.5, %v5179_v27 }
 0xf60   :  { %v5260_v15 = vmul.f32 0.70710677, %v5174_v53  ;;  %v6843_v61 = vpop.f32.mrb[84].mxu0  ;;  %v5244_v33 = vmul.f32 0.5, %v5174_v53 }
 0xf61   :  { %7859 = verf.f32 %v5261_v25  ;;  %v5189_v63 = vadd.f32 %v6843_v61, %v10275_v3  ;;  %v5183_v57 = vpop.f32.mrb[85].mxu0 }
 0xf62   :  { %7861 = verf.f32 %v5260_v15  ;;  %v5184_v14 = vadd.f32 %v5183_v57, %v10275_v3 }
 0xf63   :  { %v5263_v8 = vmul.f32 0.70710677, %v5189_v63  ;;  %v5247_v35 = vmul.f32 0.5, %v5189_v63 }
 0xf64   :  { %v5262_v54 = vmul.f32 0.70710677, %v5184_v14  ;;  %v6846_v11 = vpop.f32.mrb[86].mxu0  ;;  %v5246_v16 = vmul.f32 0.5, %v5184_v14 }
 0xf65   :  { %7863 = verf.f32 %v5263_v8  ;;  %v5199_v47 = vadd.f32 %v6846_v11, %v10275_v3  ;;  %v5193_v51 = vpop.f32.mrb[87].mxu0 }
 0xf66   :  { %7865 = verf.f32 %v5262_v54  ;;  %v5194_v60 = vadd.f32 %v5193_v51, %v10275_v3 }
 0xf67   :  { %v7856_v22 = vpop.eup %7855  ;;  %v5265_v40 = vmul.f32 0.70710677, %v5199_v47  ;;  %v5249_v27 = vmul.f32 0.5, %v5199_v47 }
 0xf68   :  { %v7858_v59 = vpop.eup %7857  ;;  %v5291_v37 = vadd.f32 1.0, %v7856_v22  ;;  %v5264_v4 = vmul.f32 0.70710677, %v5194_v60  ;;  %v5248_v13 = vmul.f32 0.5, %v5194_v60 }
 0xf69   :  { %v5290_v2 = vadd.f32 1.0, %v7858_v59  ;;  %7867 = verf.f32 %v5265_v40 }
 0xf6a   :  { %7869 = verf.f32 %v5264_v4  ;;  %v5307_v18 = vmul.f32 %v5291_v37, %v5243_v50 }
 0xf6b   :  { %v7860_v38 = vpop.eup %7859  ;;  %v5306_v44 = vmul.f32 %v5290_v2, %v5242_v19 }
 0xf6c   :  { %v7862_v41 = vpop.eup %7861  ;;  %v5293_v30 = vadd.f32 1.0, %v7860_v38 }
 0xf6d   :  { %v5292_v12 = vadd.f32 1.0, %v7862_v41  ;;  %6891 = vmatprep.mubr.f32.mxu0 %v5306_v44 }
 0xf6e   :  { %6892 = vmatmul.mubr.f32.vlgmr.msra.gmra.mrb[96].mxu0 %v5307_v18  ;;  %v5309_v0 = vmul.f32 %v5293_v30, %v5245_v5 }
 0xf6f   :  { %v7864_v45 = vpop.eup %7863  ;;  %v5308_v1 = vmul.f32 %v5292_v12, %v5244_v33 }
 0xf70   :  { %v7866_v55 = vpop.eup %7865  ;;  %v5295_v7 = vadd.f32 1.0, %v7864_v45 }
 0xf71   :  { %v5294_v36 = vadd.f32 1.0, %v7866_v55  ;;  %6894 = vmatprep.mubr.f32.mxu0 %v5308_v1 }
 0xf72   :  { %6895 = vmatmul.mubr.f32.gmra.mrb[98].mxu0 %v5309_v0  ;;  %v5311_v31 = vmul.f32 %v5295_v7, %v5247_v35 }
 0xf73   :  { %v7868_v20 = vpop.eup %7867  ;;  %v5310_v9 = vmul.f32 %v5294_v36, %v5246_v16 }
 0xf74   :  { %v7870_v10 = vpop.eup %7869  ;;  %v5297_v52 = vadd.f32 1.0, %v7868_v20 }
 0xf75   :  { %v5296_v43 = vadd.f32 1.0, %v7870_v10  ;;  %6897 = vmatprep.mubr.f32.mxu0 %v5310_v9 }
 0xf76   :  { %6898 = vmatmul.mubr.f32.gmra.mrb[100].mxu0 %v5311_v31  ;;  %v5313_v53 = vmul.f32 %v5297_v52, %v5249_v27 }
 0xf77   :  { %v5312_v34 = vmul.f32 %v5296_v43, %v5248_v13 }
 0xf79   :  { %6900 = vmatprep.mubr.f32.mxu1 %v5312_v34 }
 0xf7a   :  { %6901 = vmatmul.mubr.f32.vlgmr.msra.gmra.mrb[80].mxu1 %v5313_v53 }
 0xfd8   :  { %v6849_v25 = vpop.f32.mrb[88].mxu0 }
 0xfd9   :  { %v5209_v15 = vadd.f32 %v6849_v25, %v10275_v3  ;;  %v5203_v61 = vpop.f32.mrb[89].mxu0 }
 0xfda   :  { %v5204_v63 = vadd.f32 %v5203_v61, %v10275_v3 }
 0xfdb   :  { %v5267_v57 = vmul.f32 0.70710677, %v5209_v15  ;;  %v5251_v30 = vmul.f32 0.5, %v5209_v15 }
 0xfdc   :  { %v5266_v14 = vmul.f32 0.70710677, %v5204_v63  ;;  %v5250_v38 = vmul.f32 0.5, %v5204_v63 }
 0xfdd   :  { %7871 = verf.f32 %v5267_v57 }
 0xfde   :  { %7873 = verf.f32 %v5266_v14 }
 0xfdf   :  { %v6852_v8 = vpop.f32.mrb[90].mxu0 }
 0xfe0   :  { %v5219_v54 = vadd.f32 %v6852_v8, %v10275_v3  ;;  %v5213_v11 = vpop.f32.mrb[91].mxu0 }
 0xfe1   :  { %v5214_v47 = vadd.f32 %v5213_v11, %v10275_v3 }
 0xfe2   :  { %v5269_v51 = vmul.f32 0.70710677, %v5219_v54  ;;  %v5253_v9 = vmul.f32 0.5, %v5219_v54 }
 0xfe3   :  { %v5268_v60 = vmul.f32 0.70710677, %v5214_v47  ;;  %v5252_v35 = vmul.f32 0.5, %v5214_v47  ;;  %v5340_v47 = vsub.s32 7, %v8071_v6 }
 0xfe4   :  { %7875 = verf.f32 %v5269_v51  ;;  %v7938_v51 = vld [vmem:[%s10379_s1] sm:$0xff] }
 0xfe5   :  { %7877 = verf.f32 %v5268_v60  ;;  %v6855_v22 = vpop.f32.mrb[92].mxu0  ;;  %v5341_v60 = vrot.slane %v7938_v51, %v5340_v47 }
 0xfe6   :  { %v5229_v40 = vadd.f32 %v6855_v22, %v10275_v3  ;;  %v5223_v59 = vpop.f32.mrb[93].mxu0 }
 0xfe7   :  { %v7872_v37 = vpop.eup %7871  ;;  %v5224_v4 = vadd.f32 %v5223_v59, %v10275_v3 }
 0xfe8   :  { %v7874_v19 = vpop.eup %7873  ;;  %v5299_v2 = vadd.f32 1.0, %v7872_v37  ;;  %v5271_v50 = vmul.f32 0.70710677, %v5229_v40  ;;  %v5255_v34 = vmul.f32 0.5, %v5229_v40 }
 0xfe9   :  { %v5298_v44 = vadd.f32 1.0, %v7874_v19  ;;  %v5270_v41 = vmul.f32 0.70710677, %v5224_v4  ;;  %v6858_v18 = vpop.f32.mrb[94].mxu0  ;;  %v5254_v43 = vmul.f32 0.5, %v5224_v4 }
 0xfea   :  { %7879 = verf.f32 %v5271_v50  ;;  %v5239_v33 = vadd.f32 %v6858_v18, %v10275_v3  ;;  %v5233_v12 = vpop.f32.mrb[95].mxu0  ;;  %v5315_v55 = vmul.f32 %v5299_v2, %v5251_v30 }
 0xfeb   :  { %7881 = verf.f32 %v5270_v41  ;;  %v5234_v5 = vadd.f32 %v5233_v12, %v10275_v3  ;;  %v5314_v45 = vmul.f32 %v5298_v44, %v5250_v38 }
 0xfec   :  { %v5273_v1 = vmul.f32 0.70710677, %v5239_v33  ;;  %v5257_v8 = vmul.f32 0.5, %v5239_v33 }
 0xfed   :  { %v5272_v7 = vmul.f32 0.70710677, %v5234_v5  ;;  %6903 = vmatprep.mubr.f32.mxu1 %v5314_v45  ;;  %v5256_v57 = vmul.f32 0.5, %v5234_v5 }
 0xfee   :  { %v7876_v0 = vpop.eup %7875  ;;  %7883 = verf.f32 %v5273_v1  ;;  %6904 = vmatmul.mubr.f32.gmra.mrb[82].mxu1 %v5315_v55 }
 0xfef   :  { %v7878_v16 = vpop.eup %7877  ;;  %v5301_v36 = vadd.f32 1.0, %v7876_v0  ;;  %7885 = verf.f32 %v5272_v7 }
 0xff0   :  { %v5300_v20 = vadd.f32 1.0, %v7878_v16 }
 0xff1   :  { %v5317_v52 = vmul.f32 %v5301_v36, %v5253_v9 }
 0xff2   :  { %v5316_v10 = vmul.f32 %v5300_v20, %v5252_v35 }
 0xff4   :  { %v7880_v31 = vpop.eup %7879  ;;  %6906 = vmatprep.mubr.f32.mxu1 %v5316_v10 }
 0xff5   :  { %v7882_v13 = vpop.eup %7881  ;;  %v5303_v3 = vadd.f32 1.0, %v7880_v31  ;;  %6907 = vmatmul.mubr.f32.gmra.mrb[84].mxu1 %v5317_v52 }
 0xff6   :  { %v5302_v27 = vadd.f32 1.0, %v7882_v13 }
 0xff7   :  { %v5319_v63 = vmul.f32 %v5303_v3, %v5255_v34 }
 0xff8   :  { %v7884_v53 = vpop.eup %7883  ;;  %v5318_v25 = vmul.f32 %v5302_v27, %v5254_v43 }
 0xff9   :  { %v7886_v15 = vpop.eup %7885  ;;  %v5305_v61 = vadd.f32 1.0, %v7884_v53 }
 0xffa   :  { %v5304_v14 = vadd.f32 1.0, %v7886_v15  ;;  %6909 = vmatprep.mubr.f32.mxu1 %v5318_v25 }
 0xffb   :  { %6910 = vmatmul.mubr.f32.gmra.mrb[86].mxu1 %v5319_v63  ;;  %v5321_v11 = vmul.f32 %v5305_v61, %v5257_v8 }
 0xffc   :  { %v5320_v54 = vmul.f32 %v5304_v14, %v5256_v57 }
 0xffe   :  { %6912 = vmatprep.mubr.f32.mxu1 %v5320_v54 }
 0xfff   :  { %6913 = vmatmul.mubr.f32.gmra.mrb[88].mxu1 %v5321_v11 }
0x1041   :  { %v6893_v22 = vpop.f32.mrb[96].mxu0 }
0x1042   :  { %v5414_v40 = vadd.f32 %v6893_v22, %v5341_v60  ;;  %v5408_v59 = vpop.f32.mrb[97].mxu0 }
0x1043   :  { %v5409_v37 = vadd.f32 %v5408_v59, %v5341_v60 }
0x1044   :  { %v5488_v4 = vadd.f32 %v9906_v58, %v5414_v40 }
0x1045   :  { %v5487_v19 = vadd.f32 %v9909_v29, %v5409_v37  ;;  %v6896_v2 = vpop.f32.mrb[98].mxu0 }
0x1046   :  { %5504 = vst.msk [vmem:[%s10382_s5 + $0x8] sm:$0xff] %vm45_vm0, %v5488_v4  ;;  %v5424_v6 = vadd.f32 %v6896_v2, %v5341_v60  ;;  %v5418_v50 = vpop.f32.mrb[99].mxu0 }
0x1047   :  { %5503 = vst.msk [vmem:[%s10382_s5] sm:$0xff] %vm45_vm0, %v5487_v19  ;;  %v5419_v38 = vadd.f32 %v5418_v50, %v5341_v60 }
0x1048   :  { %v5490_v44 = vadd.f32 %v9924_v26, %v5424_v6 }
0x1049   :  { %v5489_v58 = vadd.f32 %v9927_v17, %v5419_v38  ;;  %v6899_v41 = vpop.f32.mrb[100].mxu0 }
0x104a   :  { %5506 = vst.msk [vmem:[%s10382_s5 + $0x18] sm:$0xff] %vm45_vm0, %v5490_v44  ;;  %v5434_v29 = vadd.f32 %v6899_v41, %v5341_v60  ;;  %v5428_v18 = vpop.f32.mrb[101].mxu0 }
0x104b   :  { %5505 = vst.msk [vmem:[%s10382_s5 + $0x10] sm:$0xff] %vm45_vm0, %v5489_v58  ;;  %v5429_v30 = vadd.f32 %v5428_v18, %v5341_v60 }
0x104c   :  { %v5492_v33 = vadd.f32 %v9942_v32, %v5434_v29 }
0x104d   :  { %v5491_v26 = vadd.f32 %v9945_v42, %v5429_v30  ;;  %v6902_v12 = vpop.f32.mrb[80].mxu1 }
0x104e   :  { %5508 = vst.msk [vmem:[%s10382_s5 + $0x28] sm:$0xff] %vm45_vm0, %v5492_v33  ;;  %v5444_v17 = vadd.f32 %v6902_v12, %v5341_v60  ;;  %v5438_v5 = vpop.f32.mrb[81].mxu1 }
0x104f   :  { %5507 = vst.msk [vmem:[%s10382_s5 + $0x20] sm:$0xff] %vm45_vm0, %v5491_v26  ;;  %v5439_v45 = vadd.f32 %v5438_v5, %v5341_v60 }
0x1050   :  { %v5494_v1 = vadd.f32 %v9952_v48, %v5444_v17 }
0x1051   :  { %v5493_v32 = vadd.f32 %v9955_v21, %v5439_v45 }
0x1052   :  { %5510 = vst.msk [vmem:[%s10382_s5 + $0x38] sm:$0xff] %vm45_vm0, %v5494_v1 }
0x1053   :  { %5509 = vst.msk [vmem:[%s10382_s5 + $0x30] sm:$0xff] %vm45_vm0, %v5493_v32 }
0x10c1   :  { %v6905_v42 = vpop.f32.mrb[82].mxu1 }
0x10c2   :  { %v5454_v55 = vadd.f32 %v6905_v42, %v5341_v60  ;;  %v5448_v7 = vpop.f32.mrb[83].mxu1 }
0x10c3   :  { %v5449_v0 = vadd.f32 %v5448_v7, %v5341_v60 }
0x10c4   :  { %v5496_v16 = vadd.f32 %v9989_v39, %v5454_v55 }
0x10c5   :  { %v5495_v48 = vadd.f32 %v9991_v62, %v5449_v0 }
0x10c6   :  { %5512 = vst.msk [vmem:[%s10382_s5 + $0x48] sm:$0xff] %vm45_vm0, %v5496_v16 }
0x10c7   :  { %5511 = vst.msk [vmem:[%s10382_s5 + $0x40] sm:$0xff] %vm45_vm0, %v5495_v48 }
0x10c8   :  { %v6908_v21 = vpop.f32.mrb[84].mxu1 }
0x10c9   :  { %v5464_v36 = vadd.f32 %v6908_v21, %v5341_v60  ;;  %v5458_v35 = vpop.f32.mrb[85].mxu1 }
0x10ca   :  { %v5459_v20 = vadd.f32 %v5458_v35, %v5341_v60 }
0x10cb   :  { %v5498_v9 = vadd.f32 %v10005_v49, %v5464_v36 }
0x10cc   :  { %v5497_v39 = vadd.f32 %v10007_v46, %v5459_v20 }
0x10cd   :  { %5514 = vst.msk [vmem:[%s10382_s5 + $0x58] sm:$0xff] %vm45_vm0, %v5498_v9 }
0x10ce   :  { %5513 = vst.msk [vmem:[%s10382_s5 + $0x50] sm:$0xff] %vm45_vm0, %v5497_v39  ;;  %v6911_v62 = vpop.f32.mrb[86].mxu1 }
0x10cf   :  { %v5474_v10 = vadd.f32 %v6911_v62, %v5341_v60  ;;  %v5468_v52 = vpop.f32.mrb[87].mxu1 }
0x10d0   :  { %v5469_v31 = vadd.f32 %v5468_v52, %v5341_v60 }
0x10d1   :  { %v5500_v13 = vadd.f32 %v10021_v56, %v5474_v10 }
0x10d2   :  { %v5499_v49 = vadd.f32 %v10027_v23, %v5469_v31  ;;  %v6914_v3 = vpop.f32.mrb[88].mxu1 }
0x10d3   :  { %5516 = vst.msk [vmem:[%s10382_s5 + $0x68] sm:$0xff] %vm45_vm0, %v5500_v13  ;;  %v5484_v46 = vadd.f32 %v6914_v3, %v5341_v60  ;;  %v5478_v43 = vpop.f32.mrb[89].mxu1 }
0x10d4   :  { %5515 = vst.msk [vmem:[%s10382_s5 + $0x60] sm:$0xff] %vm45_vm0, %v5499_v49  ;;  %v5479_v27 = vadd.f32 %v5478_v43, %v5341_v60 }
0x10d5   :  { %v5502_v34 = vadd.f32 %v10043_v28, %v5484_v46 }
0x10d6   :  { %v5501_v56 = vadd.f32 %v10045_v24, %v5479_v27 }
0x10d7   :  { %5518 = vst.msk [vmem:[%s10382_s5 + $0x78] sm:$0xff] %vm45_vm0, %v5502_v34 }
0x10d8   :  { %5517 = vst.msk [vmem:[%s10382_s5 + $0x70] sm:$0xff] %vm45_vm0, %v5501_v56 }

</bundles_post_ra>
